<compile_context>
chip_gen: v7x
topology: tpu7x:2x2x1
jax: 0.10.0
libtpu: 0.0.40
codegen_flags: <defaults>
</compile_context>

<pallas_src>
import functools
import math

import jax
import jax.numpy as jnp
from jax import lax
from jax.experimental import pallas as pl
from jax.experimental.pallas import tpu as pltpu


# ---------------------------------------------------------------------------
# config
# ---------------------------------------------------------------------------
class Config:
    def __init__(self, data_size, input_channel, latent_size, hidden_size, pred_steps):
        self.data_size = data_size
        self.window_size = data_size
        self.input_channel = input_channel
        self.latent_size = latent_size
        self.hidden_size = hidden_size
        self.pred_steps = pred_steps
        self.layer_num = int(math.log2(data_size)) - 3
        self.max_channel = data_size * 2
        self.final_size = 4
        self.num_layers = 2


# ---------------------------------------------------------------------------
# kernel 1: fused  Linear+ReLU -> [ConvT1d+BN+ReLU]*N -> ConvT1d+Tanh -> LSTM x2
# Single pallas_call, no grid: all intermediates stay in VMEM / vregs.
# ---------------------------------------------------------------------------
def _conv_t_block(x, wblk, bcat):
    """ConvTranspose1d(k=4, s=2, p=1) with all 4 taps merged into ONE MXU matmul.

    x    : (B, L, Cin)   channels-last activation
    wblk : (3*Cin, 2*Cout)  rows = [x[j-1] | x[j] | x[j+1]] taps,
                            cols = [even outputs | odd outputs]
    bcat : (1, 2*Cout)
    returns packed (B, L, 2*Cout): [:, j, :Cout] = y[2j], [:, j, Cout:] = y[2j+1]
    """
    B, L, Cin = x.shape
    zrow = jnp.zeros((B, 1, Cin), jnp.float32)
    x_prev = jnp.concatenate([zrow, x[:, :L - 1, :]], axis=1)   # x[j-1]
    x_next = jnp.concatenate([x[:, 1:, :], zrow], axis=1)       # x[j+1]
    xin = jnp.concatenate([x_prev, x, x_next], axis=-1)         # (B, L, 3*Cin)
    y = jnp.dot(xin.reshape(B * L, 3 * Cin), wblk,
                preferred_element_type=jnp.float32) + bcat
    return y.reshape(B, L, wblk.shape[1])


def _interleave(packed, cout):
    """(B, L, 2*Cout) even/odd packed -> (B, 2L, Cout) spatially interleaved."""
    B, L, _ = packed.shape
    pieces = []
    for j in range(L):
        pieces.append(packed[:, j:j + 1, :cout])     # spatial position 2j
        pieces.append(packed[:, j:j + 1, cout:])     # spatial position 2j+1
    return jnp.concatenate(pieces, axis=1)


def _fused_kernel(*refs, dims):
    (B, L0, C0, conv_couts, Cf, H, T, num_layers) = dims
    out_ref = refs[-1]                     # (T, B, H) LSTM hidden sequence
    it = iter(refs[:-1])

    # ---- linear_layers: Linear + ReLU (weight columns pre-permuted to (l, c)) ----
    z = next(it)[...]
    w_lc = next(it)[...]
    b_lc = next(it)[...]
    y = jnp.dot(z, w_lc, preferred_element_type=jnp.float32) + b_lc
    y = jnp.maximum(y, 0.0)                                      # (B, L0*C0)
    x = jnp.concatenate(
        [y[:, l * C0:(l + 1) * C0].reshape(B, 1, C0) for l in range(L0)],
        axis=1)                                                  # (B, L0, C0)

    # ---- conv_layers: [ConvT1d + BatchNorm(batch stats) + ReLU] * layer_num ----
    for cout in conv_couts:
        wblk = next(it)[...]
        bcat = next(it)[...]
        gamma = next(it)[...]
        beta = next(it)[...]
        u = _interleave(_conv_t_block(x, wblk, bcat), cout)      # (B, 2L, Cout)
        mean = jnp.mean(u, axis=(0, 1), keepdims=True)
        var = jnp.mean(jnp.square(u - mean), axis=(0, 1), keepdims=True)
        u = (u - mean) * lax.rsqrt(var + 1e-5) * gamma + beta
        x = jnp.maximum(u, 0.0)

    # ---- final ConvT1d + Tanh, emitted directly as the time-major sequence ----
    wblk = next(it)[...]
    bcat = next(it)[...]
    packed = jnp.tanh(_conv_t_block(x, wblk, bcat))              # (B, T//2, 2*Cf)
    x_rows = jnp.concatenate(
        [packed[:, p // 2, (p % 2) * Cf:(p % 2 + 1) * Cf] for p in range(T)],
        axis=0)                                                  # (T*B, Cf), rows = (t, b)

    # ---- predict_layers: 2-layer LSTM, zero (h0, c0), PyTorch gate order i,f,g,o ----
    # TODO(synk): nn.LSTM inter-layer dropout (p=0.4) is stochastic / train-only;
    #             applied as identity (eval mode).
    for li in range(num_layers):
        w_ih = next(it)[...]                                     # (Din, 4H)
        w_hh = next(it)[...]                                     # (H, 4H)
        bias = next(it)[...]                                     # (1, 4H)
        last = li == num_layers - 1
        # input projection hoisted out of the recurrence: one big MXU matmul
        gin = jnp.dot(x_rows, w_ih, preferred_element_type=jnp.float32) + bias
        h = jnp.zeros((B, H), jnp.float32)
        c = jnp.zeros((B, H), jnp.float32)
        rows = []
        for t in range(T):                                       # statically unrolled
            g = gin[t * B:(t + 1) * B, :] + jnp.dot(
                h, w_hh, preferred_element_type=jnp.float32)     # (B, 4H)
            # sigmoid(x) = 0.5*(tanh(0.5x)+1): full-vreg EUP pushes, no divide
            sg = 0.5 * (jnp.tanh(0.5 * g) + 1.0)
            tg = jnp.tanh(g)
            c = sg[:, H:2 * H] * c + sg[:, :H] * tg[:, 2 * H:3 * H]
            h = sg[:, 3 * H:] * jnp.tanh(c)
            if last:
                out_ref[t] = h           # VMEM store; HBM writeback happens once
            else:
                rows.append(h)
        if not last:
            x_rows = jnp.concatenate(rows, axis=0)               # (T*B, H)


# ---------------------------------------------------------------------------
# kernel 2: pred_linear head (after torch's time/batch-mixing .view, done in XLA)
# ---------------------------------------------------------------------------
def _pred_kernel(x_ref, w_ref, b_ref, o_ref):
    o_ref[...] = (jnp.dot(x_ref[...], w_ref[...],
                          preferred_element_type=jnp.float32) + b_ref[...]
                  ).astype(o_ref.dtype)


# ---------------------------------------------------------------------------
# parameters (torch-like layouts) and host-side layout prep
# ---------------------------------------------------------------------------
def init_params(key, cfg):
    def normal(k, shape, scale=0.1):
        return scale * jax.random.normal(k, shape, dtype=jnp.float32)

    keys = iter(jax.random.split(key, 64))
    p = {}
    p["lin_w"] = normal(next(keys), (cfg.latent_size, cfg.final_size * cfg.max_channel))
    p["lin_b"] = normal(next(keys), (cfg.final_size * cfg.max_channel,))

    convs = []
    prev = cfg.max_channel
    for i in range(cfg.layer_num):
        cout = cfg.max_channel // 2 ** (i + 1)
        convs.append({
            "w": normal(next(keys), (prev, cout, 4)),     # torch ConvT1d: (Cin, Cout, K)
            "b": normal(next(keys), (cout,)),
            "gamma": jnp.ones((cout,), jnp.float32),
            "beta": jnp.zeros((cout,), jnp.float32),
        })
        prev = cout
    p["convs"] = convs
    p["conv_final_w"] = normal(next(keys), (prev, cfg.input_channel, 4))
    p["conv_final_b"] = normal(next(keys), (cfg.input_channel,))

    lstm = []
    din = cfg.input_channel
    for _ in range(cfg.num_layers):
        lstm.append({
            "w_ih": normal(next(keys), (4 * cfg.hidden_size, din)),
            "w_hh": normal(next(keys), (4 * cfg.hidden_size, cfg.hidden_size)),
            "b_ih": normal(next(keys), (4 * cfg.hidden_size,)),
            "b_hh": normal(next(keys), (4 * cfg.hidden_size,)),
        })
        din = cfg.hidden_size
    p["lstm"] = lstm

    p["pred_w"] = normal(next(keys), (cfg.window_size * cfg.hidden_size,
                                      cfg.pred_steps * cfg.input_channel))
    p["pred_b"] = normal(next(keys), (cfg.pred_steps * cfg.input_channel,))
    return p


def _block_conv_weight(w_pt):
    """torch ConvTranspose1d weight (Cin, Cout, 4) -> merged tap matrix (3*Cin, 2*Cout)."""
    cin, cout, _ = w_pt.shape
    zero = jnp.zeros((cin, cout), jnp.float32)
    w0, w1, w2, w3 = (w_pt[:, :, k] for k in range(4))
    return jnp.concatenate([
        jnp.concatenate([w3, zero], axis=1),   # tap on x[j-1]
        jnp.concatenate([w1, w2], axis=1),     # tap on x[j]
        jnp.concatenate([zero, w0], axis=1),   # tap on x[j+1]
    ], axis=0)


def prepare_kernel_args(params, cfg):
    """Host-side (free) layout glue: permute / merge weights for the fused kernel."""
    L0, C0, H = cfg.final_size, cfg.max_channel, cfg.hidden_size
    # linear weight: torch column order is (c, l); kernel wants (l, c)
    w_lc = params["lin_w"].reshape(cfg.latent_size, C0, L0).transpose(0, 2, 1)
    w_lc = w_lc.reshape(cfg.latent_size, L0 * C0)
    b_lc = params["lin_b"].reshape(C0, L0).T.reshape(1, L0 * C0)
    args = [w_lc, b_lc]
    conv_couts = []
    for layer in params["convs"]:
        cout = layer["w"].shape[1]
        conv_couts.append(cout)
        args += [_block_conv_weight(layer["w"]),
                 jnp.concatenate([layer["b"], layer["b"]]).reshape(1, 2 * cout),
                 layer["gamma"].reshape(1, 1, cout),
                 layer["beta"].reshape(1, 1, cout)]
    cf = cfg.input_channel
    args += [_block_conv_weight(params["conv_final_w"]),
             jnp.concatenate([params["conv_final_b"],
                              params["conv_final_b"]]).reshape(1, 2 * cf)]
    for layer in params["lstm"]:
        args += [layer["w_ih"].T,                       # (Din, 4H)
                 layer["w_hh"].T,                       # (H, 4H)
                 (layer["b_ih"] + layer["b_hh"]).reshape(1, 4 * H)]
    return args, tuple(conv_couts)


def rnn_predictor_forward(z, params, cfg):
    B = z.shape[0]
    H, T = cfg.hidden_size, cfg.window_size
    args, conv_couts = prepare_kernel_args(params, cfg)
    dims = (B, cfg.final_size, cfg.max_channel, conv_couts,
            cfg.input_channel, H, T, cfg.num_layers)
    h_seq = pl.pallas_call(
        functools.partial(_fused_kernel, dims=dims),
        out_shape=jax.ShapeDtypeStruct((T, B, H), jnp.float32),
        compiler_params=pltpu.CompilerParams(vmem_limit_bytes=32 * 1024 * 1024),
    )(z, *args)
    # torch: out.view(-1, window*hidden) on the contiguous (T, B, H) LSTM output
    # (mixes time and batch when B > 1); free HBM-level reshape between kernels.
    flat = h_seq.reshape(-1, T * H)
    out = pl.pallas_call(
        _pred_kernel,
        out_shape=jax.ShapeDtypeStruct(
            (flat.shape[0], cfg.pred_steps * cfg.input_channel), jnp.float32),
    )(flat, params["pred_w"], params["pred_b"].reshape(1, -1))
    return out.reshape(-1, cfg.pred_steps, cfg.input_channel)


# ---------------------------------------------------------------------------
# plain-JAX reference (no Pallas) for a numerical cross-check
# ---------------------------------------------------------------------------
def reference_forward(z, params, cfg):
    hp = jax.lax.Precision.HIGHEST
    B = z.shape[0]
    out = jnp.maximum(jnp.dot(z, params["lin_w"], precision=hp) + params["lin_b"], 0.0)
    x = out.reshape(B, cfg.max_channel, cfg.final_size)            # (B, C, L)

    def conv_t(x_ncl, w, b):
        Bb, cin, L = x_ncl.shape
        cout = w.shape[1]
        full = jnp.zeros((Bb, cout, 2 * L + 2), jnp.float32)
        for k in range(4):
            contrib = jnp.einsum('bcl,cd->bdl', x_ncl, w[:, :, k], precision=hp)
            full = full.at[:, :, k:k + 2 * L:2].add(contrib)
        return full[:, :, 1:2 * L + 1] + b[None, :, None]

    for layer in params["convs"]:
        x = conv_t(x, layer["w"], layer["b"])
        mean = jnp.mean(x, axis=(0, 2), keepdims=True)
        var = jnp.mean(jnp.square(x - mean), axis=(0, 2), keepdims=True)
        x = (x - mean) * jax.lax.rsqrt(var + 1e-5)
        x = x * layer["gamma"][None, :, None] + layer["beta"][None, :, None]
        x = jnp.maximum(x, 0.0)
    x = jnp.tanh(conv_t(x, params["conv_final_w"], params["conv_final_b"]))
    seq = jnp.transpose(x, (2, 0, 1))                              # (T, B, C)

    H = cfg.hidden_size
    for layer in params["lstm"]:
        T = seq.shape[0]
        h = jnp.zeros((B, H), jnp.float32)
        c = jnp.zeros((B, H), jnp.float32)
        outs = []
        for t in range(T):
            g = (jnp.dot(seq[t], layer["w_ih"].T, precision=hp)
                 + jnp.dot(h, layer["w_hh"].T, precision=hp)
                 + layer["b_ih"] + layer["b_hh"])
            i = jax.nn.sigmoid(g[:, 0 * H:1 * H])
            f = jax.nn.sigmoid(g[:, 1 * H:2 * H])
            gg = jnp.tanh(g[:, 2 * H:3 * H])
            o = jax.nn.sigmoid(g[:, 3 * H:4 * H])
            c = f * c + i * gg
            h = o * jnp.tanh(c)
            outs.append(h)
        seq = jnp.stack(outs, axis=0)
    flat = seq.reshape(-1, cfg.window_size * cfg.hidden_size)
    out = jnp.dot(flat, params["pred_w"], precision=hp) + params["pred_b"]
    return out.reshape(-1, cfg.pred_steps, cfg.input_channel)


if __name__ == "__main__":
    cfg = Config(data_size=16, input_channel=4, latent_size=8, hidden_size=32, pred_steps=4)
    key = jax.random.PRNGKey(0)
    pkey, zkey = jax.random.split(key)
    params = init_params(pkey, cfg)

    batch = 2
    z = jax.random.normal(zkey, (batch, cfg.latent_size), dtype=jnp.float32)

    fwd = jax.jit(lambda zz: rnn_predictor_forward(zz, params, cfg))
    out = jax.block_until_ready(fwd(z))
    assert out.shape == (batch, cfg.pred_steps, cfg.input_channel), out.shape
    assert bool(jnp.all(jnp.isfinite(out)))

    # numerical cross-check against the plain-JAX reference
    ref = reference_forward(z, params, cfg)
    max_diff = float(jnp.max(jnp.abs(out - ref)))
    assert max_diff < 5e-2, f"kernel/reference mismatch: max|diff|={max_diff}"

    print("KERNEL_OK")
</pallas_src>

<mosaic_0001>
module attributes {stable_mosaic.version = 11 : i64} {
  func.func @_pred_kernel(%arg0: memref<2x512xf32, #tpu.memory_space<vmem>>, %arg1: memref<512x16xf32, #tpu.memory_space<vmem>>, %arg2: memref<1x16xf32, #tpu.memory_space<vmem>>, %arg3: memref<2x16xf32, #tpu.memory_space<vmem>>) attributes {dimension_semantics = [], scalar_prefetch = 0 : i64, scratch_operands = 0 : i64, tpu.core_type = #tpu.core_type<tc>} {
    %c0 = arith.constant 0 : index
    %c0_0 = arith.constant 0 : index
    %0 = vector.load %arg0[%c0, %c0_0] : memref<2x512xf32, #tpu.memory_space<vmem>>, vector<2x512xf32>
    %c0_1 = arith.constant 0 : index
    %c0_2 = arith.constant 0 : index
    %1 = vector.load %arg1[%c0_1, %c0_2] : memref<512x16xf32, #tpu.memory_space<vmem>>, vector<512x16xf32>
    %cst = arith.constant dense<0.000000e+00> : vector<2x16xf32>
    %2 = tpu.matmul %0, %1, %cst {dimension_numbers = #tpu.dot_dimension_numbers<[1], [0], [0], [1], [0, 0, 1, 1], [], []>} : vector<2x512xf32>, vector<512x16xf32>, vector<2x16xf32> -> vector<2x16xf32>
    %c0_3 = arith.constant 0 : index
    %c0_4 = arith.constant 0 : index
    %3 = vector.load %arg2[%c0_3, %c0_4] : memref<1x16xf32, #tpu.memory_space<vmem>>, vector<1x16xf32>
    %4 = vector.broadcast %3 : vector<1x16xf32> to vector<2x16xf32>
    %5 = arith.addf %2, %4 : vector<2x16xf32>
    %c0_5 = arith.constant 0 : index
    %c0_6 = arith.constant 0 : index
    %6 = vector.load %arg3[%c0_5, %c0_6] : memref<2x16xf32, #tpu.memory_space<vmem>>, vector<2x16xf32>
    tpu.vector_store %arg3[%c0_5, %c0_6], %5 {strides = array<i32>} : memref<2x16xf32, #tpu.memory_space<vmem>>, vector<2x16xf32>,
    return
  }
}

module attributes {stable_mosaic.version = 11 : i64} {
  func.func @_fused_kernel(%arg0: memref<2x8xf32, #tpu.memory_space<vmem>>, %arg1: memref<8x128xf32, #tpu.memory_space<vmem>>, %arg2: memref<1x128xf32, #tpu.memory_space<vmem>>, %arg3: memref<96x32xf32, #tpu.memory_space<vmem>>, %arg4: memref<1x32xf32, #tpu.memory_space<vmem>>, %arg5: memref<1x1x16xf32, #tpu.memory_space<vmem>>, %arg6: memref<1x1x16xf32, #tpu.memory_space<vmem>>, %arg7: memref<48x8xf32, #tpu.memory_space<vmem>>, %arg8: memref<1x8xf32, #tpu.memory_space<vmem>>, %arg9: memref<4x128xf32, #tpu.memory_space<vmem>>, %arg10: memref<32x128xf32, #tpu.memory_space<vmem>>, %arg11: memref<1x128xf32, #tpu.memory_space<vmem>>, %arg12: memref<32x128xf32, #tpu.memory_space<vmem>>, %arg13: memref<32x128xf32, #tpu.memory_space<vmem>>, %arg14: memref<1x128xf32, #tpu.memory_space<vmem>>, %arg15: memref<16x2x32xf32, #tpu.memory_space<vmem>>) attributes {dimension_semantics = [], scalar_prefetch = 0 : i64, scratch_operands = 0 : i64, tpu.core_type = #tpu.core_type<tc>} {
    %c0 = arith.constant 0 : index
    %c0_0 = arith.constant 0 : index
    %0 = vector.load %arg0[%c0, %c0_0] : memref<2x8xf32, #tpu.memory_space<vmem>>, vector<2x8xf32>
    %c0_1 = arith.constant 0 : index
    %c0_2 = arith.constant 0 : index
    %1 = vector.load %arg1[%c0_1, %c0_2] : memref<8x128xf32, #tpu.memory_space<vmem>>, vector<8x128xf32>
    %c0_3 = arith.constant 0 : index
    %c0_4 = arith.constant 0 : index
    %2 = vector.load %arg2[%c0_3, %c0_4] : memref<1x128xf32, #tpu.memory_space<vmem>>, vector<1x128xf32>
    %cst = arith.constant dense<0.000000e+00> : vector<2x128xf32>
    %3 = tpu.matmul %0, %1, %cst {dimension_numbers = #tpu.dot_dimension_numbers<[1], [0], [0], [1], [0, 0, 1, 1], [], []>} : vector<2x8xf32>, vector<8x128xf32>, vector<2x128xf32> -> vector<2x128xf32>
    %4 = vector.broadcast %2 : vector<1x128xf32> to vector<2x128xf32>
    %5 = arith.addf %3, %4 : vector<2x128xf32>
    %cst_5 = arith.constant 0.000000e+00 : f32
    %6 = vector.broadcast %cst_5 : f32 to vector<2x128xf32>
    %7 = arith.maximumf %5, %6 : vector<2x128xf32>
    %8 = vector.extract_strided_slice %7 {offsets = [0, 0], sizes = [2, 32], strides = [1, 1]} : vector<2x128xf32> to vector<2x32xf32>
    %9 = vector.shape_cast %8 : vector<2x32xf32> to vector<2x1x32xf32>
    %10 = vector.extract_strided_slice %7 {offsets = [0, 32], sizes = [2, 32], strides = [1, 1]} : vector<2x128xf32> to vector<2x32xf32>
    %11 = vector.shape_cast %10 : vector<2x32xf32> to vector<2x1x32xf32>
    %12 = vector.extract_strided_slice %7 {offsets = [0, 64], sizes = [2, 32], strides = [1, 1]} : vector<2x128xf32> to vector<2x32xf32>
    %13 = vector.shape_cast %12 : vector<2x32xf32> to vector<2x1x32xf32>
    %14 = vector.extract_strided_slice %7 {offsets = [0, 96], sizes = [2, 32], strides = [1, 1]} : vector<2x128xf32> to vector<2x32xf32>
    %15 = vector.shape_cast %14 : vector<2x32xf32> to vector<2x1x32xf32>
    %16 = tpu.concatenate %9, %11, %13, %15 in 1 : vector<2x1x32xf32>, vector<2x1x32xf32>, vector<2x1x32xf32>, vector<2x1x32xf32> -> vector<2x4x32xf32>
    %c0_6 = arith.constant 0 : index
    %c0_7 = arith.constant 0 : index
    %17 = vector.load %arg3[%c0_6, %c0_7] : memref<96x32xf32, #tpu.memory_space<vmem>>, vector<96x32xf32>
    %c0_8 = arith.constant 0 : index
    %c0_9 = arith.constant 0 : index
    %18 = vector.load %arg4[%c0_8, %c0_9] : memref<1x32xf32, #tpu.memory_space<vmem>>, vector<1x32xf32>
    %c0_10 = arith.constant 0 : index
    %c0_11 = arith.constant 0 : index
    %c0_12 = arith.constant 0 : index
    %19 = vector.load %arg5[%c0_10, %c0_11, %c0_12] : memref<1x1x16xf32, #tpu.memory_space<vmem>>, vector<1x1x16xf32>
    %c0_13 = arith.constant 0 : index
    %c0_14 = arith.constant 0 : index
    %c0_15 = arith.constant 0 : index
    %20 = vector.load %arg6[%c0_13, %c0_14, %c0_15] : memref<1x1x16xf32, #tpu.memory_space<vmem>>, vector<1x1x16xf32>
    %cst_16 = arith.constant 0.000000e+00 : f32
    %21 = vector.broadcast %cst_16 : f32 to vector<2x1x32xf32>
    %22 = vector.extract_strided_slice %16 {offsets = [0, 0, 0], sizes = [2, 3, 32], strides = [1, 1, 1]} : vector<2x4x32xf32> to vector<2x3x32xf32>
    %23 = tpu.concatenate %21, %22 in 1 : vector<2x1x32xf32>, vector<2x3x32xf32> -> vector<2x4x32xf32>
    %24 = vector.extract_strided_slice %16 {offsets = [0, 1, 0], sizes = [2, 3, 32], strides = [1, 1, 1]} : vector<2x4x32xf32> to vector<2x3x32xf32>
    %25 = tpu.concatenate %24, %21 in 1 : vector<2x3x32xf32>, vector<2x1x32xf32> -> vector<2x4x32xf32>
    %26 = tpu.concatenate %23, %16, %25 in 2 : vector<2x4x32xf32>, vector<2x4x32xf32>, vector<2x4x32xf32> -> vector<2x4x96xf32>
    %27 = vector.shape_cast %26 : vector<2x4x96xf32> to vector<8x96xf32>
    %cst_17 = arith.constant dense<0.000000e+00> : vector<8x32xf32>
    %28 = tpu.matmul %27, %17, %cst_17 {dimension_numbers = #tpu.dot_dimension_numbers<[1], [0], [0], [1], [0, 0, 1, 1], [], []>} : vector<8x96xf32>, vector<96x32xf32>, vector<8x32xf32> -> vector<8x32xf32>
    %29 = vector.broadcast %18 : vector<1x32xf32> to vector<8x32xf32>
    %30 = arith.addf %28, %29 : vector<8x32xf32>
    %31 = vector.shape_cast %30 : vector<8x32xf32> to vector<2x4x32xf32>
    %32 = vector.extract_strided_slice %31 {offsets = [0, 0, 0], sizes = [2, 1, 16], strides = [1, 1, 1]} : vector<2x4x32xf32> to vector<2x1x16xf32>
    %33 = vector.extract_strided_slice %31 {offsets = [0, 0, 16], sizes = [2, 1, 16], strides = [1, 1, 1]} : vector<2x4x32xf32> to vector<2x1x16xf32>
    %34 = vector.extract_strided_slice %31 {offsets = [0, 1, 0], sizes = [2, 1, 16], strides = [1, 1, 1]} : vector<2x4x32xf32> to vector<2x1x16xf32>
    %35 = vector.extract_strided_slice %31 {offsets = [0, 1, 16], sizes = [2, 1, 16], strides = [1, 1, 1]} : vector<2x4x32xf32> to vector<2x1x16xf32>
    %36 = vector.extract_strided_slice %31 {offsets = [0, 2, 0], sizes = [2, 1, 16], strides = [1, 1, 1]} : vector<2x4x32xf32> to vector<2x1x16xf32>
    %37 = vector.extract_strided_slice %31 {offsets = [0, 2, 16], sizes = [2, 1, 16], strides = [1, 1, 1]} : vector<2x4x32xf32> to vector<2x1x16xf32>
    %38 = vector.extract_strided_slice %31 {offsets = [0, 3, 0], sizes = [2, 1, 16], strides = [1, 1, 1]} : vector<2x4x32xf32> to vector<2x1x16xf32>
    %39 = vector.extract_strided_slice %31 {offsets = [0, 3, 16], sizes = [2, 1, 16], strides = [1, 1, 1]} : vector<2x4x32xf32> to vector<2x1x16xf32>
    %40 = tpu.concatenate %32, %33, %34, %35, %36, %37, %38, %39 in 1 : vector<2x1x16xf32>, vector<2x1x16xf32>, vector<2x1x16xf32>, vector<2x1x16xf32>, vector<2x1x16xf32>, vector<2x1x16xf32>, vector<2x1x16xf32>, vector<2x1x16xf32> -> vector<2x8x16xf32>
    %cst_18 = arith.constant dense<0.000000e+00> : vector<16xf32>
    %41 = vector.multi_reduction <add>, %40, %cst_18 [0, 1] : vector<2x8x16xf32> to vector<16xf32>
    %42 = vector.shape_cast %41 : vector<16xf32> to vector<1x1x16xf32>
    %cst_19 = arith.constant 1.600000e+01 : f32
    %43 = vector.broadcast %cst_19 : f32 to vector<1x1x16xf32>
    %44 = arith.divf %42, %43 : vector<1x1x16xf32>
    %45 = vector.broadcast %44 : vector<1x1x16xf32> to vector<2x8x16xf32>
    %46 = arith.subf %40, %45 : vector<2x8x16xf32>
    %47 = arith.mulf %46, %46 : vector<2x8x16xf32>
    %cst_20 = arith.constant dense<0.000000e+00> : vector<16xf32>
    %48 = vector.multi_reduction <add>, %47, %cst_20 [0, 1] : vector<2x8x16xf32> to vector<16xf32>
    %49 = vector.shape_cast %48 : vector<16xf32> to vector<1x1x16xf32>
    %cst_21 = arith.constant 1.600000e+01 : f32
    %50 = vector.broadcast %cst_21 : f32 to vector<1x1x16xf32>
    %51 = arith.divf %49, %50 : vector<1x1x16xf32>
    %52 = vector.broadcast %44 : vector<1x1x16xf32> to vector<2x8x16xf32>
    %53 = arith.subf %40, %52 : vector<2x8x16xf32>
    %cst_22 = arith.constant 9.99999974E-6 : f32
    %54 = vector.broadcast %cst_22 : f32 to vector<1x1x16xf32>
    %55 = arith.addf %51, %54 : vector<1x1x16xf32>
    %56 = math.rsqrt %55 : vector<1x1x16xf32>
    %57 = vector.broadcast %56 : vector<1x1x16xf32> to vector<2x8x16xf32>
    %58 = arith.mulf %53, %57 : vector<2x8x16xf32>
    %59 = vector.broadcast %19 : vector<1x1x16xf32> to vector<2x8x16xf32>
    %60 = arith.mulf %58, %59 : vector<2x8x16xf32>
    %61 = vector.broadcast %20 : vector<1x1x16xf32> to vector<2x8x16xf32>
    %62 = arith.addf %60, %61 : vector<2x8x16xf32>
    %cst_23 = arith.constant 0.000000e+00 : f32
    %63 = vector.broadcast %cst_23 : f32 to vector<2x8x16xf32>
    %64 = arith.maximumf %62, %63 : vector<2x8x16xf32>
    %c0_24 = arith.constant 0 : index
    %c0_25 = arith.constant 0 : index
    %65 = vector.load %arg7[%c0_24, %c0_25] : memref<48x8xf32, #tpu.memory_space<vmem>>, vector<48x8xf32>
    %c0_26 = arith.constant 0 : index
    %c0_27 = arith.constant 0 : index
    %66 = vector.load %arg8[%c0_26, %c0_27] : memref<1x8xf32, #tpu.memory_space<vmem>>, vector<1x8xf32>
    %cst_28 = arith.constant 0.000000e+00 : f32
    %67 = vector.broadcast %cst_28 : f32 to vector<2x1x16xf32>
    %68 = vector.extract_strided_slice %64 {offsets = [0, 0, 0], sizes = [2, 7, 16], strides = [1, 1, 1]} : vector<2x8x16xf32> to vector<2x7x16xf32>
    %69 = tpu.concatenate %67, %68 in 1 : vector<2x1x16xf32>, vector<2x7x16xf32> -> vector<2x8x16xf32>
    %70 = vector.extract_strided_slice %64 {offsets = [0, 1, 0], sizes = [2, 7, 16], strides = [1, 1, 1]} : vector<2x8x16xf32> to vector<2x7x16xf32>
    %71 = tpu.concatenate %70, %67 in 1 : vector<2x7x16xf32>, vector<2x1x16xf32> -> vector<2x8x16xf32>
    %72 = tpu.concatenate %69, %64, %71 in 2 : vector<2x8x16xf32>, vector<2x8x16xf32>, vector<2x8x16xf32> -> vector<2x8x48xf32>
    %73 = vector.shape_cast %72 : vector<2x8x48xf32> to vector<16x48xf32>
    %cst_29 = arith.constant dense<0.000000e+00> : vector<16x8xf32>
    %74 = tpu.matmul %73, %65, %cst_29 {dimension_numbers = #tpu.dot_dimension_numbers<[1], [0], [0], [1], [0, 0, 1, 1], [], []>} : vector<16x48xf32>, vector<48x8xf32>, vector<16x8xf32> -> vector<16x8xf32>
    %75 = vector.broadcast %66 : vector<1x8xf32> to vector<16x8xf32>
    %76 = arith.addf %74, %75 : vector<16x8xf32>
    %77 = vector.shape_cast %76 : vector<16x8xf32> to vector<2x8x8xf32>
    %78 = math.tanh %77 : vector<2x8x8xf32>
    %79 = vector.extract_strided_slice %78 {offsets = [0, 0, 0], sizes = [2, 1, 4], strides = [1, 1, 1]} : vector<2x8x8xf32> to vector<2x1x4xf32>
    %80 = vector.shape_cast %79 : vector<2x1x4xf32> to vector<2x4xf32>
    %81 = vector.extract_strided_slice %78 {offsets = [0, 0, 4], sizes = [2, 1, 4], strides = [1, 1, 1]} : vector<2x8x8xf32> to vector<2x1x4xf32>
    %82 = vector.shape_cast %81 : vector<2x1x4xf32> to vector<2x4xf32>
    %83 = vector.extract_strided_slice %78 {offsets = [0, 1, 0], sizes = [2, 1, 4], strides = [1, 1, 1]} : vector<2x8x8xf32> to vector<2x1x4xf32>
    %84 = vector.shape_cast %83 : vector<2x1x4xf32> to vector<2x4xf32>
    %85 = vector.extract_strided_slice %78 {offsets = [0, 1, 4], sizes = [2, 1, 4], strides = [1, 1, 1]} : vector<2x8x8xf32> to vector<2x1x4xf32>
    %86 = vector.shape_cast %85 : vector<2x1x4xf32> to vector<2x4xf32>
    %87 = vector.extract_strided_slice %78 {offsets = [0, 2, 0], sizes = [2, 1, 4], strides = [1, 1, 1]} : vector<2x8x8xf32> to vector<2x1x4xf32>
    %88 = vector.shape_cast %87 : vector<2x1x4xf32> to vector<2x4xf32>
    %89 = vector.extract_strided_slice %78 {offsets = [0, 2, 4], sizes = [2, 1, 4], strides = [1, 1, 1]} : vector<2x8x8xf32> to vector<2x1x4xf32>
    %90 = vector.shape_cast %89 : vector<2x1x4xf32> to vector<2x4xf32>
    %91 = vector.extract_strided_slice %78 {offsets = [0, 3, 0], sizes = [2, 1, 4], strides = [1, 1, 1]} : vector<2x8x8xf32> to vector<2x1x4xf32>
    %92 = vector.shape_cast %91 : vector<2x1x4xf32> to vector<2x4xf32>
    %93 = vector.extract_strided_slice %78 {offsets = [0, 3, 4], sizes = [2, 1, 4], strides = [1, 1, 1]} : vector<2x8x8xf32> to vector<2x1x4xf32>
    %94 = vector.shape_cast %93 : vector<2x1x4xf32> to vector<2x4xf32>
    %95 = vector.extract_strided_slice %78 {offsets = [0, 4, 0], sizes = [2, 1, 4], strides = [1, 1, 1]} : vector<2x8x8xf32> to vector<2x1x4xf32>
    %96 = vector.shape_cast %95 : vector<2x1x4xf32> to vector<2x4xf32>
    %97 = vector.extract_strided_slice %78 {offsets = [0, 4, 4], sizes = [2, 1, 4], strides = [1, 1, 1]} : vector<2x8x8xf32> to vector<2x1x4xf32>
    %98 = vector.shape_cast %97 : vector<2x1x4xf32> to vector<2x4xf32>
    %99 = vector.extract_strided_slice %78 {offsets = [0, 5, 0], sizes = [2, 1, 4], strides = [1, 1, 1]} : vector<2x8x8xf32> to vector<2x1x4xf32>
    %100 = vector.shape_cast %99 : vector<2x1x4xf32> to vector<2x4xf32>
    %101 = vector.extract_strided_slice %78 {offsets = [0, 5, 4], sizes = [2, 1, 4], strides = [1, 1, 1]} : vector<2x8x8xf32> to vector<2x1x4xf32>
    %102 = vector.shape_cast %101 : vector<2x1x4xf32> to vector<2x4xf32>
    %103 = vector.extract_strided_slice %78 {offsets = [0, 6, 0], sizes = [2, 1, 4], strides = [1, 1, 1]} : vector<2x8x8xf32> to vector<2x1x4xf32>
    %104 = vector.shape_cast %103 : vector<2x1x4xf32> to vector<2x4xf32>
    %105 = vector.extract_strided_slice %78 {offsets = [0, 6, 4], sizes = [2, 1, 4], strides = [1, 1, 1]} : vector<2x8x8xf32> to vector<2x1x4xf32>
    %106 = vector.shape_cast %105 : vector<2x1x4xf32> to vector<2x4xf32>
    %107 = vector.extract_strided_slice %78 {offsets = [0, 7, 0], sizes = [2, 1, 4], strides = [1, 1, 1]} : vector<2x8x8xf32> to vector<2x1x4xf32>
    %108 = vector.shape_cast %107 : vector<2x1x4xf32> to vector<2x4xf32>
    %109 = vector.extract_strided_slice %78 {offsets = [0, 7, 4], sizes = [2, 1, 4], strides = [1, 1, 1]} : vector<2x8x8xf32> to vector<2x1x4xf32>
    %110 = vector.shape_cast %109 : vector<2x1x4xf32> to vector<2x4xf32>
    %111 = tpu.concatenate %80, %82, %84, %86, %88, %90, %92, %94, %96, %98, %100, %102, %104, %106, %108, %110 in 0 : vector<2x4xf32>, vector<2x4xf32>, vector<2x4xf32>, vector<2x4xf32>, vector<2x4xf32>, vector<2x4xf32>, vector<2x4xf32>, vector<2x4xf32>, vector<2x4xf32>, vector<2x4xf32>, vector<2x4xf32>, vector<2x4xf32>, vector<2x4xf32>, vector<2x4xf32>, vector<2x4xf32>, vector<2x4xf32> -> vector<32x4xf32>
    %c0_30 = arith.constant 0 : index
    %c0_31 = arith.constant 0 : index
    %112 = vector.load %arg9[%c0_30, %c0_31] : memref<4x128xf32, #tpu.memory_space<vmem>>, vector<4x128xf32>
    %c0_32 = arith.constant 0 : index
    %c0_33 = arith.constant 0 : index
    %113 = vector.load %arg10[%c0_32, %c0_33] : memref<32x128xf32, #tpu.memory_space<vmem>>, vector<32x128xf32>
    %c0_34 = arith.constant 0 : index
    %c0_35 = arith.constant 0 : index
    %114 = vector.load %arg11[%c0_34, %c0_35] : memref<1x128xf32, #tpu.memory_space<vmem>>, vector<1x128xf32>
    %cst_36 = arith.constant dense<0.000000e+00> : vector<32x128xf32>
    %115 = tpu.matmul %111, %112, %cst_36 {dimension_numbers = #tpu.dot_dimension_numbers<[1], [0], [0], [1], [0, 0, 1, 1], [], []>} : vector<32x4xf32>, vector<4x128xf32>, vector<32x128xf32> -> vector<32x128xf32>
    %116 = vector.broadcast %114 : vector<1x128xf32> to vector<32x128xf32>
    %117 = arith.addf %115, %116 : vector<32x128xf32>
    %cst_37 = arith.constant 0.000000e+00 : f32
    %118 = vector.broadcast %cst_37 : f32 to vector<2x32xf32>
    %cst_38 = arith.constant 0.000000e+00 : f32
    %119 = vector.broadcast %cst_38 : f32 to vector<2x32xf32>
    %120 = vector.extract_strided_slice %117 {offsets = [0, 0], sizes = [2, 128], strides = [1, 1]} : vector<32x128xf32> to vector<2x128xf32>
    %cst_39 = arith.constant dense<0.000000e+00> : vector<2x128xf32>
    %121 = tpu.matmul %118, %113, %cst_39 {dimension_numbers = #tpu.dot_dimension_numbers<[1], [0], [0], [1], [0, 0, 1, 1], [], []>} : vector<2x32xf32>, vector<32x128xf32>, vector<2x128xf32> -> vector<2x128xf32>
    %122 = arith.addf %120, %121 : vector<2x128xf32>
    %cst_40 = arith.constant 5.000000e-01 : f32
    %123 = vector.broadcast %cst_40 : f32 to vector<2x128xf32>
    %124 = arith.mulf %123, %122 : vector<2x128xf32>
    %125 = math.tanh %124 : vector<2x128xf32>
    %cst_41 = arith.constant 1.000000e+00 : f32
    %126 = vector.broadcast %cst_41 : f32 to vector<2x128xf32>
    %127 = arith.addf %125, %126 : vector<2x128xf32>
    %cst_42 = arith.constant 5.000000e-01 : f32
    %128 = vector.broadcast %cst_42 : f32 to vector<2x128xf32>
    %129 = arith.mulf %128, %127 : vector<2x128xf32>
    %130 = math.tanh %122 : vector<2x128xf32>
    %131 = vector.extract_strided_slice %129 {offsets = [0, 32], sizes = [2, 32], strides = [1, 1]} : vector<2x128xf32> to vector<2x32xf32>
    %132 = arith.mulf %131, %119 : vector<2x32xf32>
    %133 = vector.extract_strided_slice %129 {offsets = [0, 0], sizes = [2, 32], strides = [1, 1]} : vector<2x128xf32> to vector<2x32xf32>
    %134 = vector.extract_strided_slice %130 {offsets = [0, 64], sizes = [2, 32], strides = [1, 1]} : vector<2x128xf32> to vector<2x32xf32>
    %135 = arith.mulf %133, %134 : vector<2x32xf32>
    %136 = arith.addf %132, %135 : vector<2x32xf32>
    %137 = vector.extract_strided_slice %129 {offsets = [0, 96], sizes = [2, 32], strides = [1, 1]} : vector<2x128xf32> to vector<2x32xf32>
    %138 = math.tanh %136 : vector<2x32xf32>
    %139 = arith.mulf %137, %138 : vector<2x32xf32>
    %140 = vector.extract_strided_slice %117 {offsets = [2, 0], sizes = [2, 128], strides = [1, 1]} : vector<32x128xf32> to vector<2x128xf32>
    %cst_43 = arith.constant dense<0.000000e+00> : vector<2x128xf32>
    %141 = tpu.matmul %139, %113, %cst_43 {dimension_numbers = #tpu.dot_dimension_numbers<[1], [0], [0], [1], [0, 0, 1, 1], [], []>} : vector<2x32xf32>, vector<32x128xf32>, vector<2x128xf32> -> vector<2x128xf32>
    %142 = arith.addf %140, %141 : vector<2x128xf32>
    %cst_44 = arith.constant 5.000000e-01 : f32
    %143 = vector.broadcast %cst_44 : f32 to vector<2x128xf32>
    %144 = arith.mulf %143, %142 : vector<2x128xf32>
    %145 = math.tanh %144 : vector<2x128xf32>
    %cst_45 = arith.constant 1.000000e+00 : f32
    %146 = vector.broadcast %cst_45 : f32 to vector<2x128xf32>
    %147 = arith.addf %145, %146 : vector<2x128xf32>
    %cst_46 = arith.constant 5.000000e-01 : f32
    %148 = vector.broadcast %cst_46 : f32 to vector<2x128xf32>
    %149 = arith.mulf %148, %147 : vector<2x128xf32>
    %150 = math.tanh %142 : vector<2x128xf32>
    %151 = vector.extract_strided_slice %149 {offsets = [0, 32], sizes = [2, 32], strides = [1, 1]} : vector<2x128xf32> to vector<2x32xf32>
    %152 = arith.mulf %151, %136 : vector<2x32xf32>
    %153 = vector.extract_strided_slice %149 {offsets = [0, 0], sizes = [2, 32], strides = [1, 1]} : vector<2x128xf32> to vector<2x32xf32>
    %154 = vector.extract_strided_slice %150 {offsets = [0, 64], sizes = [2, 32], strides = [1, 1]} : vector<2x128xf32> to vector<2x32xf32>
    %155 = arith.mulf %153, %154 : vector<2x32xf32>
    %156 = arith.addf %152, %155 : vector<2x32xf32>
    %157 = vector.extract_strided_slice %149 {offsets = [0, 96], sizes = [2, 32], strides = [1, 1]} : vector<2x128xf32> to vector<2x32xf32>
    %158 = math.tanh %156 : vector<2x32xf32>
    %159 = arith.mulf %157, %158 : vector<2x32xf32>
    %160 = vector.extract_strided_slice %117 {offsets = [4, 0], sizes = [2, 128], strides = [1, 1]} : vector<32x128xf32> to vector<2x128xf32>
    %cst_47 = arith.constant dense<0.000000e+00> : vector<2x128xf32>
    %161 = tpu.matmul %159, %113, %cst_47 {dimension_numbers = #tpu.dot_dimension_numbers<[1], [0], [0], [1], [0, 0, 1, 1], [], []>} : vector<2x32xf32>, vector<32x128xf32>, vector<2x128xf32> -> vector<2x128xf32>
    %162 = arith.addf %160, %161 : vector<2x128xf32>
    %cst_48 = arith.constant 5.000000e-01 : f32
    %163 = vector.broadcast %cst_48 : f32 to vector<2x128xf32>
    %164 = arith.mulf %163, %162 : vector<2x128xf32>
    %165 = math.tanh %164 : vector<2x128xf32>
    %cst_49 = arith.constant 1.000000e+00 : f32
    %166 = vector.broadcast %cst_49 : f32 to vector<2x128xf32>
    %167 = arith.addf %165, %166 : vector<2x128xf32>
    %cst_50 = arith.constant 5.000000e-01 : f32
    %168 = vector.broadcast %cst_50 : f32 to vector<2x128xf32>
    %169 = arith.mulf %168, %167 : vector<2x128xf32>
    %170 = math.tanh %162 : vector<2x128xf32>
    %171 = vector.extract_strided_slice %169 {offsets = [0, 32], sizes = [2, 32], strides = [1, 1]} : vector<2x128xf32> to vector<2x32xf32>
    %172 = arith.mulf %171, %156 : vector<2x32xf32>
    %173 = vector.extract_strided_slice %169 {offsets = [0, 0], sizes = [2, 32], strides = [1, 1]} : vector<2x128xf32> to vector<2x32xf32>
    %174 = vector.extract_strided_slice %170 {offsets = [0, 64], sizes = [2, 32], strides = [1, 1]} : vector<2x128xf32> to vector<2x32xf32>
    %175 = arith.mulf %173, %174 : vector<2x32xf32>
    %176 = arith.addf %172, %175 : vector<2x32xf32>
    %177 = vector.extract_strided_slice %169 {offsets = [0, 96], sizes = [2, 32], strides = [1, 1]} : vector<2x128xf32> to vector<2x32xf32>
    %178 = math.tanh %176 : vector<2x32xf32>
    %179 = arith.mulf %177, %178 : vector<2x32xf32>
    %180 = vector.extract_strided_slice %117 {offsets = [6, 0], sizes = [2, 128], strides = [1, 1]} : vector<32x128xf32> to vector<2x128xf32>
    %cst_51 = arith.constant dense<0.000000e+00> : vector<2x128xf32>
    %181 = tpu.matmul %179, %113, %cst_51 {dimension_numbers = #tpu.dot_dimension_numbers<[1], [0], [0], [1], [0, 0, 1, 1], [], []>} : vector<2x32xf32>, vector<32x128xf32>, vector<2x128xf32> -> vector<2x128xf32>
    %182 = arith.addf %180, %181 : vector<2x128xf32>
    %cst_52 = arith.constant 5.000000e-01 : f32
    %183 = vector.broadcast %cst_52 : f32 to vector<2x128xf32>
    %184 = arith.mulf %183, %182 : vector<2x128xf32>
    %185 = math.tanh %184 : vector<2x128xf32>
    %cst_53 = arith.constant 1.000000e+00 : f32
    %186 = vector.broadcast %cst_53 : f32 to vector<2x128xf32>
    %187 = arith.addf %185, %186 : vector<2x128xf32>
    %cst_54 = arith.constant 5.000000e-01 : f32
    %188 = vector.broadcast %cst_54 : f32 to vector<2x128xf32>
    %189 = arith.mulf %188, %187 : vector<2x128xf32>
    %190 = math.tanh %182 : vector<2x128xf32>
    %191 = vector.extract_strided_slice %189 {offsets = [0, 32], sizes = [2, 32], strides = [1, 1]} : vector<2x128xf32> to vector<2x32xf32>
    %192 = arith.mulf %191, %176 : vector<2x32xf32>
    %193 = vector.extract_strided_slice %189 {offsets = [0, 0], sizes = [2, 32], strides = [1, 1]} : vector<2x128xf32> to vector<2x32xf32>
    %194 = vector.extract_strided_slice %190 {offsets = [0, 64], sizes = [2, 32], strides = [1, 1]} : vector<2x128xf32> to vector<2x32xf32>
    %195 = arith.mulf %193, %194 : vector<2x32xf32>
    %196 = arith.addf %192, %195 : vector<2x32xf32>
    %197 = vector.extract_strided_slice %189 {offsets = [0, 96], sizes = [2, 32], strides = [1, 1]} : vector<2x128xf32> to vector<2x32xf32>
    %198 = math.tanh %196 : vector<2x32xf32>
    %199 = arith.mulf %197, %198 : vector<2x32xf32>
    %200 = vector.extract_strided_slice %117 {offsets = [8, 0], sizes = [2, 128], strides = [1, 1]} : vector<32x128xf32> to vector<2x128xf32>
    %cst_55 = arith.constant dense<0.000000e+00> : vector<2x128xf32>
    %201 = tpu.matmul %199, %113, %cst_55 {dimension_numbers = #tpu.dot_dimension_numbers<[1], [0], [0], [1], [0, 0, 1, 1], [], []>} : vector<2x32xf32>, vector<32x128xf32>, vector<2x128xf32> -> vector<2x128xf32>
    %202 = arith.addf %200, %201 : vector<2x128xf32>
    %cst_56 = arith.constant 5.000000e-01 : f32
    %203 = vector.broadcast %cst_56 : f32 to vector<2x128xf32>
    %204 = arith.mulf %203, %202 : vector<2x128xf32>
    %205 = math.tanh %204 : vector<2x128xf32>
    %cst_57 = arith.constant 1.000000e+00 : f32
    %206 = vector.broadcast %cst_57 : f32 to vector<2x128xf32>
    %207 = arith.addf %205, %206 : vector<2x128xf32>
    %cst_58 = arith.constant 5.000000e-01 : f32
    %208 = vector.broadcast %cst_58 : f32 to vector<2x128xf32>
    %209 = arith.mulf %208, %207 : vector<2x128xf32>
    %210 = math.tanh %202 : vector<2x128xf32>
    %211 = vector.extract_strided_slice %209 {offsets = [0, 32], sizes = [2, 32], strides = [1, 1]} : vector<2x128xf32> to vector<2x32xf32>
    %212 = arith.mulf %211, %196 : vector<2x32xf32>
    %213 = vector.extract_strided_slice %209 {offsets = [0, 0], sizes = [2, 32], strides = [1, 1]} : vector<2x128xf32> to vector<2x32xf32>
    %214 = vector.extract_strided_slice %210 {offsets = [0, 64], sizes = [2, 32], strides = [1, 1]} : vector<2x128xf32> to vector<2x32xf32>
    %215 = arith.mulf %213, %214 : vector<2x32xf32>
    %216 = arith.addf %212, %215 : vector<2x32xf32>
    %217 = vector.extract_strided_slice %209 {offsets = [0, 96], sizes = [2, 32], strides = [1, 1]} : vector<2x128xf32> to vector<2x32xf32>
    %218 = math.tanh %216 : vector<2x32xf32>
    %219 = arith.mulf %217, %218 : vector<2x32xf32>
    %220 = vector.extract_strided_slice %117 {offsets = [10, 0], sizes = [2, 128], strides = [1, 1]} : vector<32x128xf32> to vector<2x128xf32>
    %cst_59 = arith.constant dense<0.000000e+00> : vector<2x128xf32>
    %221 = tpu.matmul %219, %113, %cst_59 {dimension_numbers = #tpu.dot_dimension_numbers<[1], [0], [0], [1], [0, 0, 1, 1], [], []>} : vector<2x32xf32>, vector<32x128xf32>, vector<2x128xf32> -> vector<2x128xf32>
    %222 = arith.addf %220, %221 : vector<2x128xf32>
    %cst_60 = arith.constant 5.000000e-01 : f32
    %223 = vector.broadcast %cst_60 : f32 to vector<2x128xf32>
    %224 = arith.mulf %223, %222 : vector<2x128xf32>
    %225 = math.tanh %224 : vector<2x128xf32>
    %cst_61 = arith.constant 1.000000e+00 : f32
    %226 = vector.broadcast %cst_61 : f32 to vector<2x128xf32>
    %227 = arith.addf %225, %226 : vector<2x128xf32>
    %cst_62 = arith.constant 5.000000e-01 : f32
    %228 = vector.broadcast %cst_62 : f32 to vector<2x128xf32>
    %229 = arith.mulf %228, %227 : vector<2x128xf32>
    %230 = math.tanh %222 : vector<2x128xf32>
    %231 = vector.extract_strided_slice %229 {offsets = [0, 32], sizes = [2, 32], strides = [1, 1]} : vector<2x128xf32> to vector<2x32xf32>
    %232 = arith.mulf %231, %216 : vector<2x32xf32>
    %233 = vector.extract_strided_slice %229 {offsets = [0, 0], sizes = [2, 32], strides = [1, 1]} : vector<2x128xf32> to vector<2x32xf32>
    %234 = vector.extract_strided_slice %230 {offsets = [0, 64], sizes = [2, 32], strides = [1, 1]} : vector<2x128xf32> to vector<2x32xf32>
    %235 = arith.mulf %233, %234 : vector<2x32xf32>
    %236 = arith.addf %232, %235 : vector<2x32xf32>
    %237 = vector.extract_strided_slice %229 {offsets = [0, 96], sizes = [2, 32], strides = [1, 1]} : vector<2x128xf32> to vector<2x32xf32>
    %238 = math.tanh %236 : vector<2x32xf32>
    %239 = arith.mulf %237, %238 : vector<2x32xf32>
    %240 = vector.extract_strided_slice %117 {offsets = [12, 0], sizes = [2, 128], strides = [1, 1]} : vector<32x128xf32> to vector<2x128xf32>
    %cst_63 = arith.constant dense<0.000000e+00> : vector<2x128xf32>
    %241 = tpu.matmul %239, %113, %cst_63 {dimension_numbers = #tpu.dot_dimension_numbers<[1], [0], [0], [1], [0, 0, 1, 1], [], []>} : vector<2x32xf32>, vector<32x128xf32>, vector<2x128xf32> -> vector<2x128xf32>
    %242 = arith.addf %240, %241 : vector<2x128xf32>
    %cst_64 = arith.constant 5.000000e-01 : f32
    %243 = vector.broadcast %cst_64 : f32 to vector<2x128xf32>
    %244 = arith.mulf %243, %242 : vector<2x128xf32>
    %245 = math.tanh %244 : vector<2x128xf32>
    %cst_65 = arith.constant 1.000000e+00 : f32
    %246 = vector.broadcast %cst_65 : f32 to vector<2x128xf32>
    %247 = arith.addf %245, %246 : vector<2x128xf32>
    %cst_66 = arith.constant 5.000000e-01 : f32
    %248 = vector.broadcast %cst_66 : f32 to vector<2x128xf32>
    %249 = arith.mulf %248, %247 : vector<2x128xf32>
    %250 = math.tanh %242 : vector<2x128xf32>
    %251 = vector.extract_strided_slice %249 {offsets = [0, 32], sizes = [2, 32], strides = [1, 1]} : vector<2x128xf32> to vector<2x32xf32>
    %252 = arith.mulf %251, %236 : vector<2x32xf32>
    %253 = vector.extract_strided_slice %249 {offsets = [0, 0], sizes = [2, 32], strides = [1, 1]} : vector<2x128xf32> to vector<2x32xf32>
    %254 = vector.extract_strided_slice %250 {offsets = [0, 64], sizes = [2, 32], strides = [1, 1]} : vector<2x128xf32> to vector<2x32xf32>
    %255 = arith.mulf %253, %254 : vector<2x32xf32>
    %256 = arith.addf %252, %255 : vector<2x32xf32>
    %257 = vector.extract_strided_slice %249 {offsets = [0, 96], sizes = [2, 32], strides = [1, 1]} : vector<2x128xf32> to vector<2x32xf32>
    %258 = math.tanh %256 : vector<2x32xf32>
    %259 = arith.mulf %257, %258 : vector<2x32xf32>
    %260 = vector.extract_strided_slice %117 {offsets = [14, 0], sizes = [2, 128], strides = [1, 1]} : vector<32x128xf32> to vector<2x128xf32>
    %cst_67 = arith.constant dense<0.000000e+00> : vector<2x128xf32>
    %261 = tpu.matmul %259, %113, %cst_67 {dimension_numbers = #tpu.dot_dimension_numbers<[1], [0], [0], [1], [0, 0, 1, 1], [], []>} : vector<2x32xf32>, vector<32x128xf32>, vector<2x128xf32> -> vector<2x128xf32>
    %262 = arith.addf %260, %261 : vector<2x128xf32>
    %cst_68 = arith.constant 5.000000e-01 : f32
    %263 = vector.broadcast %cst_68 : f32 to vector<2x128xf32>
    %264 = arith.mulf %263, %262 : vector<2x128xf32>
    %265 = math.tanh %264 : vector<2x128xf32>
    %cst_69 = arith.constant 1.000000e+00 : f32
    %266 = vector.broadcast %cst_69 : f32 to vector<2x128xf32>
    %267 = arith.addf %265, %266 : vector<2x128xf32>
    %cst_70 = arith.constant 5.000000e-01 : f32
    %268 = vector.broadcast %cst_70 : f32 to vector<2x128xf32>
    %269 = arith.mulf %268, %267 : vector<2x128xf32>
    %270 = math.tanh %262 : vector<2x128xf32>
    %271 = vector.extract_strided_slice %269 {offsets = [0, 32], sizes = [2, 32], strides = [1, 1]} : vector<2x128xf32> to vector<2x32xf32>
    %272 = arith.mulf %271, %256 : vector<2x32xf32>
    %273 = vector.extract_strided_slice %269 {offsets = [0, 0], sizes = [2, 32], strides = [1, 1]} : vector<2x128xf32> to vector<2x32xf32>
    %274 = vector.extract_strided_slice %270 {offsets = [0, 64], sizes = [2, 32], strides = [1, 1]} : vector<2x128xf32> to vector<2x32xf32>
    %275 = arith.mulf %273, %274 : vector<2x32xf32>
    %276 = arith.addf %272, %275 : vector<2x32xf32>
    %277 = vector.extract_strided_slice %269 {offsets = [0, 96], sizes = [2, 32], strides = [1, 1]} : vector<2x128xf32> to vector<2x32xf32>
    %278 = math.tanh %276 : vector<2x32xf32>
    %279 = arith.mulf %277, %278 : vector<2x32xf32>
    %280 = vector.extract_strided_slice %117 {offsets = [16, 0], sizes = [2, 128], strides = [1, 1]} : vector<32x128xf32> to vector<2x128xf32>
    %cst_71 = arith.constant dense<0.000000e+00> : vector<2x128xf32>
    %281 = tpu.matmul %279, %113, %cst_71 {dimension_numbers = #tpu.dot_dimension_numbers<[1], [0], [0], [1], [0, 0, 1, 1], [], []>} : vector<2x32xf32>, vector<32x128xf32>, vector<2x128xf32> -> vector<2x128xf32>
    %282 = arith.addf %280, %281 : vector<2x128xf32>
    %cst_72 = arith.constant 5.000000e-01 : f32
    %283 = vector.broadcast %cst_72 : f32 to vector<2x128xf32>
    %284 = arith.mulf %283, %282 : vector<2x128xf32>
    %285 = math.tanh %284 : vector<2x128xf32>
    %cst_73 = arith.constant 1.000000e+00 : f32
    %286 = vector.broadcast %cst_73 : f32 to vector<2x128xf32>
    %287 = arith.addf %285, %286 : vector<2x128xf32>
    %cst_74 = arith.constant 5.000000e-01 : f32
    %288 = vector.broadcast %cst_74 : f32 to vector<2x128xf32>
    %289 = arith.mulf %288, %287 : vector<2x128xf32>
    %290 = math.tanh %282 : vector<2x128xf32>
    %291 = vector.extract_strided_slice %289 {offsets = [0, 32], sizes = [2, 32], strides = [1, 1]} : vector<2x128xf32> to vector<2x32xf32>
    %292 = arith.mulf %291, %276 : vector<2x32xf32>
    %293 = vector.extract_strided_slice %289 {offsets = [0, 0], sizes = [2, 32], strides = [1, 1]} : vector<2x128xf32> to vector<2x32xf32>
    %294 = vector.extract_strided_slice %290 {offsets = [0, 64], sizes = [2, 32], strides = [1, 1]} : vector<2x128xf32> to vector<2x32xf32>
    %295 = arith.mulf %293, %294 : vector<2x32xf32>
    %296 = arith.addf %292, %295 : vector<2x32xf32>
    %297 = vector.extract_strided_slice %289 {offsets = [0, 96], sizes = [2, 32], strides = [1, 1]} : vector<2x128xf32> to vector<2x32xf32>
    %298 = math.tanh %296 : vector<2x32xf32>
    %299 = arith.mulf %297, %298 : vector<2x32xf32>
    %300 = vector.extract_strided_slice %117 {offsets = [18, 0], sizes = [2, 128], strides = [1, 1]} : vector<32x128xf32> to vector<2x128xf32>
    %cst_75 = arith.constant dense<0.000000e+00> : vector<2x128xf32>
    %301 = tpu.matmul %299, %113, %cst_75 {dimension_numbers = #tpu.dot_dimension_numbers<[1], [0], [0], [1], [0, 0, 1, 1], [], []>} : vector<2x32xf32>, vector<32x128xf32>, vector<2x128xf32> -> vector<2x128xf32>
    %302 = arith.addf %300, %301 : vector<2x128xf32>
    %cst_76 = arith.constant 5.000000e-01 : f32
    %303 = vector.broadcast %cst_76 : f32 to vector<2x128xf32>
    %304 = arith.mulf %303, %302 : vector<2x128xf32>
    %305 = math.tanh %304 : vector<2x128xf32>
    %cst_77 = arith.constant 1.000000e+00 : f32
    %306 = vector.broadcast %cst_77 : f32 to vector<2x128xf32>
    %307 = arith.addf %305, %306 : vector<2x128xf32>
    %cst_78 = arith.constant 5.000000e-01 : f32
    %308 = vector.broadcast %cst_78 : f32 to vector<2x128xf32>
    %309 = arith.mulf %308, %307 : vector<2x128xf32>
    %310 = math.tanh %302 : vector<2x128xf32>
    %311 = vector.extract_strided_slice %309 {offsets = [0, 32], sizes = [2, 32], strides = [1, 1]} : vector<2x128xf32> to vector<2x32xf32>
    %312 = arith.mulf %311, %296 : vector<2x32xf32>
    %313 = vector.extract_strided_slice %309 {offsets = [0, 0], sizes = [2, 32], strides = [1, 1]} : vector<2x128xf32> to vector<2x32xf32>
    %314 = vector.extract_strided_slice %310 {offsets = [0, 64], sizes = [2, 32], strides = [1, 1]} : vector<2x128xf32> to vector<2x32xf32>
    %315 = arith.mulf %313, %314 : vector<2x32xf32>
    %316 = arith.addf %312, %315 : vector<2x32xf32>
    %317 = vector.extract_strided_slice %309 {offsets = [0, 96], sizes = [2, 32], strides = [1, 1]} : vector<2x128xf32> to vector<2x32xf32>
    %318 = math.tanh %316 : vector<2x32xf32>
    %319 = arith.mulf %317, %318 : vector<2x32xf32>
    %320 = vector.extract_strided_slice %117 {offsets = [20, 0], sizes = [2, 128], strides = [1, 1]} : vector<32x128xf32> to vector<2x128xf32>
    %cst_79 = arith.constant dense<0.000000e+00> : vector<2x128xf32>
    %321 = tpu.matmul %319, %113, %cst_79 {dimension_numbers = #tpu.dot_dimension_numbers<[1], [0], [0], [1], [0, 0, 1, 1], [], []>} : vector<2x32xf32>, vector<32x128xf32>, vector<2x128xf32> -> vector<2x128xf32>
    %322 = arith.addf %320, %321 : vector<2x128xf32>
    %cst_80 = arith.constant 5.000000e-01 : f32
    %323 = vector.broadcast %cst_80 : f32 to vector<2x128xf32>
    %324 = arith.mulf %323, %322 : vector<2x128xf32>
    %325 = math.tanh %324 : vector<2x128xf32>
    %cst_81 = arith.constant 1.000000e+00 : f32
    %326 = vector.broadcast %cst_81 : f32 to vector<2x128xf32>
    %327 = arith.addf %325, %326 : vector<2x128xf32>
    %cst_82 = arith.constant 5.000000e-01 : f32
    %328 = vector.broadcast %cst_82 : f32 to vector<2x128xf32>
    %329 = arith.mulf %328, %327 : vector<2x128xf32>
    %330 = math.tanh %322 : vector<2x128xf32>
    %331 = vector.extract_strided_slice %329 {offsets = [0, 32], sizes = [2, 32], strides = [1, 1]} : vector<2x128xf32> to vector<2x32xf32>
    %332 = arith.mulf %331, %316 : vector<2x32xf32>
    %333 = vector.extract_strided_slice %329 {offsets = [0, 0], sizes = [2, 32], strides = [1, 1]} : vector<2x128xf32> to vector<2x32xf32>
    %334 = vector.extract_strided_slice %330 {offsets = [0, 64], sizes = [2, 32], strides = [1, 1]} : vector<2x128xf32> to vector<2x32xf32>
    %335 = arith.mulf %333, %334 : vector<2x32xf32>
    %336 = arith.addf %332, %335 : vector<2x32xf32>
    %337 = vector.extract_strided_slice %329 {offsets = [0, 96], sizes = [2, 32], strides = [1, 1]} : vector<2x128xf32> to vector<2x32xf32>
    %338 = math.tanh %336 : vector<2x32xf32>
    %339 = arith.mulf %337, %338 : vector<2x32xf32>
    %340 = vector.extract_strided_slice %117 {offsets = [22, 0], sizes = [2, 128], strides = [1, 1]} : vector<32x128xf32> to vector<2x128xf32>
    %cst_83 = arith.constant dense<0.000000e+00> : vector<2x128xf32>
    %341 = tpu.matmul %339, %113, %cst_83 {dimension_numbers = #tpu.dot_dimension_numbers<[1], [0], [0], [1], [0, 0, 1, 1], [], []>} : vector<2x32xf32>, vector<32x128xf32>, vector<2x128xf32> -> vector<2x128xf32>
    %342 = arith.addf %340, %341 : vector<2x128xf32>
    %cst_84 = arith.constant 5.000000e-01 : f32
    %343 = vector.broadcast %cst_84 : f32 to vector<2x128xf32>
    %344 = arith.mulf %343, %342 : vector<2x128xf32>
    %345 = math.tanh %344 : vector<2x128xf32>
    %cst_85 = arith.constant 1.000000e+00 : f32
    %346 = vector.broadcast %cst_85 : f32 to vector<2x128xf32>
    %347 = arith.addf %345, %346 : vector<2x128xf32>
    %cst_86 = arith.constant 5.000000e-01 : f32
    %348 = vector.broadcast %cst_86 : f32 to vector<2x128xf32>
    %349 = arith.mulf %348, %347 : vector<2x128xf32>
    %350 = math.tanh %342 : vector<2x128xf32>
    %351 = vector.extract_strided_slice %349 {offsets = [0, 32], sizes = [2, 32], strides = [1, 1]} : vector<2x128xf32> to vector<2x32xf32>
    %352 = arith.mulf %351, %336 : vector<2x32xf32>
    %353 = vector.extract_strided_slice %349 {offsets = [0, 0], sizes = [2, 32], strides = [1, 1]} : vector<2x128xf32> to vector<2x32xf32>
    %354 = vector.extract_strided_slice %350 {offsets = [0, 64], sizes = [2, 32], strides = [1, 1]} : vector<2x128xf32> to vector<2x32xf32>
    %355 = arith.mulf %353, %354 : vector<2x32xf32>
    %356 = arith.addf %352, %355 : vector<2x32xf32>
    %357 = vector.extract_strided_slice %349 {offsets = [0, 96], sizes = [2, 32], strides = [1, 1]} : vector<2x128xf32> to vector<2x32xf32>
    %358 = math.tanh %356 : vector<2x32xf32>
    %359 = arith.mulf %357, %358 : vector<2x32xf32>
    %360 = vector.extract_strided_slice %117 {offsets = [24, 0], sizes = [2, 128], strides = [1, 1]} : vector<32x128xf32> to vector<2x128xf32>
    %cst_87 = arith.constant dense<0.000000e+00> : vector<2x128xf32>
    %361 = tpu.matmul %359, %113, %cst_87 {dimension_numbers = #tpu.dot_dimension_numbers<[1], [0], [0], [1], [0, 0, 1, 1], [], []>} : vector<2x32xf32>, vector<32x128xf32>, vector<2x128xf32> -> vector<2x128xf32>
    %362 = arith.addf %360, %361 : vector<2x128xf32>
    %cst_88 = arith.constant 5.000000e-01 : f32
    %363 = vector.broadcast %cst_88 : f32 to vector<2x128xf32>
    %364 = arith.mulf %363, %362 : vector<2x128xf32>
    %365 = math.tanh %364 : vector<2x128xf32>
    %cst_89 = arith.constant 1.000000e+00 : f32
    %366 = vector.broadcast %cst_89 : f32 to vector<2x128xf32>
    %367 = arith.addf %365, %366 : vector<2x128xf32>
    %cst_90 = arith.constant 5.000000e-01 : f32
    %368 = vector.broadcast %cst_90 : f32 to vector<2x128xf32>
    %369 = arith.mulf %368, %367 : vector<2x128xf32>
    %370 = math.tanh %362 : vector<2x128xf32>
    %371 = vector.extract_strided_slice %369 {offsets = [0, 32], sizes = [2, 32], strides = [1, 1]} : vector<2x128xf32> to vector<2x32xf32>
    %372 = arith.mulf %371, %356 : vector<2x32xf32>
    %373 = vector.extract_strided_slice %369 {offsets = [0, 0], sizes = [2, 32], strides = [1, 1]} : vector<2x128xf32> to vector<2x32xf32>
    %374 = vector.extract_strided_slice %370 {offsets = [0, 64], sizes = [2, 32], strides = [1, 1]} : vector<2x128xf32> to vector<2x32xf32>
    %375 = arith.mulf %373, %374 : vector<2x32xf32>
    %376 = arith.addf %372, %375 : vector<2x32xf32>
    %377 = vector.extract_strided_slice %369 {offsets = [0, 96], sizes = [2, 32], strides = [1, 1]} : vector<2x128xf32> to vector<2x32xf32>
    %378 = math.tanh %376 : vector<2x32xf32>
    %379 = arith.mulf %377, %378 : vector<2x32xf32>
    %380 = vector.extract_strided_slice %117 {offsets = [26, 0], sizes = [2, 128], strides = [1, 1]} : vector<32x128xf32> to vector<2x128xf32>
    %cst_91 = arith.constant dense<0.000000e+00> : vector<2x128xf32>
    %381 = tpu.matmul %379, %113, %cst_91 {dimension_numbers = #tpu.dot_dimension_numbers<[1], [0], [0], [1], [0, 0, 1, 1], [], []>} : vector<2x32xf32>, vector<32x128xf32>, vector<2x128xf32> -> vector<2x128xf32>
    %382 = arith.addf %380, %381 : vector<2x128xf32>
    %cst_92 = arith.constant 5.000000e-01 : f32
    %383 = vector.broadcast %cst_92 : f32 to vector<2x128xf32>
    %384 = arith.mulf %383, %382 : vector<2x128xf32>
    %385 = math.tanh %384 : vector<2x128xf32>
    %cst_93 = arith.constant 1.000000e+00 : f32
    %386 = vector.broadcast %cst_93 : f32 to vector<2x128xf32>
    %387 = arith.addf %385, %386 : vector<2x128xf32>
    %cst_94 = arith.constant 5.000000e-01 : f32
    %388 = vector.broadcast %cst_94 : f32 to vector<2x128xf32>
    %389 = arith.mulf %388, %387 : vector<2x128xf32>
    %390 = math.tanh %382 : vector<2x128xf32>
    %391 = vector.extract_strided_slice %389 {offsets = [0, 32], sizes = [2, 32], strides = [1, 1]} : vector<2x128xf32> to vector<2x32xf32>
    %392 = arith.mulf %391, %376 : vector<2x32xf32>
    %393 = vector.extract_strided_slice %389 {offsets = [0, 0], sizes = [2, 32], strides = [1, 1]} : vector<2x128xf32> to vector<2x32xf32>
    %394 = vector.extract_strided_slice %390 {offsets = [0, 64], sizes = [2, 32], strides = [1, 1]} : vector<2x128xf32> to vector<2x32xf32>
    %395 = arith.mulf %393, %394 : vector<2x32xf32>
    %396 = arith.addf %392, %395 : vector<2x32xf32>
    %397 = vector.extract_strided_slice %389 {offsets = [0, 96], sizes = [2, 32], strides = [1, 1]} : vector<2x128xf32> to vector<2x32xf32>
    %398 = math.tanh %396 : vector<2x32xf32>
    %399 = arith.mulf %397, %398 : vector<2x32xf32>
    %400 = vector.extract_strided_slice %117 {offsets = [28, 0], sizes = [2, 128], strides = [1, 1]} : vector<32x128xf32> to vector<2x128xf32>
    %cst_95 = arith.constant dense<0.000000e+00> : vector<2x128xf32>
    %401 = tpu.matmul %399, %113, %cst_95 {dimension_numbers = #tpu.dot_dimension_numbers<[1], [0], [0], [1], [0, 0, 1, 1], [], []>} : vector<2x32xf32>, vector<32x128xf32>, vector<2x128xf32> -> vector<2x128xf32>
    %402 = arith.addf %400, %401 : vector<2x128xf32>
    %cst_96 = arith.constant 5.000000e-01 : f32
    %403 = vector.broadcast %cst_96 : f32 to vector<2x128xf32>
    %404 = arith.mulf %403, %402 : vector<2x128xf32>
    %405 = math.tanh %404 : vector<2x128xf32>
    %cst_97 = arith.constant 1.000000e+00 : f32
    %406 = vector.broadcast %cst_97 : f32 to vector<2x128xf32>
    %407 = arith.addf %405, %406 : vector<2x128xf32>
    %cst_98 = arith.constant 5.000000e-01 : f32
    %408 = vector.broadcast %cst_98 : f32 to vector<2x128xf32>
    %409 = arith.mulf %408, %407 : vector<2x128xf32>
    %410 = math.tanh %402 : vector<2x128xf32>
    %411 = vector.extract_strided_slice %409 {offsets = [0, 32], sizes = [2, 32], strides = [1, 1]} : vector<2x128xf32> to vector<2x32xf32>
    %412 = arith.mulf %411, %396 : vector<2x32xf32>
    %413 = vector.extract_strided_slice %409 {offsets = [0, 0], sizes = [2, 32], strides = [1, 1]} : vector<2x128xf32> to vector<2x32xf32>
    %414 = vector.extract_strided_slice %410 {offsets = [0, 64], sizes = [2, 32], strides = [1, 1]} : vector<2x128xf32> to vector<2x32xf32>
    %415 = arith.mulf %413, %414 : vector<2x32xf32>
    %416 = arith.addf %412, %415 : vector<2x32xf32>
    %417 = vector.extract_strided_slice %409 {offsets = [0, 96], sizes = [2, 32], strides = [1, 1]} : vector<2x128xf32> to vector<2x32xf32>
    %418 = math.tanh %416 : vector<2x32xf32>
    %419 = arith.mulf %417, %418 : vector<2x32xf32>
    %420 = vector.extract_strided_slice %117 {offsets = [30, 0], sizes = [2, 128], strides = [1, 1]} : vector<32x128xf32> to vector<2x128xf32>
    %cst_99 = arith.constant dense<0.000000e+00> : vector<2x128xf32>
    %421 = tpu.matmul %419, %113, %cst_99 {dimension_numbers = #tpu.dot_dimension_numbers<[1], [0], [0], [1], [0, 0, 1, 1], [], []>} : vector<2x32xf32>, vector<32x128xf32>, vector<2x128xf32> -> vector<2x128xf32>
    %422 = arith.addf %420, %421 : vector<2x128xf32>
    %cst_100 = arith.constant 5.000000e-01 : f32
    %423 = vector.broadcast %cst_100 : f32 to vector<2x128xf32>
    %424 = arith.mulf %423, %422 : vector<2x128xf32>
    %425 = math.tanh %424 : vector<2x128xf32>
    %cst_101 = arith.constant 1.000000e+00 : f32
    %426 = vector.broadcast %cst_101 : f32 to vector<2x128xf32>
    %427 = arith.addf %425, %426 : vector<2x128xf32>
    %cst_102 = arith.constant 5.000000e-01 : f32
    %428 = vector.broadcast %cst_102 : f32 to vector<2x128xf32>
    %429 = arith.mulf %428, %427 : vector<2x128xf32>
    %430 = math.tanh %422 : vector<2x128xf32>
    %431 = vector.extract_strided_slice %429 {offsets = [0, 32], sizes = [2, 32], strides = [1, 1]} : vector<2x128xf32> to vector<2x32xf32>
    %432 = arith.mulf %431, %416 : vector<2x32xf32>
    %433 = vector.extract_strided_slice %429 {offsets = [0, 0], sizes = [2, 32], strides = [1, 1]} : vector<2x128xf32> to vector<2x32xf32>
    %434 = vector.extract_strided_slice %430 {offsets = [0, 64], sizes = [2, 32], strides = [1, 1]} : vector<2x128xf32> to vector<2x32xf32>
    %435 = arith.mulf %433, %434 : vector<2x32xf32>
    %436 = arith.addf %432, %435 : vector<2x32xf32>
    %437 = vector.extract_strided_slice %429 {offsets = [0, 96], sizes = [2, 32], strides = [1, 1]} : vector<2x128xf32> to vector<2x32xf32>
    %438 = math.tanh %436 : vector<2x32xf32>
    %439 = arith.mulf %437, %438 : vector<2x32xf32>
    %440 = tpu.concatenate %139, %159, %179, %199, %219, %239, %259, %279, %299, %319, %339, %359, %379, %399, %419, %439 in 0 : vector<2x32xf32>, vector<2x32xf32>, vector<2x32xf32>, vector<2x32xf32>, vector<2x32xf32>, vector<2x32xf32>, vector<2x32xf32>, vector<2x32xf32>, vector<2x32xf32>, vector<2x32xf32>, vector<2x32xf32>, vector<2x32xf32>, vector<2x32xf32>, vector<2x32xf32>, vector<2x32xf32>, vector<2x32xf32> -> vector<32x32xf32>
    %c0_103 = arith.constant 0 : index
    %c0_104 = arith.constant 0 : index
    %441 = vector.load %arg12[%c0_103, %c0_104] : memref<32x128xf32, #tpu.memory_space<vmem>>, vector<32x128xf32>
    %c0_105 = arith.constant 0 : index
    %c0_106 = arith.constant 0 : index
    %442 = vector.load %arg13[%c0_105, %c0_106] : memref<32x128xf32, #tpu.memory_space<vmem>>, vector<32x128xf32>
    %c0_107 = arith.constant 0 : index
    %c0_108 = arith.constant 0 : index
    %443 = vector.load %arg14[%c0_107, %c0_108] : memref<1x128xf32, #tpu.memory_space<vmem>>, vector<1x128xf32>
    %cst_109 = arith.constant dense<0.000000e+00> : vector<32x128xf32>
    %444 = tpu.matmul %440, %441, %cst_109 {dimension_numbers = #tpu.dot_dimension_numbers<[1], [0], [0], [1], [0, 0, 1, 1], [], []>} : vector<32x32xf32>, vector<32x128xf32>, vector<32x128xf32> -> vector<32x128xf32>
    %445 = vector.broadcast %443 : vector<1x128xf32> to vector<32x128xf32>
    %446 = arith.addf %444, %445 : vector<32x128xf32>
    %cst_110 = arith.constant 0.000000e+00 : f32
    %447 = vector.broadcast %cst_110 : f32 to vector<2x32xf32>
    %cst_111 = arith.constant 0.000000e+00 : f32
    %448 = vector.broadcast %cst_111 : f32 to vector<2x32xf32>
    %449 = vector.extract_strided_slice %446 {offsets = [0, 0], sizes = [2, 128], strides = [1, 1]} : vector<32x128xf32> to vector<2x128xf32>
    %cst_112 = arith.constant dense<0.000000e+00> : vector<2x128xf32>
    %450 = tpu.matmul %447, %442, %cst_112 {dimension_numbers = #tpu.dot_dimension_numbers<[1], [0], [0], [1], [0, 0, 1, 1], [], []>} : vector<2x32xf32>, vector<32x128xf32>, vector<2x128xf32> -> vector<2x128xf32>
    %451 = arith.addf %449, %450 : vector<2x128xf32>
    %cst_113 = arith.constant 5.000000e-01 : f32
    %452 = vector.broadcast %cst_113 : f32 to vector<2x128xf32>
    %453 = arith.mulf %452, %451 : vector<2x128xf32>
    %454 = math.tanh %453 : vector<2x128xf32>
    %cst_114 = arith.constant 1.000000e+00 : f32
    %455 = vector.broadcast %cst_114 : f32 to vector<2x128xf32>
    %456 = arith.addf %454, %455 : vector<2x128xf32>
    %cst_115 = arith.constant 5.000000e-01 : f32
    %457 = vector.broadcast %cst_115 : f32 to vector<2x128xf32>
    %458 = arith.mulf %457, %456 : vector<2x128xf32>
    %459 = math.tanh %451 : vector<2x128xf32>
    %460 = vector.extract_strided_slice %458 {offsets = [0, 32], sizes = [2, 32], strides = [1, 1]} : vector<2x128xf32> to vector<2x32xf32>
    %461 = arith.mulf %460, %448 : vector<2x32xf32>
    %462 = vector.extract_strided_slice %458 {offsets = [0, 0], sizes = [2, 32], strides = [1, 1]} : vector<2x128xf32> to vector<2x32xf32>
    %463 = vector.extract_strided_slice %459 {offsets = [0, 64], sizes = [2, 32], strides = [1, 1]} : vector<2x128xf32> to vector<2x32xf32>
    %464 = arith.mulf %462, %463 : vector<2x32xf32>
    %465 = arith.addf %461, %464 : vector<2x32xf32>
    %466 = vector.extract_strided_slice %458 {offsets = [0, 96], sizes = [2, 32], strides = [1, 1]} : vector<2x128xf32> to vector<2x32xf32>
    %467 = math.tanh %465 : vector<2x32xf32>
    %468 = arith.mulf %466, %467 : vector<2x32xf32>
    %c0_116 = arith.constant 0 : index
    %c0_117 = arith.constant 0 : index
    %c0_118 = arith.constant 0 : index
    %469 = vector.load %arg15[%c0_116, %c0_117, %c0_118] : memref<16x2x32xf32, #tpu.memory_space<vmem>>, vector<1x2x32xf32>
    %470 = vector.shape_cast %469 : vector<1x2x32xf32> to vector<2x32xf32>
    %471 = vector.shape_cast %468 : vector<2x32xf32> to vector<1x2x32xf32>
    tpu.vector_store %arg15[%c0_116, %c0_117, %c0_118], %471 {strides = array<i32>} : memref<16x2x32xf32, #tpu.memory_space<vmem>>, vector<1x2x32xf32>,
    %472 = vector.extract_strided_slice %446 {offsets = [2, 0], sizes = [2, 128], strides = [1, 1]} : vector<32x128xf32> to vector<2x128xf32>
    %cst_119 = arith.constant dense<0.000000e+00> : vector<2x128xf32>
    %473 = tpu.matmul %468, %442, %cst_119 {dimension_numbers = #tpu.dot_dimension_numbers<[1], [0], [0], [1], [0, 0, 1, 1], [], []>} : vector<2x32xf32>, vector<32x128xf32>, vector<2x128xf32> -> vector<2x128xf32>
    %474 = arith.addf %472, %473 : vector<2x128xf32>
    %cst_120 = arith.constant 5.000000e-01 : f32
    %475 = vector.broadcast %cst_120 : f32 to vector<2x128xf32>
    %476 = arith.mulf %475, %474 : vector<2x128xf32>
    %477 = math.tanh %476 : vector<2x128xf32>
    %cst_121 = arith.constant 1.000000e+00 : f32
    %478 = vector.broadcast %cst_121 : f32 to vector<2x128xf32>
    %479 = arith.addf %477, %478 : vector<2x128xf32>
    %cst_122 = arith.constant 5.000000e-01 : f32
    %480 = vector.broadcast %cst_122 : f32 to vector<2x128xf32>
    %481 = arith.mulf %480, %479 : vector<2x128xf32>
    %482 = math.tanh %474 : vector<2x128xf32>
    %483 = vector.extract_strided_slice %481 {offsets = [0, 32], sizes = [2, 32], strides = [1, 1]} : vector<2x128xf32> to vector<2x32xf32>
    %484 = arith.mulf %483, %465 : vector<2x32xf32>
    %485 = vector.extract_strided_slice %481 {offsets = [0, 0], sizes = [2, 32], strides = [1, 1]} : vector<2x128xf32> to vector<2x32xf32>
    %486 = vector.extract_strided_slice %482 {offsets = [0, 64], sizes = [2, 32], strides = [1, 1]} : vector<2x128xf32> to vector<2x32xf32>
    %487 = arith.mulf %485, %486 : vector<2x32xf32>
    %488 = arith.addf %484, %487 : vector<2x32xf32>
    %489 = vector.extract_strided_slice %481 {offsets = [0, 96], sizes = [2, 32], strides = [1, 1]} : vector<2x128xf32> to vector<2x32xf32>
    %490 = math.tanh %488 : vector<2x32xf32>
    %491 = arith.mulf %489, %490 : vector<2x32xf32>
    %c1 = arith.constant 1 : index
    %c0_123 = arith.constant 0 : index
    %c0_124 = arith.constant 0 : index
    %492 = vector.load %arg15[%c1, %c0_123, %c0_124] : memref<16x2x32xf32, #tpu.memory_space<vmem>>, vector<1x2x32xf32>
    %493 = vector.shape_cast %492 : vector<1x2x32xf32> to vector<2x32xf32>
    %494 = vector.shape_cast %491 : vector<2x32xf32> to vector<1x2x32xf32>
    tpu.vector_store %arg15[%c1, %c0_123, %c0_124], %494 {strides = array<i32>} : memref<16x2x32xf32, #tpu.memory_space<vmem>>, vector<1x2x32xf32>,
    %495 = vector.extract_strided_slice %446 {offsets = [4, 0], sizes = [2, 128], strides = [1, 1]} : vector<32x128xf32> to vector<2x128xf32>
    %cst_125 = arith.constant dense<0.000000e+00> : vector<2x128xf32>
    %496 = tpu.matmul %491, %442, %cst_125 {dimension_numbers = #tpu.dot_dimension_numbers<[1], [0], [0], [1], [0, 0, 1, 1], [], []>} : vector<2x32xf32>, vector<32x128xf32>, vector<2x128xf32> -> vector<2x128xf32>
    %497 = arith.addf %495, %496 : vector<2x128xf32>
    %cst_126 = arith.constant 5.000000e-01 : f32
    %498 = vector.broadcast %cst_126 : f32 to vector<2x128xf32>
    %499 = arith.mulf %498, %497 : vector<2x128xf32>
    %500 = math.tanh %499 : vector<2x128xf32>
    %cst_127 = arith.constant 1.000000e+00 : f32
    %501 = vector.broadcast %cst_127 : f32 to vector<2x128xf32>
    %502 = arith.addf %500, %501 : vector<2x128xf32>
    %cst_128 = arith.constant 5.000000e-01 : f32
    %503 = vector.broadcast %cst_128 : f32 to vector<2x128xf32>
    %504 = arith.mulf %503, %502 : vector<2x128xf32>
    %505 = math.tanh %497 : vector<2x128xf32>
    %506 = vector.extract_strided_slice %504 {offsets = [0, 32], sizes = [2, 32], strides = [1, 1]} : vector<2x128xf32> to vector<2x32xf32>
    %507 = arith.mulf %506, %488 : vector<2x32xf32>
    %508 = vector.extract_strided_slice %504 {offsets = [0, 0], sizes = [2, 32], strides = [1, 1]} : vector<2x128xf32> to vector<2x32xf32>
    %509 = vector.extract_strided_slice %505 {offsets = [0, 64], sizes = [2, 32], strides = [1, 1]} : vector<2x128xf32> to vector<2x32xf32>
    %510 = arith.mulf %508, %509 : vector<2x32xf32>
    %511 = arith.addf %507, %510 : vector<2x32xf32>
    %512 = vector.extract_strided_slice %504 {offsets = [0, 96], sizes = [2, 32], strides = [1, 1]} : vector<2x128xf32> to vector<2x32xf32>
    %513 = math.tanh %511 : vector<2x32xf32>
    %514 = arith.mulf %512, %513 : vector<2x32xf32>
    %c2 = arith.constant 2 : index
    %c0_129 = arith.constant 0 : index
    %c0_130 = arith.constant 0 : index
    %515 = vector.load %arg15[%c2, %c0_129, %c0_130] : memref<16x2x32xf32, #tpu.memory_space<vmem>>, vector<1x2x32xf32>
    %516 = vector.shape_cast %515 : vector<1x2x32xf32> to vector<2x32xf32>
    %517 = vector.shape_cast %514 : vector<2x32xf32> to vector<1x2x32xf32>
    tpu.vector_store %arg15[%c2, %c0_129, %c0_130], %517 {strides = array<i32>} : memref<16x2x32xf32, #tpu.memory_space<vmem>>, vector<1x2x32xf32>,
    %518 = vector.extract_strided_slice %446 {offsets = [6, 0], sizes = [2, 128], strides = [1, 1]} : vector<32x128xf32> to vector<2x128xf32>
    %cst_131 = arith.constant dense<0.000000e+00> : vector<2x128xf32>
    %519 = tpu.matmul %514, %442, %cst_131 {dimension_numbers = #tpu.dot_dimension_numbers<[1], [0], [0], [1], [0, 0, 1, 1], [], []>} : vector<2x32xf32>, vector<32x128xf32>, vector<2x128xf32> -> vector<2x128xf32>
    %520 = arith.addf %518, %519 : vector<2x128xf32>
    %cst_132 = arith.constant 5.000000e-01 : f32
    %521 = vector.broadcast %cst_132 : f32 to vector<2x128xf32>
    %522 = arith.mulf %521, %520 : vector<2x128xf32>
    %523 = math.tanh %522 : vector<2x128xf32>
    %cst_133 = arith.constant 1.000000e+00 : f32
    %524 = vector.broadcast %cst_133 : f32 to vector<2x128xf32>
    %525 = arith.addf %523, %524 : vector<2x128xf32>
    %cst_134 = arith.constant 5.000000e-01 : f32
    %526 = vector.broadcast %cst_134 : f32 to vector<2x128xf32>
    %527 = arith.mulf %526, %525 : vector<2x128xf32>
    %528 = math.tanh %520 : vector<2x128xf32>
    %529 = vector.extract_strided_slice %527 {offsets = [0, 32], sizes = [2, 32], strides = [1, 1]} : vector<2x128xf32> to vector<2x32xf32>
    %530 = arith.mulf %529, %511 : vector<2x32xf32>
    %531 = vector.extract_strided_slice %527 {offsets = [0, 0], sizes = [2, 32], strides = [1, 1]} : vector<2x128xf32> to vector<2x32xf32>
    %532 = vector.extract_strided_slice %528 {offsets = [0, 64], sizes = [2, 32], strides = [1, 1]} : vector<2x128xf32> to vector<2x32xf32>
    %533 = arith.mulf %531, %532 : vector<2x32xf32>
    %534 = arith.addf %530, %533 : vector<2x32xf32>
    %535 = vector.extract_strided_slice %527 {offsets = [0, 96], sizes = [2, 32], strides = [1, 1]} : vector<2x128xf32> to vector<2x32xf32>
    %536 = math.tanh %534 : vector<2x32xf32>
    %537 = arith.mulf %535, %536 : vector<2x32xf32>
    %c3 = arith.constant 3 : index
    %c0_135 = arith.constant 0 : index
    %c0_136 = arith.constant 0 : index
    %538 = vector.load %arg15[%c3, %c0_135, %c0_136] : memref<16x2x32xf32, #tpu.memory_space<vmem>>, vector<1x2x32xf32>
    %539 = vector.shape_cast %538 : vector<1x2x32xf32> to vector<2x32xf32>
    %540 = vector.shape_cast %537 : vector<2x32xf32> to vector<1x2x32xf32>
    tpu.vector_store %arg15[%c3, %c0_135, %c0_136], %540 {strides = array<i32>} : memref<16x2x32xf32, #tpu.memory_space<vmem>>, vector<1x2x32xf32>,
    %541 = vector.extract_strided_slice %446 {offsets = [8, 0], sizes = [2, 128], strides = [1, 1]} : vector<32x128xf32> to vector<2x128xf32>
    %cst_137 = arith.constant dense<0.000000e+00> : vector<2x128xf32>
    %542 = tpu.matmul %537, %442, %cst_137 {dimension_numbers = #tpu.dot_dimension_numbers<[1], [0], [0], [1], [0, 0, 1, 1], [], []>} : vector<2x32xf32>, vector<32x128xf32>, vector<2x128xf32> -> vector<2x128xf32>
    %543 = arith.addf %541, %542 : vector<2x128xf32>
    %cst_138 = arith.constant 5.000000e-01 : f32
    %544 = vector.broadcast %cst_138 : f32 to vector<2x128xf32>
    %545 = arith.mulf %544, %543 : vector<2x128xf32>
    %546 = math.tanh %545 : vector<2x128xf32>
    %cst_139 = arith.constant 1.000000e+00 : f32
    %547 = vector.broadcast %cst_139 : f32 to vector<2x128xf32>
    %548 = arith.addf %546, %547 : vector<2x128xf32>
    %cst_140 = arith.constant 5.000000e-01 : f32
    %549 = vector.broadcast %cst_140 : f32 to vector<2x128xf32>
    %550 = arith.mulf %549, %548 : vector<2x128xf32>
    %551 = math.tanh %543 : vector<2x128xf32>
    %552 = vector.extract_strided_slice %550 {offsets = [0, 32], sizes = [2, 32], strides = [1, 1]} : vector<2x128xf32> to vector<2x32xf32>
    %553 = arith.mulf %552, %534 : vector<2x32xf32>
    %554 = vector.extract_strided_slice %550 {offsets = [0, 0], sizes = [2, 32], strides = [1, 1]} : vector<2x128xf32> to vector<2x32xf32>
    %555 = vector.extract_strided_slice %551 {offsets = [0, 64], sizes = [2, 32], strides = [1, 1]} : vector<2x128xf32> to vector<2x32xf32>
    %556 = arith.mulf %554, %555 : vector<2x32xf32>
    %557 = arith.addf %553, %556 : vector<2x32xf32>
    %558 = vector.extract_strided_slice %550 {offsets = [0, 96], sizes = [2, 32], strides = [1, 1]} : vector<2x128xf32> to vector<2x32xf32>
    %559 = math.tanh %557 : vector<2x32xf32>
    %560 = arith.mulf %558, %559 : vector<2x32xf32>
    %c4 = arith.constant 4 : index
    %c0_141 = arith.constant 0 : index
    %c0_142 = arith.constant 0 : index
    %561 = vector.load %arg15[%c4, %c0_141, %c0_142] : memref<16x2x32xf32, #tpu.memory_space<vmem>>, vector<1x2x32xf32>
    %562 = vector.shape_cast %561 : vector<1x2x32xf32> to vector<2x32xf32>
    %563 = vector.shape_cast %560 : vector<2x32xf32> to vector<1x2x32xf32>
    tpu.vector_store %arg15[%c4, %c0_141, %c0_142], %563 {strides = array<i32>} : memref<16x2x32xf32, #tpu.memory_space<vmem>>, vector<1x2x32xf32>,
    %564 = vector.extract_strided_slice %446 {offsets = [10, 0], sizes = [2, 128], strides = [1, 1]} : vector<32x128xf32> to vector<2x128xf32>
    %cst_143 = arith.constant dense<0.000000e+00> : vector<2x128xf32>
    %565 = tpu.matmul %560, %442, %cst_143 {dimension_numbers = #tpu.dot_dimension_numbers<[1], [0], [0], [1], [0, 0, 1, 1], [], []>} : vector<2x32xf32>, vector<32x128xf32>, vector<2x128xf32> -> vector<2x128xf32>
    %566 = arith.addf %564, %565 : vector<2x128xf32>
    %cst_144 = arith.constant 5.000000e-01 : f32
    %567 = vector.broadcast %cst_144 : f32 to vector<2x128xf32>
    %568 = arith.mulf %567, %566 : vector<2x128xf32>
    %569 = math.tanh %568 : vector<2x128xf32>
    %cst_145 = arith.constant 1.000000e+00 : f32
    %570 = vector.broadcast %cst_145 : f32 to vector<2x128xf32>
    %571 = arith.addf %569, %570 : vector<2x128xf32>
    %cst_146 = arith.constant 5.000000e-01 : f32
    %572 = vector.broadcast %cst_146 : f32 to vector<2x128xf32>
    %573 = arith.mulf %572, %571 : vector<2x128xf32>
    %574 = math.tanh %566 : vector<2x128xf32>
    %575 = vector.extract_strided_slice %573 {offsets = [0, 32], sizes = [2, 32], strides = [1, 1]} : vector<2x128xf32> to vector<2x32xf32>
    %576 = arith.mulf %575, %557 : vector<2x32xf32>
    %577 = vector.extract_strided_slice %573 {offsets = [0, 0], sizes = [2, 32], strides = [1, 1]} : vector<2x128xf32> to vector<2x32xf32>
    %578 = vector.extract_strided_slice %574 {offsets = [0, 64], sizes = [2, 32], strides = [1, 1]} : vector<2x128xf32> to vector<2x32xf32>
    %579 = arith.mulf %577, %578 : vector<2x32xf32>
    %580 = arith.addf %576, %579 : vector<2x32xf32>
    %581 = vector.extract_strided_slice %573 {offsets = [0, 96], sizes = [2, 32], strides = [1, 1]} : vector<2x128xf32> to vector<2x32xf32>
    %582 = math.tanh %580 : vector<2x32xf32>
    %583 = arith.mulf %581, %582 : vector<2x32xf32>
    %c5 = arith.constant 5 : index
    %c0_147 = arith.constant 0 : index
    %c0_148 = arith.constant 0 : index
    %584 = vector.load %arg15[%c5, %c0_147, %c0_148] : memref<16x2x32xf32, #tpu.memory_space<vmem>>, vector<1x2x32xf32>
    %585 = vector.shape_cast %584 : vector<1x2x32xf32> to vector<2x32xf32>
    %586 = vector.shape_cast %583 : vector<2x32xf32> to vector<1x2x32xf32>
    tpu.vector_store %arg15[%c5, %c0_147, %c0_148], %586 {strides = array<i32>} : memref<16x2x32xf32, #tpu.memory_space<vmem>>, vector<1x2x32xf32>,
    %587 = vector.extract_strided_slice %446 {offsets = [12, 0], sizes = [2, 128], strides = [1, 1]} : vector<32x128xf32> to vector<2x128xf32>
    %cst_149 = arith.constant dense<0.000000e+00> : vector<2x128xf32>
    %588 = tpu.matmul %583, %442, %cst_149 {dimension_numbers = #tpu.dot_dimension_numbers<[1], [0], [0], [1], [0, 0, 1, 1], [], []>} : vector<2x32xf32>, vector<32x128xf32>, vector<2x128xf32> -> vector<2x128xf32>
    %589 = arith.addf %587, %588 : vector<2x128xf32>
    %cst_150 = arith.constant 5.000000e-01 : f32
    %590 = vector.broadcast %cst_150 : f32 to vector<2x128xf32>
    %591 = arith.mulf %590, %589 : vector<2x128xf32>
    %592 = math.tanh %591 : vector<2x128xf32>
    %cst_151 = arith.constant 1.000000e+00 : f32
    %593 = vector.broadcast %cst_151 : f32 to vector<2x128xf32>
    %594 = arith.addf %592, %593 : vector<2x128xf32>
    %cst_152 = arith.constant 5.000000e-01 : f32
    %595 = vector.broadcast %cst_152 : f32 to vector<2x128xf32>
    %596 = arith.mulf %595, %594 : vector<2x128xf32>
    %597 = math.tanh %589 : vector<2x128xf32>
    %598 = vector.extract_strided_slice %596 {offsets = [0, 32], sizes = [2, 32], strides = [1, 1]} : vector<2x128xf32> to vector<2x32xf32>
    %599 = arith.mulf %598, %580 : vector<2x32xf32>
    %600 = vector.extract_strided_slice %596 {offsets = [0, 0], sizes = [2, 32], strides = [1, 1]} : vector<2x128xf32> to vector<2x32xf32>
    %601 = vector.extract_strided_slice %597 {offsets = [0, 64], sizes = [2, 32], strides = [1, 1]} : vector<2x128xf32> to vector<2x32xf32>
    %602 = arith.mulf %600, %601 : vector<2x32xf32>
    %603 = arith.addf %599, %602 : vector<2x32xf32>
    %604 = vector.extract_strided_slice %596 {offsets = [0, 96], sizes = [2, 32], strides = [1, 1]} : vector<2x128xf32> to vector<2x32xf32>
    %605 = math.tanh %603 : vector<2x32xf32>
    %606 = arith.mulf %604, %605 : vector<2x32xf32>
    %c6 = arith.constant 6 : index
    %c0_153 = arith.constant 0 : index
    %c0_154 = arith.constant 0 : index
    %607 = vector.load %arg15[%c6, %c0_153, %c0_154] : memref<16x2x32xf32, #tpu.memory_space<vmem>>, vector<1x2x32xf32>
    %608 = vector.shape_cast %607 : vector<1x2x32xf32> to vector<2x32xf32>
    %609 = vector.shape_cast %606 : vector<2x32xf32> to vector<1x2x32xf32>
    tpu.vector_store %arg15[%c6, %c0_153, %c0_154], %609 {strides = array<i32>} : memref<16x2x32xf32, #tpu.memory_space<vmem>>, vector<1x2x32xf32>,
    %610 = vector.extract_strided_slice %446 {offsets = [14, 0], sizes = [2, 128], strides = [1, 1]} : vector<32x128xf32> to vector<2x128xf32>
    %cst_155 = arith.constant dense<0.000000e+00> : vector<2x128xf32>
    %611 = tpu.matmul %606, %442, %cst_155 {dimension_numbers = #tpu.dot_dimension_numbers<[1], [0], [0], [1], [0, 0, 1, 1], [], []>} : vector<2x32xf32>, vector<32x128xf32>, vector<2x128xf32> -> vector<2x128xf32>
    %612 = arith.addf %610, %611 : vector<2x128xf32>
    %cst_156 = arith.constant 5.000000e-01 : f32
    %613 = vector.broadcast %cst_156 : f32 to vector<2x128xf32>
    %614 = arith.mulf %613, %612 : vector<2x128xf32>
    %615 = math.tanh %614 : vector<2x128xf32>
    %cst_157 = arith.constant 1.000000e+00 : f32
    %616 = vector.broadcast %cst_157 : f32 to vector<2x128xf32>
    %617 = arith.addf %615, %616 : vector<2x128xf32>
    %cst_158 = arith.constant 5.000000e-01 : f32
    %618 = vector.broadcast %cst_158 : f32 to vector<2x128xf32>
    %619 = arith.mulf %618, %617 : vector<2x128xf32>
    %620 = math.tanh %612 : vector<2x128xf32>
    %621 = vector.extract_strided_slice %619 {offsets = [0, 32], sizes = [2, 32], strides = [1, 1]} : vector<2x128xf32> to vector<2x32xf32>
    %622 = arith.mulf %621, %603 : vector<2x32xf32>
    %623 = vector.extract_strided_slice %619 {offsets = [0, 0], sizes = [2, 32], strides = [1, 1]} : vector<2x128xf32> to vector<2x32xf32>
    %624 = vector.extract_strided_slice %620 {offsets = [0, 64], sizes = [2, 32], strides = [1, 1]} : vector<2x128xf32> to vector<2x32xf32>
    %625 = arith.mulf %623, %624 : vector<2x32xf32>
    %626 = arith.addf %622, %625 : vector<2x32xf32>
    %627 = vector.extract_strided_slice %619 {offsets = [0, 96], sizes = [2, 32], strides = [1, 1]} : vector<2x128xf32> to vector<2x32xf32>
    %628 = math.tanh %626 : vector<2x32xf32>
    %629 = arith.mulf %627, %628 : vector<2x32xf32>
    %c7 = arith.constant 7 : index
    %c0_159 = arith.constant 0 : index
    %c0_160 = arith.constant 0 : index
    %630 = vector.load %arg15[%c7, %c0_159, %c0_160] : memref<16x2x32xf32, #tpu.memory_space<vmem>>, vector<1x2x32xf32>
    %631 = vector.shape_cast %630 : vector<1x2x32xf32> to vector<2x32xf32>
    %632 = vector.shape_cast %629 : vector<2x32xf32> to vector<1x2x32xf32>
    tpu.vector_store %arg15[%c7, %c0_159, %c0_160], %632 {strides = array<i32>} : memref<16x2x32xf32, #tpu.memory_space<vmem>>, vector<1x2x32xf32>,
    %633 = vector.extract_strided_slice %446 {offsets = [16, 0], sizes = [2, 128], strides = [1, 1]} : vector<32x128xf32> to vector<2x128xf32>
    %cst_161 = arith.constant dense<0.000000e+00> : vector<2x128xf32>
    %634 = tpu.matmul %629, %442, %cst_161 {dimension_numbers = #tpu.dot_dimension_numbers<[1], [0], [0], [1], [0, 0, 1, 1], [], []>} : vector<2x32xf32>, vector<32x128xf32>, vector<2x128xf32> -> vector<2x128xf32>
    %635 = arith.addf %633, %634 : vector<2x128xf32>
    %cst_162 = arith.constant 5.000000e-01 : f32
    %636 = vector.broadcast %cst_162 : f32 to vector<2x128xf32>
    %637 = arith.mulf %636, %635 : vector<2x128xf32>
    %638 = math.tanh %637 : vector<2x128xf32>
    %cst_163 = arith.constant 1.000000e+00 : f32
    %639 = vector.broadcast %cst_163 : f32 to vector<2x128xf32>
    %640 = arith.addf %638, %639 : vector<2x128xf32>
    %cst_164 = arith.constant 5.000000e-01 : f32
    %641 = vector.broadcast %cst_164 : f32 to vector<2x128xf32>
    %642 = arith.mulf %641, %640 : vector<2x128xf32>
    %643 = math.tanh %635 : vector<2x128xf32>
    %644 = vector.extract_strided_slice %642 {offsets = [0, 32], sizes = [2, 32], strides = [1, 1]} : vector<2x128xf32> to vector<2x32xf32>
    %645 = arith.mulf %644, %626 : vector<2x32xf32>
    %646 = vector.extract_strided_slice %642 {offsets = [0, 0], sizes = [2, 32], strides = [1, 1]} : vector<2x128xf32> to vector<2x32xf32>
    %647 = vector.extract_strided_slice %643 {offsets = [0, 64], sizes = [2, 32], strides = [1, 1]} : vector<2x128xf32> to vector<2x32xf32>
    %648 = arith.mulf %646, %647 : vector<2x32xf32>
    %649 = arith.addf %645, %648 : vector<2x32xf32>
    %650 = vector.extract_strided_slice %642 {offsets = [0, 96], sizes = [2, 32], strides = [1, 1]} : vector<2x128xf32> to vector<2x32xf32>
    %651 = math.tanh %649 : vector<2x32xf32>
    %652 = arith.mulf %650, %651 : vector<2x32xf32>
    %c8 = arith.constant 8 : index
    %c0_165 = arith.constant 0 : index
    %c0_166 = arith.constant 0 : index
    %653 = vector.load %arg15[%c8, %c0_165, %c0_166] : memref<16x2x32xf32, #tpu.memory_space<vmem>>, vector<1x2x32xf32>
    %654 = vector.shape_cast %653 : vector<1x2x32xf32> to vector<2x32xf32>
    %655 = vector.shape_cast %652 : vector<2x32xf32> to vector<1x2x32xf32>
    tpu.vector_store %arg15[%c8, %c0_165, %c0_166], %655 {strides = array<i32>} : memref<16x2x32xf32, #tpu.memory_space<vmem>>, vector<1x2x32xf32>,
    %656 = vector.extract_strided_slice %446 {offsets = [18, 0], sizes = [2, 128], strides = [1, 1]} : vector<32x128xf32> to vector<2x128xf32>
    %cst_167 = arith.constant dense<0.000000e+00> : vector<2x128xf32>
    %657 = tpu.matmul %652, %442, %cst_167 {dimension_numbers = #tpu.dot_dimension_numbers<[1], [0], [0], [1], [0, 0, 1, 1], [], []>} : vector<2x32xf32>, vector<32x128xf32>, vector<2x128xf32> -> vector<2x128xf32>
    %658 = arith.addf %656, %657 : vector<2x128xf32>
    %cst_168 = arith.constant 5.000000e-01 : f32
    %659 = vector.broadcast %cst_168 : f32 to vector<2x128xf32>
    %660 = arith.mulf %659, %658 : vector<2x128xf32>
    %661 = math.tanh %660 : vector<2x128xf32>
    %cst_169 = arith.constant 1.000000e+00 : f32
    %662 = vector.broadcast %cst_169 : f32 to vector<2x128xf32>
    %663 = arith.addf %661, %662 : vector<2x128xf32>
    %cst_170 = arith.constant 5.000000e-01 : f32
    %664 = vector.broadcast %cst_170 : f32 to vector<2x128xf32>
    %665 = arith.mulf %664, %663 : vector<2x128xf32>
    %666 = math.tanh %658 : vector<2x128xf32>
    %667 = vector.extract_strided_slice %665 {offsets = [0, 32], sizes = [2, 32], strides = [1, 1]} : vector<2x128xf32> to vector<2x32xf32>
    %668 = arith.mulf %667, %649 : vector<2x32xf32>
    %669 = vector.extract_strided_slice %665 {offsets = [0, 0], sizes = [2, 32], strides = [1, 1]} : vector<2x128xf32> to vector<2x32xf32>
    %670 = vector.extract_strided_slice %666 {offsets = [0, 64], sizes = [2, 32], strides = [1, 1]} : vector<2x128xf32> to vector<2x32xf32>
    %671 = arith.mulf %669, %670 : vector<2x32xf32>
    %672 = arith.addf %668, %671 : vector<2x32xf32>
    %673 = vector.extract_strided_slice %665 {offsets = [0, 96], sizes = [2, 32], strides = [1, 1]} : vector<2x128xf32> to vector<2x32xf32>
    %674 = math.tanh %672 : vector<2x32xf32>
    %675 = arith.mulf %673, %674 : vector<2x32xf32>
    %c9 = arith.constant 9 : index
    %c0_171 = arith.constant 0 : index
    %c0_172 = arith.constant 0 : index
    %676 = vector.load %arg15[%c9, %c0_171, %c0_172] : memref<16x2x32xf32, #tpu.memory_space<vmem>>, vector<1x2x32xf32>
    %677 = vector.shape_cast %676 : vector<1x2x32xf32> to vector<2x32xf32>
    %678 = vector.shape_cast %675 : vector<2x32xf32> to vector<1x2x32xf32>
    tpu.vector_store %arg15[%c9, %c0_171, %c0_172], %678 {strides = array<i32>} : memref<16x2x32xf32, #tpu.memory_space<vmem>>, vector<1x2x32xf32>,
    %679 = vector.extract_strided_slice %446 {offsets = [20, 0], sizes = [2, 128], strides = [1, 1]} : vector<32x128xf32> to vector<2x128xf32>
    %cst_173 = arith.constant dense<0.000000e+00> : vector<2x128xf32>
    %680 = tpu.matmul %675, %442, %cst_173 {dimension_numbers = #tpu.dot_dimension_numbers<[1], [0], [0], [1], [0, 0, 1, 1], [], []>} : vector<2x32xf32>, vector<32x128xf32>, vector<2x128xf32> -> vector<2x128xf32>
    %681 = arith.addf %679, %680 : vector<2x128xf32>
    %cst_174 = arith.constant 5.000000e-01 : f32
    %682 = vector.broadcast %cst_174 : f32 to vector<2x128xf32>
    %683 = arith.mulf %682, %681 : vector<2x128xf32>
    %684 = math.tanh %683 : vector<2x128xf32>
    %cst_175 = arith.constant 1.000000e+00 : f32
    %685 = vector.broadcast %cst_175 : f32 to vector<2x128xf32>
    %686 = arith.addf %684, %685 : vector<2x128xf32>
    %cst_176 = arith.constant 5.000000e-01 : f32
    %687 = vector.broadcast %cst_176 : f32 to vector<2x128xf32>
    %688 = arith.mulf %687, %686 : vector<2x128xf32>
    %689 = math.tanh %681 : vector<2x128xf32>
    %690 = vector.extract_strided_slice %688 {offsets = [0, 32], sizes = [2, 32], strides = [1, 1]} : vector<2x128xf32> to vector<2x32xf32>
    %691 = arith.mulf %690, %672 : vector<2x32xf32>
    %692 = vector.extract_strided_slice %688 {offsets = [0, 0], sizes = [2, 32], strides = [1, 1]} : vector<2x128xf32> to vector<2x32xf32>
    %693 = vector.extract_strided_slice %689 {offsets = [0, 64], sizes = [2, 32], strides = [1, 1]} : vector<2x128xf32> to vector<2x32xf32>
    %694 = arith.mulf %692, %693 : vector<2x32xf32>
    %695 = arith.addf %691, %694 : vector<2x32xf32>
    %696 = vector.extract_strided_slice %688 {offsets = [0, 96], sizes = [2, 32], strides = [1, 1]} : vector<2x128xf32> to vector<2x32xf32>
    %697 = math.tanh %695 : vector<2x32xf32>
    %698 = arith.mulf %696, %697 : vector<2x32xf32>
    %c10 = arith.constant 10 : index
    %c0_177 = arith.constant 0 : index
    %c0_178 = arith.constant 0 : index
    %699 = vector.load %arg15[%c10, %c0_177, %c0_178] : memref<16x2x32xf32, #tpu.memory_space<vmem>>, vector<1x2x32xf32>
    %700 = vector.shape_cast %699 : vector<1x2x32xf32> to vector<2x32xf32>
    %701 = vector.shape_cast %698 : vector<2x32xf32> to vector<1x2x32xf32>
    tpu.vector_store %arg15[%c10, %c0_177, %c0_178], %701 {strides = array<i32>} : memref<16x2x32xf32, #tpu.memory_space<vmem>>, vector<1x2x32xf32>,
    %702 = vector.extract_strided_slice %446 {offsets = [22, 0], sizes = [2, 128], strides = [1, 1]} : vector<32x128xf32> to vector<2x128xf32>
    %cst_179 = arith.constant dense<0.000000e+00> : vector<2x128xf32>
    %703 = tpu.matmul %698, %442, %cst_179 {dimension_numbers = #tpu.dot_dimension_numbers<[1], [0], [0], [1], [0, 0, 1, 1], [], []>} : vector<2x32xf32>, vector<32x128xf32>, vector<2x128xf32> -> vector<2x128xf32>
    %704 = arith.addf %702, %703 : vector<2x128xf32>
    %cst_180 = arith.constant 5.000000e-01 : f32
    %705 = vector.broadcast %cst_180 : f32 to vector<2x128xf32>
    %706 = arith.mulf %705, %704 : vector<2x128xf32>
    %707 = math.tanh %706 : vector<2x128xf32>
    %cst_181 = arith.constant 1.000000e+00 : f32
    %708 = vector.broadcast %cst_181 : f32 to vector<2x128xf32>
    %709 = arith.addf %707, %708 : vector<2x128xf32>
    %cst_182 = arith.constant 5.000000e-01 : f32
    %710 = vector.broadcast %cst_182 : f32 to vector<2x128xf32>
    %711 = arith.mulf %710, %709 : vector<2x128xf32>
    %712 = math.tanh %704 : vector<2x128xf32>
    %713 = vector.extract_strided_slice %711 {offsets = [0, 32], sizes = [2, 32], strides = [1, 1]} : vector<2x128xf32> to vector<2x32xf32>
    %714 = arith.mulf %713, %695 : vector<2x32xf32>
    %715 = vector.extract_strided_slice %711 {offsets = [0, 0], sizes = [2, 32], strides = [1, 1]} : vector<2x128xf32> to vector<2x32xf32>
    %716 = vector.extract_strided_slice %712 {offsets = [0, 64], sizes = [2, 32], strides = [1, 1]} : vector<2x128xf32> to vector<2x32xf32>
    %717 = arith.mulf %715, %716 : vector<2x32xf32>
    %718 = arith.addf %714, %717 : vector<2x32xf32>
    %719 = vector.extract_strided_slice %711 {offsets = [0, 96], sizes = [2, 32], strides = [1, 1]} : vector<2x128xf32> to vector<2x32xf32>
    %720 = math.tanh %718 : vector<2x32xf32>
    %721 = arith.mulf %719, %720 : vector<2x32xf32>
    %c11 = arith.constant 11 : index
    %c0_183 = arith.constant 0 : index
    %c0_184 = arith.constant 0 : index
    %722 = vector.load %arg15[%c11, %c0_183, %c0_184] : memref<16x2x32xf32, #tpu.memory_space<vmem>>, vector<1x2x32xf32>
    %723 = vector.shape_cast %722 : vector<1x2x32xf32> to vector<2x32xf32>
    %724 = vector.shape_cast %721 : vector<2x32xf32> to vector<1x2x32xf32>
    tpu.vector_store %arg15[%c11, %c0_183, %c0_184], %724 {strides = array<i32>} : memref<16x2x32xf32, #tpu.memory_space<vmem>>, vector<1x2x32xf32>,
    %725 = vector.extract_strided_slice %446 {offsets = [24, 0], sizes = [2, 128], strides = [1, 1]} : vector<32x128xf32> to vector<2x128xf32>
    %cst_185 = arith.constant dense<0.000000e+00> : vector<2x128xf32>
    %726 = tpu.matmul %721, %442, %cst_185 {dimension_numbers = #tpu.dot_dimension_numbers<[1], [0], [0], [1], [0, 0, 1, 1], [], []>} : vector<2x32xf32>, vector<32x128xf32>, vector<2x128xf32> -> vector<2x128xf32>
    %727 = arith.addf %725, %726 : vector<2x128xf32>
    %cst_186 = arith.constant 5.000000e-01 : f32
    %728 = vector.broadcast %cst_186 : f32 to vector<2x128xf32>
    %729 = arith.mulf %728, %727 : vector<2x128xf32>
    %730 = math.tanh %729 : vector<2x128xf32>
    %cst_187 = arith.constant 1.000000e+00 : f32
    %731 = vector.broadcast %cst_187 : f32 to vector<2x128xf32>
    %732 = arith.addf %730, %731 : vector<2x128xf32>
    %cst_188 = arith.constant 5.000000e-01 : f32
    %733 = vector.broadcast %cst_188 : f32 to vector<2x128xf32>
    %734 = arith.mulf %733, %732 : vector<2x128xf32>
    %735 = math.tanh %727 : vector<2x128xf32>
    %736 = vector.extract_strided_slice %734 {offsets = [0, 32], sizes = [2, 32], strides = [1, 1]} : vector<2x128xf32> to vector<2x32xf32>
    %737 = arith.mulf %736, %718 : vector<2x32xf32>
    %738 = vector.extract_strided_slice %734 {offsets = [0, 0], sizes = [2, 32], strides = [1, 1]} : vector<2x128xf32> to vector<2x32xf32>
    %739 = vector.extract_strided_slice %735 {offsets = [0, 64], sizes = [2, 32], strides = [1, 1]} : vector<2x128xf32> to vector<2x32xf32>
    %740 = arith.mulf %738, %739 : vector<2x32xf32>
    %741 = arith.addf %737, %740 : vector<2x32xf32>
    %742 = vector.extract_strided_slice %734 {offsets = [0, 96], sizes = [2, 32], strides = [1, 1]} : vector<2x128xf32> to vector<2x32xf32>
    %743 = math.tanh %741 : vector<2x32xf32>
    %744 = arith.mulf %742, %743 : vector<2x32xf32>
    %c12 = arith.constant 12 : index
    %c0_189 = arith.constant 0 : index
    %c0_190 = arith.constant 0 : index
    %745 = vector.load %arg15[%c12, %c0_189, %c0_190] : memref<16x2x32xf32, #tpu.memory_space<vmem>>, vector<1x2x32xf32>
    %746 = vector.shape_cast %745 : vector<1x2x32xf32> to vector<2x32xf32>
    %747 = vector.shape_cast %744 : vector<2x32xf32> to vector<1x2x32xf32>
    tpu.vector_store %arg15[%c12, %c0_189, %c0_190], %747 {strides = array<i32>} : memref<16x2x32xf32, #tpu.memory_space<vmem>>, vector<1x2x32xf32>,
    %748 = vector.extract_strided_slice %446 {offsets = [26, 0], sizes = [2, 128], strides = [1, 1]} : vector<32x128xf32> to vector<2x128xf32>
    %cst_191 = arith.constant dense<0.000000e+00> : vector<2x128xf32>
    %749 = tpu.matmul %744, %442, %cst_191 {dimension_numbers = #tpu.dot_dimension_numbers<[1], [0], [0], [1], [0, 0, 1, 1], [], []>} : vector<2x32xf32>, vector<32x128xf32>, vector<2x128xf32> -> vector<2x128xf32>
    %750 = arith.addf %748, %749 : vector<2x128xf32>
    %cst_192 = arith.constant 5.000000e-01 : f32
    %751 = vector.broadcast %cst_192 : f32 to vector<2x128xf32>
    %752 = arith.mulf %751, %750 : vector<2x128xf32>
    %753 = math.tanh %752 : vector<2x128xf32>
    %cst_193 = arith.constant 1.000000e+00 : f32
    %754 = vector.broadcast %cst_193 : f32 to vector<2x128xf32>
    %755 = arith.addf %753, %754 : vector<2x128xf32>
    %cst_194 = arith.constant 5.000000e-01 : f32
    %756 = vector.broadcast %cst_194 : f32 to vector<2x128xf32>
    %757 = arith.mulf %756, %755 : vector<2x128xf32>
    %758 = math.tanh %750 : vector<2x128xf32>
    %759 = vector.extract_strided_slice %757 {offsets = [0, 32], sizes = [2, 32], strides = [1, 1]} : vector<2x128xf32> to vector<2x32xf32>
    %760 = arith.mulf %759, %741 : vector<2x32xf32>
    %761 = vector.extract_strided_slice %757 {offsets = [0, 0], sizes = [2, 32], strides = [1, 1]} : vector<2x128xf32> to vector<2x32xf32>
    %762 = vector.extract_strided_slice %758 {offsets = [0, 64], sizes = [2, 32], strides = [1, 1]} : vector<2x128xf32> to vector<2x32xf32>
    %763 = arith.mulf %761, %762 : vector<2x32xf32>
    %764 = arith.addf %760, %763 : vector<2x32xf32>
    %765 = vector.extract_strided_slice %757 {offsets = [0, 96], sizes = [2, 32], strides = [1, 1]} : vector<2x128xf32> to vector<2x32xf32>
    %766 = math.tanh %764 : vector<2x32xf32>
    %767 = arith.mulf %765, %766 : vector<2x32xf32>
    %c13 = arith.constant 13 : index
    %c0_195 = arith.constant 0 : index
    %c0_196 = arith.constant 0 : index
    %768 = vector.load %arg15[%c13, %c0_195, %c0_196] : memref<16x2x32xf32, #tpu.memory_space<vmem>>, vector<1x2x32xf32>
    %769 = vector.shape_cast %768 : vector<1x2x32xf32> to vector<2x32xf32>
    %770 = vector.shape_cast %767 : vector<2x32xf32> to vector<1x2x32xf32>
    tpu.vector_store %arg15[%c13, %c0_195, %c0_196], %770 {strides = array<i32>} : memref<16x2x32xf32, #tpu.memory_space<vmem>>, vector<1x2x32xf32>,
    %771 = vector.extract_strided_slice %446 {offsets = [28, 0], sizes = [2, 128], strides = [1, 1]} : vector<32x128xf32> to vector<2x128xf32>
    %cst_197 = arith.constant dense<0.000000e+00> : vector<2x128xf32>
    %772 = tpu.matmul %767, %442, %cst_197 {dimension_numbers = #tpu.dot_dimension_numbers<[1], [0], [0], [1], [0, 0, 1, 1], [], []>} : vector<2x32xf32>, vector<32x128xf32>, vector<2x128xf32> -> vector<2x128xf32>
    %773 = arith.addf %771, %772 : vector<2x128xf32>
    %cst_198 = arith.constant 5.000000e-01 : f32
    %774 = vector.broadcast %cst_198 : f32 to vector<2x128xf32>
    %775 = arith.mulf %774, %773 : vector<2x128xf32>
    %776 = math.tanh %775 : vector<2x128xf32>
    %cst_199 = arith.constant 1.000000e+00 : f32
    %777 = vector.broadcast %cst_199 : f32 to vector<2x128xf32>
    %778 = arith.addf %776, %777 : vector<2x128xf32>
    %cst_200 = arith.constant 5.000000e-01 : f32
    %779 = vector.broadcast %cst_200 : f32 to vector<2x128xf32>
    %780 = arith.mulf %779, %778 : vector<2x128xf32>
    %781 = math.tanh %773 : vector<2x128xf32>
    %782 = vector.extract_strided_slice %780 {offsets = [0, 32], sizes = [2, 32], strides = [1, 1]} : vector<2x128xf32> to vector<2x32xf32>
    %783 = arith.mulf %782, %764 : vector<2x32xf32>
    %784 = vector.extract_strided_slice %780 {offsets = [0, 0], sizes = [2, 32], strides = [1, 1]} : vector<2x128xf32> to vector<2x32xf32>
    %785 = vector.extract_strided_slice %781 {offsets = [0, 64], sizes = [2, 32], strides = [1, 1]} : vector<2x128xf32> to vector<2x32xf32>
    %786 = arith.mulf %784, %785 : vector<2x32xf32>
    %787 = arith.addf %783, %786 : vector<2x32xf32>
    %788 = vector.extract_strided_slice %780 {offsets = [0, 96], sizes = [2, 32], strides = [1, 1]} : vector<2x128xf32> to vector<2x32xf32>
    %789 = math.tanh %787 : vector<2x32xf32>
    %790 = arith.mulf %788, %789 : vector<2x32xf32>
    %c14 = arith.constant 14 : index
    %c0_201 = arith.constant 0 : index
    %c0_202 = arith.constant 0 : index
    %791 = vector.load %arg15[%c14, %c0_201, %c0_202] : memref<16x2x32xf32, #tpu.memory_space<vmem>>, vector<1x2x32xf32>
    %792 = vector.shape_cast %791 : vector<1x2x32xf32> to vector<2x32xf32>
    %793 = vector.shape_cast %790 : vector<2x32xf32> to vector<1x2x32xf32>
    tpu.vector_store %arg15[%c14, %c0_201, %c0_202], %793 {strides = array<i32>} : memref<16x2x32xf32, #tpu.memory_space<vmem>>, vector<1x2x32xf32>,
    %794 = vector.extract_strided_slice %446 {offsets = [30, 0], sizes = [2, 128], strides = [1, 1]} : vector<32x128xf32> to vector<2x128xf32>
    %cst_203 = arith.constant dense<0.000000e+00> : vector<2x128xf32>
    %795 = tpu.matmul %790, %442, %cst_203 {dimension_numbers = #tpu.dot_dimension_numbers<[1], [0], [0], [1], [0, 0, 1, 1], [], []>} : vector<2x32xf32>, vector<32x128xf32>, vector<2x128xf32> -> vector<2x128xf32>
    %796 = arith.addf %794, %795 : vector<2x128xf32>
    %cst_204 = arith.constant 5.000000e-01 : f32
    %797 = vector.broadcast %cst_204 : f32 to vector<2x128xf32>
    %798 = arith.mulf %797, %796 : vector<2x128xf32>
    %799 = math.tanh %798 : vector<2x128xf32>
    %cst_205 = arith.constant 1.000000e+00 : f32
    %800 = vector.broadcast %cst_205 : f32 to vector<2x128xf32>
    %801 = arith.addf %799, %800 : vector<2x128xf32>
    %cst_206 = arith.constant 5.000000e-01 : f32
    %802 = vector.broadcast %cst_206 : f32 to vector<2x128xf32>
    %803 = arith.mulf %802, %801 : vector<2x128xf32>
    %804 = math.tanh %796 : vector<2x128xf32>
    %805 = vector.extract_strided_slice %803 {offsets = [0, 32], sizes = [2, 32], strides = [1, 1]} : vector<2x128xf32> to vector<2x32xf32>
    %806 = arith.mulf %805, %787 : vector<2x32xf32>
    %807 = vector.extract_strided_slice %803 {offsets = [0, 0], sizes = [2, 32], strides = [1, 1]} : vector<2x128xf32> to vector<2x32xf32>
    %808 = vector.extract_strided_slice %804 {offsets = [0, 64], sizes = [2, 32], strides = [1, 1]} : vector<2x128xf32> to vector<2x32xf32>
    %809 = arith.mulf %807, %808 : vector<2x32xf32>
    %810 = arith.addf %806, %809 : vector<2x32xf32>
    %811 = vector.extract_strided_slice %803 {offsets = [0, 96], sizes = [2, 32], strides = [1, 1]} : vector<2x128xf32> to vector<2x32xf32>
    %812 = math.tanh %810 : vector<2x32xf32>
    %813 = arith.mulf %811, %812 : vector<2x32xf32>
    %c15 = arith.constant 15 : index
    %c0_207 = arith.constant 0 : index
    %c0_208 = arith.constant 0 : index
    %814 = vector.load %arg15[%c15, %c0_207, %c0_208] : memref<16x2x32xf32, #tpu.memory_space<vmem>>, vector<1x2x32xf32>
    %815 = vector.shape_cast %814 : vector<1x2x32xf32> to vector<2x32xf32>
    %816 = vector.shape_cast %813 : vector<2x32xf32> to vector<1x2x32xf32>
    tpu.vector_store %arg15[%c15, %c0_207, %c0_208], %816 {strides = array<i32>} : memref<16x2x32xf32, #tpu.memory_space<vmem>>, vector<1x2x32xf32>,
    return
  }
}

</mosaic_0001>

<bundles_post_ra>
// kernel: _lambda_.3
= control target key start
LH: loop header
LB: loop body
LE: loop exit
PB: predicated region body
PF: predicated region fallthrough
CT: control target
= control target key end

     0   :  { %8 = vsyncpa [#allocation3], 0  ;;  %s433_s12 = smov [#allocation2]   ;;  %s478_s0 = inlined_call_operand.vmem [shape: f32[2,512], index: 0, kind: input, shape index: {}]   ;;  %s479_s1 = inlined_call_operand.hbm [shape: f32[512,16], index: 1, kind: input, shape index: {}]   ;;  %s480_s2 = inlined_call_operand.vmem [shape: f32[1,16], index: 2, kind: input, shape index: {}]   ;;  %s481_s3 = inlined_call_operand.vmem [shape: f32[2,16], index: 3, kind: output, shape index: {}]  }
   0x1   :  { %s16_s13 = sshll.u32 %s433_s12, 4  ;;  %s409_s16 = scalar_lea.hbm %s479_s1, 8192  ;;  %s17_s13 = int_to_ptr.vmem [resolvable:$true] %s16_s13 }
   0x2   :  { %p410_p0 = scmp.ne.s32.totalorder %s479_s1, %s409_s16  ;;  %p413_p1 = scmp.lt.u32.totalorder %s409_s16, %s479_s1 }
   0x4   :  { %p415_p2 = pnand %p413_p1, %p410_p0 }
   0x6   :  { %418 = shalt.err (!%p415_p2)
}
   0x7   :  { %s419_s21 = scalar_lea.vmem %s17_s13, 8192  ;;  %p424_p4 = scmp.lt.s32.totalorder %s17_s13, %s17_s13 }
   0x8   :  { %p420_p3 = scmp.ne.s32.totalorder %s17_s13, %s419_s21  ;;  %p425_p5 = scmp.lt.s32.totalorder %s419_s21, %s419_s21 }
   0xa   :  { %p426_p6 = por %p425_p5, %p424_p4 }
   0xc   :  { %p427_p7 = pnand %p426_p6, %p420_p3 }
   0xe   :  { %430 = shalt.err (!%p427_p7)
}
   0xf   :  { %s434_s22 = smov 128   ;;  %s435_s23 = smov 8  }
  0x10   :  { %22 = dma.hbm_to_vmem [thread:$0]  %s479_s1, 8192, %s17_s13, [#allocation3], %s434_s22, %s434_s22, %s435_s23  }
  0x11   :  { %431 = dma.done.wait [#allocation3], 8192  }
  0x12   :  { %432 = vsyncadd [#allocation3], 4294959104  ;;  %v45_v0 = vld [vmem:[#allocation2 + $0x80] sm:$0xff]  ;;  %v46_v1 = vld [vmem:[#allocation2 + $0x88] sm:$0xff]  ;;  %v436_v47 = vmov 1983009808   ;;  %v105_v49 = vlaneseq }
  0x13   :  { %v29_v2 = vld [vmem:[#allocation2] sm:$0xff]  ;;  %v340_v3 = vpack.c.bf16 %v46_v1, %v45_v0  ;;  %v30_v4 = vld [vmem:[#allocation2 + $0x8] sm:$0xff]  ;;  %v47_v11 = vld [vmem:[#allocation2 + $0x90] sm:$0xff]  ;;  %v103_v48 = vunpack.c.l.s4 %v436_v47  ;;  %vm262_vm0 = vcmask 123904  }
  0x14   :  { %v77_v5 = vld [vmem:[#allocation2 + $0x180] sm:$0xff]  ;;  %v78_v6 = vld [vmem:[#allocation2 + $0x188] sm:$0xff]  ;;  %v342_v7 = vpack.c.bf16 %v30_v4, %v29_v2  ;;  %v48_v13 = vld [vmem:[#allocation2 + $0x98] sm:$0xff]  ;;  %v106_v0 = vshrl.u32 %v105_v49, 7 }
  0x15   :  { %v372_v8 = vpack.c.bf16 %v78_v6, %v77_v5  ;;  %v61_v9 = vld [vmem:[#allocation2 + $0x100] sm:$0xff]  ;;  %v62_v10 = vld [vmem:[#allocation2 + $0x108] sm:$0xff]  ;;  %341 = vmatprep.subr.bf16.mxu0 %v340_v3  ;;  %v31_v14 = vld [vmem:[#allocation2 + $0x10] sm:$0xff]  ;;  %v344_v16 = vpack.c.bf16 %v48_v13, %v47_v11  ;;  %v104_v63 = vunpack.c.0.s8 %v103_v48 }
  0x16   :  { %v374_v12 = vpack.c.bf16 %v62_v10, %v61_v9  ;;  %v32_v15 = vld [vmem:[#allocation2 + $0x18] sm:$0xff]  ;;  %343 = vmatpush3.bf16.msra.mxu0 %v342_v7  ;;  %v79_v18 = vld [vmem:[#allocation2 + $0x190] sm:$0xff]  ;;  %v49_v23 = vld [vmem:[#allocation2 + $0xa0] sm:$0xff] }
  0x17   :  { %373 = vmatprep.subr.bf16.mxu1 %v372_v8  ;;  %v346_v17 = vpack.c.bf16 %v32_v15, %v31_v14  ;;  %v80_v19 = vld [vmem:[#allocation2 + $0x198] sm:$0xff]  ;;  %v63_v20 = vld [vmem:[#allocation2 + $0x110] sm:$0xff]  ;;  %v50_v24 = vld [vmem:[#allocation2 + $0xa8] sm:$0xff]  ;;  %345 = vmatprep.subr.bf16.mxu0 %v344_v16  ;;  %v107_v13 = vsub.s32 %v104_v63, %v106_v0 }
  0x18   :  { %375 = vmatpush3.bf16.msra.mxu1 %v374_v12  ;;  %v376_v21 = vpack.c.bf16 %v80_v19, %v79_v18  ;;  %v64_v22 = vld [vmem:[#allocation2 + $0x118] sm:$0xff]  ;;  %v348_v26 = vpack.c.bf16 %v50_v24, %v49_v23  ;;  %v33_v27 = vld [vmem:[#allocation2 + $0x20] sm:$0xff]  ;;  %v34_v28 = vld [vmem:[#allocation2 + $0x28] sm:$0xff] }
  0x19   :  { %v378_v25 = vpack.c.bf16 %v64_v22, %v63_v20  ;;  %v81_v29 = vld [vmem:[#allocation2 + $0x1a0] sm:$0xff]  ;;  %v82_v30 = vld [vmem:[#allocation2 + $0x1a8] sm:$0xff]  ;;  %v350_v33 = vpack.c.bf16 %v34_v28, %v33_v27  ;;  %v51_v35 = vld [vmem:[#allocation2 + $0xb0] sm:$0xff] }
  0x1a   :  { %377 = vmatprep.subr.bf16.mxu1 %v376_v21  ;;  %v65_v31 = vld [vmem:[#allocation2 + $0x120] sm:$0xff]  ;;  %v66_v32 = vld [vmem:[#allocation2 + $0x128] sm:$0xff]  ;;  %347 = vmatpush3.bf16.msra.mxu0 %v346_v17  ;;  %v380_v34 = vpack.c.bf16 %v82_v30, %v81_v29  ;;  %v52_v36 = vld [vmem:[#allocation2 + $0xb8] sm:$0xff] }
  0x1b   :  { %v35_v37 = vld [vmem:[#allocation2 + $0x30] sm:$0xff]  ;;  %349 = vmatprep.subr.bf16.mxu0 %v348_v26  ;;  %v382_v38 = vpack.c.bf16 %v66_v32, %v65_v31  ;;  %v352_v39 = vpack.c.bf16 %v52_v36, %v51_v35  ;;  %v36_v40 = vld [vmem:[#allocation2 + $0x38] sm:$0xff]  ;;  %v53_v46 = vld [vmem:[#allocation2 + $0xc0] sm:$0xff] }
  0x1c   :  { %379 = vmatpush3.bf16.msra.mxu1 %v378_v25  ;;  %v83_v41 = vld [vmem:[#allocation2 + $0x1b0] sm:$0xff]  ;;  %v84_v42 = vld [vmem:[#allocation2 + $0x1b8] sm:$0xff]  ;;  %v54_v50 = vld [vmem:[#allocation2 + $0xc8] sm:$0xff]  ;;  %v354_v51 = vpack.c.bf16 %v36_v40, %v35_v37 }
  0x1d   :  { %381 = vmatprep.subr.bf16.mxu1 %v380_v34  ;;  %v384_v43 = vpack.c.bf16 %v84_v42, %v83_v41  ;;  %v67_v44 = vld [vmem:[#allocation2 + $0x130] sm:$0xff]  ;;  %v68_v45 = vld [vmem:[#allocation2 + $0x138] sm:$0xff]  ;;  %v85_v52 = vld [vmem:[#allocation2 + $0x1c0] sm:$0xff]  ;;  %v356_v55 = vpack.c.bf16 %v54_v50, %v53_v46 }
  0x1e   :  { %351 = vmatpush3.bf16.msra.mxu0 %v350_v33  ;;  %v86_v53 = vld [vmem:[#allocation2 + $0x1c8] sm:$0xff]  ;;  %v386_v54 = vpack.c.bf16 %v68_v45, %v67_v44  ;;  %v37_v56 = vld [vmem:[#allocation2 + $0x40] sm:$0xff]  ;;  %v55_v61 = vld [vmem:[#allocation2 + $0xd0] sm:$0xff] }
  0x1f   :  { %353 = vmatprep.subr.bf16.mxu0 %v352_v39  ;;  %v38_v57 = vld [vmem:[#allocation2 + $0x48] sm:$0xff]  ;;  %v69_v58 = vld [vmem:[#allocation2 + $0x140] sm:$0xff]  ;;  %v388_v59 = vpack.c.bf16 %v86_v53, %v85_v52  ;;  %v56_v62 = vld [vmem:[#allocation2 + $0xd8] sm:$0xff] }
  0x20   :  { %383 = vmatpush3.bf16.msra.mxu1 %v382_v38  ;;  %v70_v60 = vld [vmem:[#allocation2 + $0x148] sm:$0xff]  ;;  %v87_v1 = vld [vmem:[#allocation2 + $0x1d0] sm:$0xff]  ;;  %v88_v2 = vld [vmem:[#allocation2 + $0x1d8] sm:$0xff]  ;;  %v358_v3 = vpack.c.bf16 %v38_v57, %v37_v56  ;;  %v360_v5 = vpack.c.bf16 %v56_v62, %v55_v61 }
  0x21   :  { %385 = vmatprep.subr.bf16.mxu1 %v384_v43  ;;  %v390_v4 = vpack.c.bf16 %v70_v60, %v69_v58  ;;  %v39_v6 = vld [vmem:[#allocation2 + $0x50] sm:$0xff]  ;;  %v40_v7 = vld [vmem:[#allocation2 + $0x58] sm:$0xff]  ;;  %v392_v9 = vpack.c.bf16 %v88_v2, %v87_v1  ;;  %v57_v11 = vld [vmem:[#allocation2 + $0xe0] sm:$0xff] }
  0x22   :  { %355 = vmatpush3.bf16.msra.mxu0 %v354_v51  ;;  %v71_v8 = vld [vmem:[#allocation2 + $0x150] sm:$0xff]  ;;  %v72_v10 = vld [vmem:[#allocation2 + $0x158] sm:$0xff]  ;;  %v58_v12 = vld [vmem:[#allocation2 + $0xe8] sm:$0xff]  ;;  %v362_v16 = vpack.c.bf16 %v40_v7, %v39_v6 }
  0x23   :  { %357 = vmatprep.subr.bf16.mxu0 %v356_v55  ;;  %v89_v14 = vld [vmem:[#allocation2 + $0x1e0] sm:$0xff]  ;;  %v90_v15 = vld [vmem:[#allocation2 + $0x1e8] sm:$0xff]  ;;  %v394_v18 = vpack.c.bf16 %v72_v10, %v71_v8  ;;  %v364_v19 = vpack.c.bf16 %v58_v12, %v57_v11  ;;  %v59_v25 = vld [vmem:[#allocation2 + $0xf0] sm:$0xff] }
  0x24   :  { %387 = vmatpush3.bf16.msra.mxu1 %v386_v54  ;;  %v41_v17 = vld [vmem:[#allocation2 + $0x60] sm:$0xff]  ;;  %v42_v20 = vld [vmem:[#allocation2 + $0x68] sm:$0xff]  ;;  %v396_v23 = vpack.c.bf16 %v90_v15, %v89_v14  ;;  %v60_v26 = vld [vmem:[#allocation2 + $0xf8] sm:$0xff] }
  0x25   :  { %389 = vmatprep.subr.bf16.mxu1 %v388_v59  ;;  %v73_v21 = vld [vmem:[#allocation2 + $0x160] sm:$0xff]  ;;  %v74_v24 = vld [vmem:[#allocation2 + $0x168] sm:$0xff]  ;;  %v91_v29 = vld [vmem:[#allocation2 + $0x1f0] sm:$0xff]  ;;  %v366_v31 = vpack.c.bf16 %v42_v20, %v41_v17  ;;  %v368_v35 = vpack.c.bf16 %v60_v26, %v59_v25 }
  0x26   :  { %359 = vmatpush3.bf16.msra.mxu0 %v358_v3  ;;  %v28_v22 = vld [vmem:[%s478_s0] sm:$0xff]  ;;  %v92_v30 = vld [vmem:[#allocation2 + $0x1f8] sm:$0xff]  ;;  %v398_v34 = vpack.c.bf16 %v74_v24, %v73_v21  ;;  %v43_v36 = vld [vmem:[#allocation2 + $0x70] sm:$0xff] }
  0x27   :  { %361 = vmatprep.subr.bf16.mxu0 %v360_v5  ;;  %v108_v27 = vrot.slane %v28_v22, %v107_v13  ;;  %v101_v28 = vcombine.high %v28_v22, %v28_v22  ;;  %v44_v37 = vld [vmem:[#allocation2 + $0x78] sm:$0xff]  ;;  %v400_v38 = vpack.c.bf16 %v92_v30, %v91_v29  ;;  %v75_v39 = vld [vmem:[#allocation2 + $0x170] sm:$0xff]  ;;  %v269_v45 = vld [vmem:[%s480_s2] ss:$0 sm:$0xff] }
  0x28   :  { %391 = vmatpush3.bf16.msra.mxu1 %v390_v4  ;;  %v76_v40 = vld [vmem:[#allocation2 + $0x178] sm:$0xff]  ;;  %v370_v42 = vpack.c.bf16 %v44_v37, %v43_v36 }
  0x29   :  { %393 = vmatprep.subr.bf16.mxu1 %v392_v9  ;;  %v116_v32 = vcombine.high %v108_v27, %v108_v27  ;;  %v115_v33 = vrot.slane %v101_v28, %v107_v13  ;;  %v402_v43 = vpack.c.bf16 %v76_v40, %v75_v39 }
  0x2a   :  { %363 = vmatpush3.bf16.msra.mxu0 %v362_v16 }
  0x2b   :  { %365 = vmatprep.subr.bf16.mxu0 %v364_v19  ;;  %186 = vmatprep.mubr.f32.mxu0 %v116_v32  ;;  %v117_v41 = vcombine.high %v115_v33, %v115_v33 }
  0x2c   :  { %395 = vmatpush3.bf16.msra.mxu1 %v394_v18 }
  0x2d   :  { %397 = vmatprep.subr.bf16.mxu1 %v396_v23  ;;  %256 = vmatprep.mubr.f32.mxu1 %v117_v41 }
  0x2e   :  { %367 = vmatpush3.bf16.msra.mxu0 %v366_v31 }
  0x2f   :  { %369 = vmatprep.subr.bf16.mxu0 %v368_v35 }
  0x30   :  { %399 = vmatpush3.bf16.msra.mxu1 %v398_v34 }
  0x31   :  { %401 = vmatprep.subr.bf16.mxu1 %v400_v38 }
  0x32   :  { %371 = vmatpush3.bf16.msra.mxu0 %v370_v42 }
  0x34   :  { %403 = vmatpush3.bf16.msra.mxu1 %v402_v43 }
  0x35   :  { %187 = vmatmul.mubr.f32.vlgmr.msra.gmra.mrb[0].mxu0 %v108_v27 }
  0x37   :  { %257 = vmatmul.mubr.f32.vlgmr.msra.gmra.mrb[0].mxu1 %v115_v33 }
 0x108   :  { %v302_v44 = vpop.f32.mrb[0].mxu0 }
 0x109   :  { %v303_v46 = vpop.f32.mrb[1].mxu0 }
 0x10a   :  { %v337_v47 = vpop.f32.mrb[0].mxu1  ;;  %v304_v48 = vadd.f32 %v303_v46, %v302_v44 }
 0x10b   :  { %v338_v49 = vpop.f32.mrb[1].mxu1 }
 0x10c   :  { %v339_v50 = vadd.f32 %v338_v49, %v337_v47  ;;  %v189_v51 = vadd.f32 %v304_v48, %v269_v45 }
 0x10e   :  { %v259_v52 = vadd.f32 %v339_v50, %v189_v51 }
 0x110   :  { %263 = vst.msk [vmem:[%s481_s3] sm:$0x3] %vm262_vm0, %v259_v52 }
 0x111   :  { %268 = vsyncpa [#allocation3], 1 }

// kernel: _lambda_.2
= control target key start
LH: loop header
LB: loop body
LE: loop exit
PB: predicated region body
PF: predicated region fallthrough
CT: control target
= control target key end

     0   :  { %20 = vsyncpa [#allocation3], 0  ;;  %s6767_s0 = inlined_call_operand.hbm [shape: f32[2,8], index: 0, kind: input, shape index: {}]   ;;  %s6768_s1 = inlined_call_operand.hbm [shape: f32[8,128], index: 1, kind: input, shape index: {}]   ;;  %s6769_s2 = inlined_call_operand.hbm [shape: f32[1,128], index: 2, kind: input, shape index: {}]   ;;  %s6770_s3 = inlined_call_operand.hbm [shape: f32[96,32], index: 3, kind: input, shape index: {}]   ;;  %s6771_s4 = inlined_call_operand.hbm [shape: f32[1,32], index: 4, kind: input, shape index: {}]   ;;  %s6772_s5 = inlined_call_operand.vmem [shape: f32[1,1,16], index: 5, kind: input, shape index: {}]   ;;  %s6773_s6 = inlined_call_operand.vmem [shape: f32[1,1,16], index: 6, kind: input, shape index: {}]   ;;  %s6774_s7 = inlined_call_operand.hbm [shape: f32[48,8], index: 7, kind: input, shape index: {}]   ;;  %s6775_s8 = inlined_call_operand.hbm [shape: f32[1,8], index: 8, kind: input, shape index: {}]   ;;  %s6776_s9 = inlined_call_operand.hbm [shape: f32[4,128], index: 9, kind: input, shape index: {}]   ;;  %s6777_s10 = inlined_call_operand.hbm [shape: f32[32,128], index: 10, kind: input, shape index: {}]   ;;  %s6778_s11 = inlined_call_operand.hbm [shape: f32[1,128], index: 11, kind: input, shape index: {}]   ;;  %s6779_s12 = inlined_call_operand.vmem [shape: f32[32,128], index: 12, kind: input, shape index: {}]   ;;  %s6780_s13 = inlined_call_operand.vmem [shape: f32[32,128], index: 13, kind: input, shape index: {}]   ;;  %s6781_s14 = inlined_call_operand.vmem [shape: f32[1,128], index: 14, kind: input, shape index: {}]   ;;  %s6782_s15 = inlined_call_operand.vmem [shape: f32[16,2,32], index: 15, kind: output, shape index: {}]  }
   0x1   :  { %21 = vsyncpa [#allocation5], 0 }
   0x2   :  { %22 = vsyncpa [#allocation8], 0 }
   0x3   :  { %23 = vsyncpa [#allocation11], 0 }
   0x4   :  { %24 = vsyncpa [#allocation14], 0 }
   0x5   :  { %25 = vsyncpa [#allocation17], 0  ;;  %s5795_s18 = smov [#allocation4]   ;;  %s5796_s20 = smov [#allocation7]  }
   0x6   :  { %s42_s19 = sshll.u32 %s5795_s18, 4  ;;  %s61_s21 = sshll.u32 %s5796_s20, 4  ;;  %s43_s19 = int_to_ptr.vmem [resolvable:$true] %s42_s19  ;;  %s5897_s21 = int_to_ptr.vmem [resolvable:$true] %s61_s21 }
   0x7   :  { %s5563_s24 = scalar_lea.hbm %s6768_s1, 128 }
   0x8   :  { %p5564_p0 = scmp.ne.s32.totalorder %s6768_s1, %s5563_s24  ;;  %p5567_p1 = scmp.lt.u32.totalorder %s5563_s24, %s6768_s1 }
   0xa   :  { %p5569_p2 = pnand %p5567_p1, %p5564_p0 }
   0xc   :  { %5572 = shalt.err (!%p5569_p2)
}
   0xd   :  { %s5573_s29 = scalar_lea.vmem %s43_s19, 128  ;;  %p5578_p4 = scmp.lt.s32.totalorder %s43_s19, %s43_s19 }
   0xe   :  { %p5574_p3 = scmp.ne.s32.totalorder %s43_s19, %s5573_s29  ;;  %p5579_p5 = scmp.lt.s32.totalorder %s5573_s29, %s5573_s29 }
  0x10   :  { %p5580_p6 = por %p5579_p5, %p5578_p4 }
  0x12   :  { %p5581_p7 = pnand %p5580_p6, %p5574_p3 }
  0x14   :  { %5584 = shalt.err (!%p5581_p7)
}
  0x15   :  { %45 = dma.hbm_to_vmem [thread:$0]  %s6768_s1, 128, %s43_s19, [#allocation5]  }
  0x16   :  { %s5585_s20 = scalar_lea.hbm %s6770_s3, 1536 }
  0x17   :  { %p5586_p8 = scmp.ne.s32.totalorder %s6770_s3, %s5585_s20  ;;  %p5589_p9 = scmp.lt.u32.totalorder %s5585_s20, %s6770_s3 }
  0x19   :  { %p5591_p10 = pnand %p5589_p9, %p5586_p8 }
  0x1b   :  { %5594 = shalt.err (!%p5591_p10)
}
  0x1c   :  { %s5595_s26 = scalar_lea.vmem %s5897_s21, 1536  ;;  %p5600_p12 = scmp.lt.s32.totalorder %s5897_s21, %s5897_s21 }
  0x1d   :  { %p5596_p11 = scmp.ne.s32.totalorder %s5897_s21, %s5595_s26  ;;  %p5601_p13 = scmp.lt.s32.totalorder %s5595_s26, %s5595_s26 }
  0x1f   :  { %p5602_p0 = por %p5601_p13, %p5600_p12 }
  0x21   :  { %p5603_p1 = pnand %p5602_p0, %p5596_p11 }
  0x23   :  { %5606 = shalt.err (!%p5603_p1)
}
  0x24   :  { %s5797_s1 = smov 128   ;;  %s5798_s19 = smov 8  }
  0x25   :  { %67 = dma.hbm_to_vmem [thread:$0]  %s6770_s3, 1536, %s5897_s21, [#allocation8], %s5797_s1, %s5797_s1, %s5798_s19  }
  0x26   :  { %s5799_s29 = smov [#allocation10]   ;;  %s5800_s16 = smov [#allocation13]  }
  0x27   :  { %s87_s30 = sshll.u32 %s5799_s29, 4  ;;  %s110_s17 = sshll.u32 %s5800_s16, 4  ;;  %s88_s30 = int_to_ptr.vmem [resolvable:$true] %s87_s30  ;;  %s111_s17 = int_to_ptr.vmem [resolvable:$true] %s110_s17 }
  0x28   :  { %s5607_s22 = scalar_lea.hbm %s6774_s7, 768 }
  0x29   :  { %p5608_p2 = scmp.ne.s32.totalorder %s6774_s7, %s5607_s22  ;;  %p5611_p3 = scmp.lt.u32.totalorder %s5607_s22, %s6774_s7 }
  0x2b   :  { %p5613_p4 = pnand %p5611_p3, %p5608_p2 }
  0x2d   :  { %5616 = shalt.err (!%p5613_p4)
}
  0x2e   :  { %s5617_s3 = scalar_lea.vmem %s88_s30, 768  ;;  %p5622_p6 = scmp.lt.s32.totalorder %s88_s30, %s88_s30 }
  0x2f   :  { %p5618_p5 = scmp.ne.s32.totalorder %s88_s30, %s5617_s3  ;;  %p5623_p7 = scmp.lt.s32.totalorder %s5617_s3, %s5617_s3 }
  0x31   :  { %p5624_p8 = por %p5623_p7, %p5622_p6 }
  0x33   :  { %p5625_p9 = pnand %p5624_p8, %p5618_p5 }
  0x35   :  { %5628 = shalt.err (!%p5625_p9)
}
  0x36   :  { %93 = dma.hbm_to_vmem [thread:$0]  %s6774_s7, 768, %s88_s30, [#allocation11], %s5797_s1, %s5797_s1, %s5798_s19  }
  0x37   :  { %s5629_s16 = scalar_lea.hbm %s6776_s9, 64 }
  0x38   :  { %p5630_p10 = scmp.ne.s32.totalorder %s6776_s9, %s5629_s16  ;;  %p5633_p11 = scmp.lt.u32.totalorder %s5629_s16, %s6776_s9 }
  0x3a   :  { %p5635_p12 = pnand %p5633_p11, %p5630_p10 }
  0x3c   :  { %5638 = shalt.err (!%p5635_p12)
}
  0x3d   :  { %s5639_s24 = scalar_lea.vmem %s111_s17, 64  ;;  %p5644_p0 = scmp.lt.s32.totalorder %s111_s17, %s111_s17 }
  0x3e   :  { %p5640_p13 = scmp.ne.s32.totalorder %s111_s17, %s5639_s24  ;;  %p5645_p1 = scmp.lt.s32.totalorder %s5639_s24, %s5639_s24 }
  0x40   :  { %p5646_p2 = por %p5645_p1, %p5644_p0 }
  0x42   :  { %p5647_p3 = pnand %p5646_p2, %p5640_p13 }
  0x44   :  { %5650 = shalt.err (!%p5647_p3)
}
  0x45   :  { %113 = dma.hbm_to_vmem [thread:$0]  %s6776_s9, 64, %s111_s17, [#allocation14]  }
  0x46   :  { %s5801_s25 = smov [#allocation2]   ;;  %s5802_s3 = smov [#allocation6]  }
  0x47   :  { %s32_s26 = sshll.u32 %s5801_s25, 4  ;;  %s52_s21 = sshll.u32 %s5802_s3, 4  ;;  %s33_s26 = int_to_ptr.vmem [resolvable:$true] %s32_s26  ;;  %s53_s21 = int_to_ptr.vmem [resolvable:$true] %s52_s21 }
  0x48   :  { %s5651_s29 = scalar_lea.hbm %s6767_s0, 32 }
  0x49   :  { %p5652_p4 = scmp.ne.s32.totalorder %s6767_s0, %s5651_s29  ;;  %p5655_p5 = scmp.lt.u32.totalorder %s5651_s29, %s6767_s0 }
  0x4b   :  { %p5657_p6 = pnand %p5655_p5, %p5652_p4 }
  0x4d   :  { %5660 = shalt.err (!%p5657_p6)
}
  0x4e   :  { %s5661_s9 = scalar_lea.vmem %s33_s26, 32  ;;  %p5666_p8 = scmp.lt.s32.totalorder %s33_s26, %s33_s26 }
  0x4f   :  { %p5662_p7 = scmp.ne.s32.totalorder %s33_s26, %s5661_s9  ;;  %p5667_p9 = scmp.lt.s32.totalorder %s5661_s9, %s5661_s9 }
  0x51   :  { %p5668_p10 = por %p5667_p9, %p5666_p8 }
  0x53   :  { %p5669_p11 = pnand %p5668_p10, %p5662_p7 }
  0x55   :  { %5672 = shalt.err (!%p5669_p11)
}
  0x56   :  { %35 = dma.hbm_to_vmem [thread:$0]  %s6767_s0, 32, %s33_s26, [#allocation3]  }
  0x57   :  { %s5673_s30 = scalar_lea.hbm %s6769_s2, 16 }
  0x58   :  { %p5674_p12 = scmp.ne.s32.totalorder %s6769_s2, %s5673_s30  ;;  %p5677_p13 = scmp.lt.u32.totalorder %s5673_s30, %s6769_s2 }
  0x5a   :  { %p5679_p0 = pnand %p5677_p13, %p5674_p12 }
  0x5c   :  { %5682 = shalt.err (!%p5679_p0)
}
  0x5d   :  { %s5683_s29 = scalar_lea.vmem %s53_s21, 16  ;;  %s5687_s16 = scalar_lea.vmem %s53_s21, 32 }
  0x5e   :  { %p5684_p1 = scmp.ne.s32.totalorder %s53_s21, %s5683_s29  ;;  %p5688_p2 = scmp.lt.s32.totalorder %s53_s21, %s53_s21 }
  0x5f   :  { %p5689_p3 = scmp.lt.s32.totalorder %s5687_s16, %s5683_s29 }
  0x61   :  { %p5690_p4 = por %p5689_p3, %p5688_p2 }
  0x63   :  { %p5691_p5 = pnand %p5690_p4, %p5684_p1 }
  0x65   :  { %5694 = shalt.err (!%p5691_p5)
}
  0x66   :  { %55 = dma.hbm_to_vmem [thread:$0]  %s6769_s2, 16, %s53_s21, [#allocation5]  }
  0x67   :  { %s5803_s18 = smov [#allocation9]   ;;  %s5804_s22 = smov [#allocation12]  }
  0x68   :  { %s74_s20 = sshll.u32 %s5803_s18, 4  ;;  %s100_s9 = sshll.u32 %s5804_s22, 4  ;;  %s75_s20 = int_to_ptr.vmem [resolvable:$true] %s74_s20  ;;  %s101_s9 = int_to_ptr.vmem [resolvable:$true] %s100_s9 }
  0x69   :  { %s5695_s24 = scalar_lea.hbm %s6771_s4, 16 }
  0x6a   :  { %p5696_p6 = scmp.ne.s32.totalorder %s6771_s4, %s5695_s24  ;;  %p5699_p7 = scmp.lt.u32.totalorder %s5695_s24, %s6771_s4 }
  0x6c   :  { %p5701_p8 = pnand %p5699_p7, %p5696_p6 }
  0x6e   :  { %5704 = shalt.err (!%p5701_p8)
}
  0x6f   :  { %s5705_s2 = scalar_lea.vmem %s75_s20, 16  ;;  %s5709_s21 = scalar_lea.vmem %s75_s20, 32 }
  0x70   :  { %p5706_p9 = scmp.ne.s32.totalorder %s75_s20, %s5705_s2  ;;  %p5710_p10 = scmp.lt.s32.totalorder %s75_s20, %s75_s20 }
  0x71   :  { %p5711_p11 = scmp.lt.s32.totalorder %s5709_s21, %s5705_s2 }
  0x73   :  { %p5712_p12 = por %p5711_p11, %p5710_p10 }
  0x75   :  { %p5713_p13 = pnand %p5712_p12, %p5706_p9 }
  0x77   :  { %5716 = shalt.err (!%p5713_p13)
}
  0x78   :  { %77 = dma.hbm_to_vmem [thread:$0]  %s6771_s4, 16, %s75_s20, [#allocation8]  }
  0x79   :  { %s5717_s0 = scalar_lea.hbm %s6775_s8, 16 }
  0x7a   :  { %p5718_p0 = scmp.ne.s32.totalorder %s6775_s8, %s5717_s0  ;;  %p5721_p1 = scmp.lt.u32.totalorder %s5717_s0, %s6775_s8 }
  0x7c   :  { %p5723_p2 = pnand %p5721_p1, %p5718_p0 }
  0x7e   :  { %5726 = shalt.err (!%p5723_p2)
}
  0x7f   :  { %s5727_s23 = scalar_lea.vmem %s101_s9, 16  ;;  %s5731_s24 = scalar_lea.vmem %s101_s9, 32 }
  0x80   :  { %p5728_p3 = scmp.ne.s32.totalorder %s101_s9, %s5727_s23  ;;  %p5732_p4 = scmp.lt.s32.totalorder %s101_s9, %s101_s9 }
  0x81   :  { %p5733_p5 = scmp.lt.s32.totalorder %s5731_s24, %s5727_s23 }
  0x83   :  { %p5734_p6 = por %p5733_p5, %p5732_p4 }
  0x85   :  { %p5735_p7 = pnand %p5734_p6, %p5728_p3 }
  0x87   :  { %5738 = shalt.err (!%p5735_p7)
}
  0x88   :  { %103 = dma.hbm_to_vmem [thread:$0]  %s6775_s8, 16, %s101_s9, [#allocation11]  }
  0x89   :  { %s5805_s7 = smov [#allocation15]   ;;  %s5806_s25 = smov [#allocation16]  }
  0x8a   :  { %s119_s30 = sshll.u32 %s5805_s7, 4  ;;  %s132_s3 = sshll.u32 %s5806_s25, 4  ;;  %s120_s30 = int_to_ptr.vmem [resolvable:$true] %s119_s30  ;;  %s133_s3 = int_to_ptr.vmem [resolvable:$true] %s132_s3 }
  0x8b   :  { %s5739_s27 = scalar_lea.hbm %s6777_s10, 512 }
  0x8c   :  { %p5740_p8 = scmp.ne.s32.totalorder %s6777_s10, %s5739_s27  ;;  %p5743_p9 = scmp.lt.u32.totalorder %s5739_s27, %s6777_s10 }
  0x8e   :  { %p5745_p10 = pnand %p5743_p9, %p5740_p8 }
  0x90   :  { %5748 = shalt.err (!%p5745_p10)
}
  0x91   :  { %s5749_s8 = scalar_lea.vmem %s120_s30, 512  ;;  %p5754_p12 = scmp.lt.s32.totalorder %s120_s30, %s120_s30 }
  0x92   :  { %p5750_p11 = scmp.ne.s32.totalorder %s120_s30, %s5749_s8  ;;  %p5755_p13 = scmp.lt.s32.totalorder %s5749_s8, %s5749_s8 }
  0x94   :  { %p5756_p0 = por %p5755_p13, %p5754_p12 }
  0x96   :  { %p5757_p1 = pnand %p5756_p0, %p5750_p11 }
  0x98   :  { %5760 = shalt.err (!%p5757_p1)
}
  0x99   :  { %125 = dma.hbm_to_vmem [thread:$0]  %s6777_s10, 512, %s120_s30, [#allocation14], %s5797_s1, %s5797_s1, %s5798_s19  }
  0x9a   :  { %s5761_s17 = scalar_lea.hbm %s6778_s11, 16 }
  0x9b   :  { %p5762_p2 = scmp.ne.s32.totalorder %s6778_s11, %s5761_s17  ;;  %p5765_p3 = scmp.lt.u32.totalorder %s5761_s17, %s6778_s11 }
  0x9d   :  { %p5767_p4 = pnand %p5765_p3, %p5762_p2 }
  0x9f   :  { %5770 = shalt.err (!%p5767_p4)
}
  0xa0   :  { %s5771_s7 = scalar_lea.vmem %s133_s3, 16  ;;  %s5775_s25 = scalar_lea.vmem %s133_s3, 32 }
  0xa1   :  { %p5772_p5 = scmp.ne.s32.totalorder %s133_s3, %s5771_s7  ;;  %p5776_p6 = scmp.lt.s32.totalorder %s133_s3, %s133_s3 }
  0xa2   :  { %p5777_p7 = scmp.lt.s32.totalorder %s5775_s25, %s5771_s7 }
  0xa4   :  { %p5778_p8 = por %p5777_p7, %p5776_p6 }
  0xa6   :  { %p5779_p9 = pnand %p5778_p8, %p5772_p5 }
  0xa8   :  { %5782 = shalt.err (!%p5779_p9)
}
  0xa9   :  { %135 = dma.hbm_to_vmem [thread:$0]  %s6778_s11, 16, %s133_s3, [#allocation17]  }
  0xaa   :  { %5783 = dma.done.wait [#allocation3], 32  }
  0xab   :  { %5784 = vsyncadd [#allocation3], 4294967264 }
  0xac   :  { %5785 = dma.done.wait [#allocation5], 144  }
  0xad   :  { %5786 = vsyncadd [#allocation5], 4294967152 }
  0xae   :  { %5787 = dma.done.wait [#allocation8], 1552  }
  0xaf   :  { %5788 = vsyncadd [#allocation8], 4294965744 }
  0xb0   :  { %5789 = dma.done.wait [#allocation11], 784  }
  0xb1   :  { %5790 = vsyncadd [#allocation11], 4294966512 }
  0xb2   :  { %5791 = dma.done.wait [#allocation14], 576  }
  0xb3   :  { %5792 = vsyncadd [#allocation14], 4294966720 }
  0xb4   :  { %5793 = dma.done.wait [#allocation17], 16  }
  0xb5   :  { %5794 = vsyncadd [#allocation17], 4294967280  ;;  %v5807_v0 = vmov 0.0   ;;  %vm5808_vm0 = vmmov 0   ;;  %vm181_vm1 = vcmask 64512   ;;  %v173_v1 = vld [vmem:[#allocation4] sm:$0xff]  ;;  %v260_v5 = vlaneseq }
  0xb6   :  { %4692 = vmatprep.subr.mxu0 %v5807_v0  ;;  %4694 = vmatprep.mubr.msk.f32.mxu0 %vm5808_vm0, %v5807_v0  ;;  %v172_v2 = vld [vmem:[#allocation2] sm:$0x3]  ;;  %v5809_v3 = vmov 1966171168   ;;  %v4431_v8 = vld [vmem:[#allocation6] ss:$0 sm:$0xff] }
  0xb7   :  { %4721 = vmatprep.mubr.msk.f32.mxu1 %vm5808_vm0, %v5807_v0  ;;  %4693 = vmatpush3.msra.mxu0 %v173_v1  ;;  %v258_v4 = vunpack.c.l.s4 %v5809_v3  ;;  %v6038_v7 = vshrl.u32 %v260_v5, 7  ;;  %s5810_s11 = smov 64   ;;  %s5811_s19 = smov 96   ;;  %v316_v20 = vld [vmem:[#allocation7] sm:$0xff]  ;;  %v317_v21 = vld [vmem:[#allocation7 + $0x8] sm:$0xff]  ;;  %v318_v22 = vld [vmem:[#allocation7 + $0x10] sm:$0xff] }
  0xb8   :  { %4695 = vmatmul.mubr.msk.f32.vlgmr.msra.gmra.mrb[0].mxu0 %vm181_vm1, %v172_v2  ;;  %v5812_v23 = vmov 0.0|0.0   ;;  %v5114_v24 = vpack.c.bf16 %v317_v21, %v316_v20  ;;  %v319_v25 = vld [vmem:[#allocation7 + $0x18] sm:$0xff]  ;;  %v320_v28 = vld [vmem:[#allocation7 + $0x20] sm:$0xff]  ;;  %v321_v29 = vld [vmem:[#allocation7 + $0x28] sm:$0xff]  ;;  %s5813_s30 = smov 32   ;;  %vm307_vm2 = vcmask 1040384  }
  0xb9   :  { %v259_v6 = vunpack.c.0.s8 %v258_v4  ;;  %v6042_v15 = vsub.s32 0, %v6038_v7  ;;  %5113 = vmatprep.subr.bf16.mxu1 %v5812_v23  ;;  %v5117_v27 = vpack.c.bf16 %v319_v25, %v318_v22  ;;  %v5120_v30 = vpack.c.bf16 %v321_v29, %v320_v28  ;;  %v322_v31 = vld [vmem:[#allocation7 + $0x30] sm:$0xff]  ;;  %v323_v32 = vld [vmem:[#allocation7 + $0x38] sm:$0xff]  ;;  %v324_v34 = vld [vmem:[#allocation7 + $0x40] sm:$0xff]  ;;  %s5814_s3 = smov 112   ;;  %s5815_s29 = smov 16  }
  0xba   :  { %5115 = vmatpush3.bf16.msra.mxu1 %v5114_v24  ;;  %v5123_v33 = vpack.c.bf16 %v323_v32, %v322_v31  ;;  %v325_v35 = vld [vmem:[#allocation7 + $0x48] sm:$0xff]  ;;  %v326_v37 = vld [vmem:[#allocation7 + $0x50] sm:$0xff]  ;;  %v327_v38 = vld [vmem:[#allocation7 + $0x58] sm:$0xff]  ;;  %vm310_vm3 = vcmask 1041408   ;;  %vm313_vm4 = vcmask 1042432   ;;  %vm359_vm5 = vcmask 261120  }
  0xbb   :  { %v262_v11 = vsub.s32 %v259_v6, %v6038_v7  ;;  %5116 = vmatprep.subr.bf16.mxu1 %v5812_v23  ;;  %v5126_v36 = vpack.c.bf16 %v325_v35, %v324_v34  ;;  %v5129_v39 = vpack.c.bf16 %v327_v38, %v326_v37  ;;  %vm362_vm6 = vcmask 523264   ;;  %v4433_v6 = vld [vmem:[#allocation9] ss:$0 sm:$0xff]  ;;  %v578_v25 = vld [vmem:[#allocation10] sm:$0xff] }
  0xbc   :  { %vm374_vm7 = vcmask 785408   ;;  %v498_v20 = vsub.s32 3, %v6038_v7  ;;  %v581_v28 = vld [vmem:[#allocation10 + $0x18] sm:$0xff]  ;;  %vm518_vm8 = vcmask 1043456   ;;  %vm521_vm9 = vcmask 1044480  }
  0xbd   :  { %vm524_vm10 = vcmask 1045504   ;;  %vm527_vm11 = vcmask 1046528   ;;  %vm530_vm12 = vcmask 130048   ;;  %vm623_vm13 = vcmask 392192  }
  0xbe   :  { %5118 = vmatpush3.bf16.msra.mxu1 %v5117_v27  ;;  %vm715_vm14 = vcmask 1043459   ;;  %vm727_vm15 = vcmask 1047559   ;;  %vm710_vm1 = vcmask 1041409  }
  0xbf   :  { %5119 = vmatprep.subr.bf16.mxu1 %v5812_v23 }
  0xc2   :  { %5121 = vmatpush3.bf16.msra.mxu1 %v5120_v30 }
  0xc3   :  { %5122 = vmatprep.subr.bf16.mxu1 %v5812_v23 }
  0xc6   :  { %5124 = vmatpush3.bf16.msra.mxu1 %v5123_v33 }
  0xc7   :  { %5125 = vmatprep.subr.bf16.mxu1 %v5812_v23 }
  0xca   :  { %5127 = vmatpush3.bf16.msra.mxu1 %v5126_v36 }
  0xcb   :  { %5128 = vmatprep.subr.bf16.mxu1 %v5812_v23 }
  0xce   :  { %5130 = vmatpush3.bf16.msra.mxu1 %v5129_v39 }
  0xcf   :  { %5149 = vmatprep.subr.bf16.mxu1 %v5812_v23 }
 0x18b   :  { %v251_v9 = vpop.f32.mrb[0].mxu0 }
 0x18c   :  { %v252_v10 = vadd.f32 %v4431_v8, %v251_v9  ;;  %v4696_v12 = vpop.f32.mrb[1].mxu0 }
 0x18e   :  { %v255_v13 = vmax.f32 %v252_v10, 0.0 }
 0x190   :  { %v263_v14 = vrot.slane %v255_v13, %v262_v11  ;;  %v466_v13 = vsub.s32 1, %v6038_v7 }
 0x192   :  { %v264_v16 = vcombine.high %v263_v14, %v263_v14  ;;  %v271_v17 = vrot.slane %v263_v14, %v262_v11 }
 0x194   :  { %v284_v18 = vrot.slane %v271_v17, %v6042_v15  ;;  %v278_v19 = vrot.slane %v264_v16, %v262_v11 }
 0x196   :  { %295 = vrot.lane.b32.xlu1 %v284_v18, %s5810_s11  ;;  %289 = vrot.lane.b32.xlu0 %v284_v18, %s5811_s19  ;;  %v288_v26 = vrot.slane %v278_v19, %v6042_v15 }
 0x19a   :  { %297 = vrot.lane.b32.xlu1 %v288_v26, %s5810_s11  ;;  %291 = vrot.lane.b32.xlu0 %v288_v26, %s5811_s19 }
 0x19e   :  { %303 = vrot.lane.b32.xlu1 %v288_v26, %s5813_s30  ;;  %301 = vrot.lane.b32.xlu0 %v284_v18, %s5813_s30  ;;  %v579_v26 = vld [vmem:[#allocation10 + $0x8] sm:$0xff] }
 0x19f   :  { %v5131_v27 = vpack.c.bf16 %v579_v26, %v578_v25 }
 0x1a1   :  { %5132 = vmatprep.subr.bf16.mxu0 %v5131_v27 }
 0x1a2   :  { %5134 = vmatpush3.bf16.msra.mxu0 %v5131_v27 }
 0x208   :  { %v296_v40 = vpop.permute.xlu1 %295  ;;  %v290_v41 = vpop.permute.xlu0 %289 }
 0x209   :  { %v308_v44 = vsel %vm307_vm2, %v271_v17, %v290_v41  ;;  %v482_v17 = vsub.s32 2, %v6038_v7 }
 0x20a   :  { %v311_v49 = vsel %vm310_vm3, %v308_v44, %v296_v40 }
 0x20c   :  { %v298_v42 = vpop.permute.xlu1 %297  ;;  %v292_v43 = vpop.permute.xlu0 %291 }
 0x20d   :  { %v309_v45 = vsel %vm307_vm2, %v278_v19, %v292_v43 }
 0x20e   :  { %v312_v48 = vsel %vm310_vm3, %v309_v45, %v298_v42 }
 0x210   :  { %v304_v46 = vpop.permute.xlu1 %303  ;;  %v302_v47 = vpop.permute.xlu0 %301 }
 0x211   :  { %v315_v50 = vsel %vm313_vm4, %v312_v48, %v304_v46  ;;  %v314_v51 = vsel %vm313_vm4, %v311_v49, %v302_v47 }
 0x212   :  { %347 = vrot.lane.b32.xlu1 %v315_v50, %s5813_s30  ;;  %345 = vrot.lane.b32.xlu0 %v314_v51, %s5813_s30  ;;  %v340_v52 = vrot.slane %v315_v50, 1  ;;  %v339_v53 = vrot.slane %v314_v51, 1  ;;  %v334_v56 = vrot.slane %v315_v50, 7  ;;  %v333_v57 = vrot.slane %v314_v51, 7 }
 0x214   :  { %v344_v54 = vsel %vm313_vm4, %v340_v52, 0.0  ;;  %v343_v55 = vsel %vm313_vm4, %v339_v53, 0.0  ;;  %v338_v60 = vsel %vm307_vm2, 0.0, %v334_v56  ;;  %v337_v61 = vsel %vm307_vm2, 0.0, %v333_v57 }
 0x216   :  { %355 = vrot.lane.b32.xlu1 %v344_v54, %s5810_s11  ;;  %353 = vrot.lane.b32.xlu0 %v343_v55, %s5810_s11 }
 0x284   :  { %v348_v58 = vpop.permute.xlu1 %347  ;;  %v346_v59 = vpop.permute.xlu0 %345 }
 0x285   :  { %v361_v62 = vsel %vm359_vm5, %v338_v60, %v348_v58  ;;  %v360_v63 = vsel %vm359_vm5, %v337_v61, %v346_v59 }
 0x288   :  { %v356_v1 = vpop.permute.xlu1 %355  ;;  %v354_v2 = vpop.permute.xlu0 %353 }
 0x289   :  { %v364_v3 = vsel %vm362_vm6, %v361_v62, %v356_v1  ;;  %v363_v4 = vsel %vm362_vm6, %v360_v63, %v354_v2  ;;  %vm3006_vm6 = vcmask 259076  }
 0x28a   :  { %v373_v5 = vcombine.low %v363_v4, %v364_v3 }
 0x28c   :  { %4722 = vmatmul.mubr.msk.f32.vlgmr.msra.gmra.mrb[0].mxu1 %vm374_vm7, %v373_v5 }
 0x28d   :  { %4766 = vmatprep.mubr.msk.f32.mxu1 %vm5808_vm0, %v5807_v0 }
 0x35f   :  { %v443_v8 = vpop.f32.mrb[0].mxu1 }
 0x360   :  { %v444_v9 = vadd.f32 %v4433_v6, %v443_v8  ;;  %v4723_v10 = vpop.f32.mrb[1].mxu1 }
 0x362   :  { %v453_v11 = vrot.slane %v444_v9, %v6042_v15  ;;  %v448_v12 = vcombine.high %v444_v9, %v444_v9  ;;  %v467_v16 = vrot.slane %v444_v9, %v466_v13  ;;  %v483_v19 = vrot.slane %v444_v9, %v482_v17 }
 0x363   :  { %v499_v22 = vrot.slane %v444_v9, %v498_v20 }
 0x364   :  { %458 = vrot.lane.b32.xlu0 %v453_v11, %s5814_s3  ;;  %v457_v14 = vrot.slane %v448_v12, %v6042_v15  ;;  %v471_v18 = vrot.slane %v448_v12, %v466_v13  ;;  %v487_v21 = vrot.slane %v448_v12, %v482_v17  ;;  %v503_v24 = vrot.slane %v448_v12, %v498_v20  ;;  %v580_v15 = vld [vmem:[#allocation10 + $0x10] sm:$0xff] }
 0x365   :  { %v5135_v29 = vpack.c.bf16 %v581_v28, %v580_v15 }
 0x366   :  { %460 = vrot.lane.b32.xlu1 %v457_v14, %s5814_s3  ;;  %v582_v14 = vld [vmem:[#allocation10 + $0x20] sm:$0xff] }
 0x367   :  { %5136 = vmatprep.subr.bf16.mxu0 %v5135_v29 }
 0x368   :  { %474 = vrot.lane.b32.xlu0 %v467_v16, %s5814_s3  ;;  %5138 = vmatpush3.bf16.msra.mxu0 %v5135_v29 }
 0x36a   :  { %476 = vrot.lane.b32.xlu1 %v471_v18, %s5814_s3 }
 0x36c   :  { %490 = vrot.lane.b32.xlu0 %v483_v19, %s5814_s3 }
 0x36e   :  { %492 = vrot.lane.b32.xlu1 %v487_v21, %s5814_s3 }
 0x370   :  { %506 = vrot.lane.b32.xlu0 %v499_v22, %s5814_s3 }
 0x372   :  { %508 = vrot.lane.b32.xlu1 %v503_v24, %s5814_s3 }
 0x3d6   :  { %v459_v30 = vpop.permute.xlu0 %458 }
 0x3d7   :  { %v512_v7 = vsel %vm307_vm2, %v444_v9, %v459_v30 }
 0x3d8   :  { %v461_v31 = vpop.permute.xlu1 %460  ;;  %v514_v33 = vsel %vm310_vm3, %v512_v7, %v467_v16  ;;  %v583_v16 = vld [vmem:[#allocation10 + $0x28] sm:$0xff] }
 0x3d9   :  { %v513_v32 = vsel %vm307_vm2, %v448_v12, %v461_v31  ;;  %v5139_v17 = vpack.c.bf16 %v583_v16, %v582_v14 }
 0x3da   :  { %v475_v34 = vpop.permute.xlu0 %474  ;;  %v515_v36 = vsel %vm310_vm3, %v513_v32, %v471_v18 }
 0x3db   :  { %v516_v35 = vsel %vm313_vm4, %v514_v33, %v475_v34  ;;  %5140 = vmatprep.subr.bf16.mxu0 %v5139_v17 }
 0x3dc   :  { %v477_v37 = vpop.permute.xlu1 %476  ;;  %v519_v39 = vsel %vm518_vm8, %v516_v35, %v483_v19  ;;  %v4435_v19 = vld [vmem:[%s6772_s5] ss:$0 sm:$0xff]  ;;  %5142 = vmatpush3.bf16.msra.mxu0 %v5139_v17  ;;  %s5816_s5 = smov 124  }
 0x3dd   :  { %v517_v38 = vsel %vm313_vm4, %v515_v36, %v477_v37  ;;  %vm799_vm4 = vcmask 31744  }
 0x3de   :  { %v491_v40 = vpop.permute.xlu0 %490  ;;  %v520_v42 = vsel %vm518_vm8, %v517_v38, %v487_v21 }
 0x3df   :  { %v522_v41 = vsel %vm521_vm9, %v519_v39, %v491_v40 }
 0x3e0   :  { %v493_v43 = vpop.permute.xlu1 %492  ;;  %v525_v45 = vsel %vm524_vm10, %v522_v41, %v499_v22  ;;  %v4436_v22 = vld [vmem:[%s6773_s6] ss:$0 sm:$0xff] }
 0x3e1   :  { %v523_v44 = vsel %vm521_vm9, %v520_v42, %v493_v43 }
 0x3e2   :  { %v507_v46 = vpop.permute.xlu0 %506  ;;  %v526_v48 = vsel %vm524_vm10, %v523_v44, %v503_v24  ;;  %v4437_v44 = vld [vmem:[#allocation12] ss:$0 sm:$0xff] }
 0x3e3   :  { %v528_v47 = vsel %vm527_vm11, %v525_v45, %v507_v46 }
 0x3e4   :  { %v509_v49 = vpop.permute.xlu1 %508  ;;  %v531_v51 = vsel %vm530_vm12, %v528_v47, 0.0 }
 0x3e5   :  { %v529_v50 = vsel %vm527_vm11, %v526_v48, %v509_v49  ;;  %v787_v49 = vld [vmem:[#allocation13] sm:$0xf] }
 0x3e6   :  { %v532_v52 = vsel %vm530_vm12, %v529_v50, 0.0  ;;  %4739 = vmatprep.subr.msk.mxu0 %vm518_vm8, %v787_v49 }
 0x3e7   :  { %v533_v53 = vadd.f32 %v532_v52, %v531_v51 }
 0x3e9   :  { %v534_v54 = vrot.slane %v533_v53, 4 }
 0x3eb   :  { %v535_v55 = vadd.f32 %v534_v54, %v533_v53 }
 0x3ed   :  { %v536_v56 = vrot.slane %v535_v55, 2 }
 0x3ef   :  { %v537_v57 = vadd.f32 %v536_v56, %v535_v55 }
 0x3f1   :  { %v538_v58 = vrot.slane %v537_v57, 1 }
 0x3f3   :  { %v539_v59 = vadd.f32 %v538_v58, %v537_v57 }
 0x3f5   :  { %v541_v60 = vmul.f32 0.0625, %v539_v59 }
 0x3f7   :  { %v542_v61 = vsub.f32 %v528_v47, %v541_v60  ;;  %v543_v62 = vsub.f32 %v529_v50, %v541_v60 }
 0x3f9   :  { %v544_v63 = vmul.f32 %v542_v61, %v542_v61  ;;  %v545_v1 = vmul.f32 %v543_v62, %v543_v62 }
 0x3fb   :  { %v546_v2 = vsel %vm530_vm12, %v544_v63, 0.0  ;;  %v547_v3 = vsel %vm530_vm12, %v545_v1, 0.0 }
 0x3fc   :  { %v548_v4 = vadd.f32 %v547_v3, %v546_v2 }
 0x3fe   :  { %v549_v5 = vrot.slane %v548_v4, 4 }
 0x400   :  { %v550_v6 = vadd.f32 %v549_v5, %v548_v4 }
 0x402   :  { %v551_v8 = vrot.slane %v550_v6, 2 }
 0x404   :  { %v552_v9 = vadd.f32 %v551_v8, %v550_v6 }
 0x406   :  { %v553_v10 = vrot.slane %v552_v9, 1 }
 0x408   :  { %v554_v11 = vadd.f32 %v553_v10, %v552_v9  ;;  %v788_v10 = vld [vmem:[#allocation15] sm:$0xff] }
 0x40a   :  { %v555_v12 = vmul.f32 0.0625, %v554_v11  ;;  %v789_v11 = vld [vmem:[#allocation15 + $0x8] sm:$0xff] }
 0x40c   :  { %v556_v13 = vadd.f32 1e-05, %v555_v12 }
 0x40e   :  { %5365 = vrsqrt.f32 %v556_v13 }
 0x418   :  { %v5366_v18 = vpop.eup %5365 }
 0x419   :  { %v559_v20 = vmul.f32 %v5366_v18, %v543_v62  ;;  %v558_v21 = vmul.f32 %v5366_v18, %v542_v61 }
 0x41b   :  { %v567_v24 = vmul.f32 %v4435_v19, %v559_v20  ;;  %v566_v25 = vmul.f32 %v4435_v19, %v558_v21 }
 0x41d   :  { %v575_v26 = vadd.f32 %v4436_v22, %v567_v24  ;;  %v574_v15 = vadd.f32 %v4436_v22, %v566_v25  ;;  %v6133_v22 = vpack.c.bf16 %v789_v11, %v788_v10  ;;  %v790_v25 = vld [vmem:[#allocation15 + $0x10] sm:$0xff] }
 0x41f   :  { %v577_v27 = vmax.f32 %v575_v26, 0.0  ;;  %v576_v28 = vmax.f32 %v574_v15, 0.0  ;;  %v791_v26 = vld [vmem:[#allocation15 + $0x18] sm:$0xff]  ;;  %5151 = vmatpush3.bf16.msra.mxu1 %v6133_v22 }
 0x420   :  { %5152 = vmatprep.subr.bf16.mxu1 %v5812_v23  ;;  %v6140_v15 = vpack.c.bf16 %v791_v26, %v790_v25 }
 0x421   :  { %601 = vrot.lane.b32.xlu1 %v577_v27, %s5815_s29  ;;  %599 = vrot.lane.b32.xlu0 %v576_v28, %s5815_s29  ;;  %v594_v29 = vrot.slane %v577_v27, 1  ;;  %v593_v30 = vrot.slane %v576_v28, 1  ;;  %v588_v32 = vrot.slane %v577_v27, 7  ;;  %v587_v33 = vrot.slane %v576_v28, 7 }
 0x423   :  { %v598_v7 = vsel %vm527_vm11, %v594_v29, 0.0  ;;  %v597_v31 = vsel %vm527_vm11, %v593_v30, 0.0  ;;  %v592_v36 = vsel %vm307_vm2, 0.0, %v588_v32  ;;  %v591_v37 = vsel %vm307_vm2, 0.0, %v587_v33  ;;  %5154 = vmatpush3.bf16.msra.mxu1 %v6140_v15 }
 0x424   :  { %vm722_vm2 = vcmask 1045509   ;;  %5161 = vmatprep.subr.bf16.mxu1 %v5812_v23 }
 0x425   :  { %609 = vrot.lane.b32.xlu1 %v598_v7, %s5813_s30  ;;  %607 = vrot.lane.b32.xlu0 %v597_v31, %s5813_s30 }
 0x493   :  { %v602_v34 = vpop.permute.xlu1 %601  ;;  %v600_v35 = vpop.permute.xlu0 %599 }
 0x494   :  { %v614_v38 = vsel %vm530_vm12, %v592_v36, %v602_v34  ;;  %v613_v39 = vsel %vm530_vm12, %v591_v37, %v600_v35 }
 0x497   :  { %v610_v40 = vpop.permute.xlu1 %609  ;;  %v608_v41 = vpop.permute.xlu0 %607 }
 0x498   :  { %v616_v42 = vsel %vm359_vm5, %v614_v38, %v610_v40  ;;  %v615_v43 = vsel %vm359_vm5, %v613_v39, %v608_v41 }
 0x499   :  { %4736 = vmatprep.mubr.msk.f32.mxu0 %vm623_vm13, %v615_v43 }
 0x49a   :  { %4737 = vmatmul.mubr.msk.f32.vlgmr.msra.gmra.mrb[2].mxu0 %vm623_vm13, %v616_v42 }
 0x49b   :  { %4740 = vmatpush3.msk.msra.mxu0 %vm518_vm8, %v787_v49 }
 0x49c   :  { %5143 = vmatprep.subr.bf16.mxu0 %v5812_v23 }
 0x56d   :  { %v4738_v45 = vpop.f32.mrb[2].mxu0 }
 0x56e   :  { %v702_v46 = vadd.f32 %v4738_v45, %v4437_v44  ;;  %v696_v47 = vpop.f32.mrb[3].mxu0 }
 0x56f   :  { %v697_v48 = vadd.f32 %v4437_v44, %v696_v47 }
 0x570   :  { %5367 = vtanh.f32 %v702_v46  ;;  %v4440_v46 = vld [vmem:[#allocation16] ss:$0 sm:$0xff] }
 0x571   :  { %5369 = vtanh.f32 %v697_v48 }
 0x57a   :  { %v5368_v50 = vpop.eup %5367 }
 0x57b   :  { %v5370_v51 = vpop.eup %5369  ;;  %v709_v52 = vrot.slane %v5368_v50, 7  ;;  %v714_v53 = vrot.slane %v5368_v50, 5  ;;  %v721_v54 = vrot.slane %v5368_v50, 4  ;;  %v726_v55 = vrot.slane %v5368_v50, 2 }
 0x57c   :  { %v713_v56 = vrot.slane %v5370_v51, 6  ;;  %v720_v57 = vrot.slane %v5370_v51, 5  ;;  %v725_v58 = vrot.slane %v5370_v51, 3  ;;  %v748_v59 = vrot.slane %v5370_v51, 4 }
 0x57d   :  { %v736_v60 = vsel %vm715_vm14, %v709_v52, %v5370_v51  ;;  %v749_v61 = vrot.slane %v5368_v50, 3  ;;  %v732_v62 = vrot.slane %v5370_v51, 2  ;;  %v733_v63 = vrot.slane %v5368_v50, 1 }
 0x57e   :  { %737 = vrot.lane.b32.xlu1 %v736_v60, %s5816_s5  ;;  %v716_v1 = vsel %vm715_vm14, %v714_v53, %v713_v56  ;;  %v744_v2 = vsel %vm727_vm15, %v721_v54, %v720_v57  ;;  %v728_v3 = vsel %vm727_vm15, %v726_v55, %v725_v58  ;;  %v756_v4 = vrot.slane %v5370_v51, 1 }
 0x57f   :  { %717 = vrot.lane.b32.xlu0 %v716_v1, %s5816_s5  ;;  %v765_v5 = vsel %vm715_vm14, %v749_v61, %v748_v59  ;;  %v752_v6 = vsel %vm715_vm14, %v733_v63, %v732_v62  ;;  %v740_v8 = vrot.slane %v5370_v51, 7  ;;  %v741_v9 = vrot.slane %v5368_v50, 6 }
 0x580   :  { %v771_v12 = vsel %vm727_vm15, %v5368_v50, %v756_v4  ;;  %v734_v13 = vsel %vm710_vm1, %v733_v63, %v732_v62  ;;  %v711_v14 = vsel %vm710_vm1, %v709_v52, %v5370_v51  ;;  %v723_v16 = vsel %vm722_vm2, %v721_v54, %v720_v57 }
 0x581   :  { %v759_v17 = vsel %vm727_vm15, %v741_v9, %v740_v8  ;;  %v742_v18 = vsel %vm722_vm2, %v741_v9, %v740_v8  ;;  %v763_v19 = vsel %vm710_vm1, %v714_v53, %v713_v56  ;;  %v750_v20 = vsel %vm710_vm1, %v749_v61, %v748_v59 }
 0x582   :  { %745 = vrot.lane.b32.xlu1 %v744_v2, %s5816_s5  ;;  %v769_v21 = vsel %vm722_vm2, %v726_v55, %v725_v58  ;;  %v757_v24 = vsel %vm722_vm2, %v5368_v50, %v756_v4 }
 0x583   :  { %729 = vrot.lane.b32.xlu0 %v728_v3, %s5816_s5 }
 0x586   :  { %766 = vrot.lane.b32.xlu1 %v765_v5, %s5816_s5 }
 0x587   :  { %753 = vrot.lane.b32.xlu0 %v752_v6, %s5816_s5 }
 0x58a   :  { %772 = vrot.lane.b32.xlu1 %v771_v12, %s5816_s5 }
 0x58b   :  { %760 = vrot.lane.b32.xlu0 %v759_v17, %s5816_s5 }
 0x5f0   :  { %v738_v27 = vpop.permute.xlu1 %737 }
 0x5f1   :  { %v778_v28 = vsel %vm310_vm3, %v734_v13, %v738_v27  ;;  %v718_v29 = vpop.permute.xlu0 %717 }
 0x5f2   :  { %v775_v30 = vsel %vm310_vm3, %v711_v14, %v718_v29  ;;  %v779_v7 = vsel %vm518_vm8, %v778_v28, %v742_v18 }
 0x5f3   :  { %v776_v31 = vsel %vm518_vm8, %v775_v30, %v723_v16 }
 0x5f4   :  { %v746_v32 = vpop.permute.xlu1 %745 }
 0x5f5   :  { %v730_v33 = vpop.permute.xlu0 %729  ;;  %v780_v35 = vsel %vm524_vm10, %v779_v7, %v746_v32 }
 0x5f6   :  { %v777_v34 = vsel %vm524_vm10, %v776_v31, %v730_v33 }
 0x5f7   :  { %4741 = vmatprep.mubr.msk.f32.mxu0 %vm799_vm4, %v777_v34 }
 0x5f8   :  { %v767_v36 = vpop.permute.xlu1 %766  ;;  %4742 = vmatmul.mubr.msk.f32.vlgmr.msra.gmra.mrb[4].mxu0 %vm799_vm4, %v780_v35 }
 0x5f9   :  { %v784_v37 = vsel %vm310_vm3, %v763_v19, %v767_v36  ;;  %v754_v38 = vpop.permute.xlu0 %753  ;;  %5145 = vmatpush3.bf16.msra.mxu0 %v6133_v22 }
 0x5fa   :  { %v781_v39 = vsel %vm310_vm3, %v750_v20, %v754_v38  ;;  %v785_v40 = vsel %vm518_vm8, %v784_v37, %v769_v21  ;;  %5146 = vmatprep.subr.bf16.mxu0 %v5812_v23 }
 0x5fb   :  { %v782_v41 = vsel %vm518_vm8, %v781_v39, %v757_v24 }
 0x5fc   :  { %v773_v42 = vpop.permute.xlu1 %772 }
 0x5fd   :  { %v761_v43 = vpop.permute.xlu0 %760  ;;  %5148 = vmatpush3.bf16.msra.mxu0 %v6140_v15  ;;  %v786_v45 = vsel %vm524_vm10, %v785_v40, %v773_v42 }
 0x5fe   :  { %v783_v44 = vsel %vm524_vm10, %v782_v41, %v761_v43  ;;  %5155 = vmatprep.subr.bf16.mxu0 %v5812_v23 }
 0x5ff   :  { %4744 = vmatprep.mubr.msk.f32.mxu0 %vm799_vm4, %v783_v44 }
 0x600   :  { %4745 = vmatmul.mubr.msk.f32.gmra.mrb[6].mxu0 %vm799_vm4, %v786_v45 }
 0x601   :  { %4755 = vmatprep.mubr.msk.f32.mxu0 %vm5808_vm0, %v5807_v0 }
 0x604   :  { %4756 = vmatmul.mubr.f32.vlgmr.msra.gmra.mrb[8].mxu0 %v5807_v0 }
 0x605   :  { %5157 = vmatpush3.bf16.msra.mxu0 %v6133_v22  ;;  %4777 = vmatprep.mubr.msk.f32.mxu0 %vm5808_vm0, %v5807_v0 }
 0x606   :  { %5158 = vmatprep.subr.bf16.mxu0 %v5812_v23 }
 0x609   :  { %5160 = vmatpush3.bf16.msra.mxu0 %v6140_v15 }
 0x60a   :  { %5167 = vmatprep.subr.bf16.mxu0 %v5812_v23 }
 0x6cb   :  { %v4743_v47 = vpop.f32.mrb[4].mxu0 }
 0x6cc   :  { %v6176_v48 = vadd.f32 %v4743_v47, %v4440_v46  ;;  %v881_v49 = vpop.f32.mrb[5].mxu0 }
 0x6cd   :  { %v6182_v54 = vadd.f32 %v4440_v46, %v881_v49 }
 0x6d3   :  { %v4746_v50 = vpop.f32.mrb[6].mxu0 }
 0x6d4   :  { %v6178_v51 = vadd.f32 %v4746_v50, %v4440_v46  ;;  %v891_v52 = vpop.f32.mrb[7].mxu0 }
 0x6d5   :  { %v6180_v53 = vadd.f32 %v4440_v46, %v891_v52 }
 0x6d7   :  { %v969_v55 = vpop.f32.mrb[8].mxu0 }
 0x6d8   :  { %v973_v56 = vadd.f32 %v969_v55, %v6182_v54  ;;  %v4757_v57 = vpop.f32.mrb[9].mxu0 }
 0x6da   :  { %5371 = vtanh.f32 %v973_v56  ;;  %v974_v59 = vmul.f32 0.5, %v973_v56 }
 0x6dc   :  { %5373 = vtanh.f32 %v974_v59 }
 0x6e4   :  { %v5372_v58 = vpop.eup %5371 }
 0x6e5   :  { %981 = vrot.lane.b32.xlu0 %v5372_v58, %s5810_s11 }
 0x6e6   :  { %v5374_v60 = vpop.eup %5373 }
 0x6e7   :  { %v976_v61 = vadd.f32 1.0, %v5374_v60 }
 0x6e9   :  { %v977_v62 = vmul.f32 0.5, %v976_v61 }
 0x6eb   :  { %v979_v2 = vmul.f32 0.0, %v977_v62 }
 0x757   :  { %v982_v63 = vpop.permute.xlu0 %981 }
 0x758   :  { %v984_v1 = vmul.f32 %v982_v63, %v977_v62 }
 0x75a   :  { %986 = vrot.lane.b32.xlu1 %v984_v1, %s5813_s30 }
 0x7cc   :  { %v987_v3 = vpop.permute.xlu1 %986 }
 0x7cd   :  { %v989_v4 = vadd.f32 %v987_v3, %v979_v2 }
 0x7cf   :  { %5375 = vtanh.f32 %v989_v4  ;;  %v1081_v24 = vrot.slane %v989_v4, 6 }
 0x7d9   :  { %v5376_v5 = vpop.eup %5375 }
 0x7da   :  { %992 = vrot.lane.b32.xlu0 %v5376_v5, %s5810_s11 }
 0x84c   :  { %v993_v6 = vpop.permute.xlu0 %992 }
 0x84d   :  { %v6188_v8 = vmul.f32 %v993_v6, %v977_v62 }
 0x84f   :  { %997 = vrot.lane.b32.xlu1 %v6188_v8, %s5813_s30 }
 0x8c1   :  { %v998_v9 = vpop.permute.xlu1 %997 }
 0x8c2   :  { %4767 = vmatmul.mubr.msk.f32.vlgmr.msra.gmra.mrb[2].mxu1 %vm359_vm5, %v998_v9 }
 0x8c3   :  { %5163 = vmatpush3.bf16.msra.mxu1 %v6133_v22  ;;  %4788 = vmatprep.mubr.msk.f32.mxu1 %vm5808_vm0, %v5807_v0 }
 0x8c4   :  { %5164 = vmatprep.subr.bf16.mxu1 %v5812_v23 }
 0x8c7   :  { %5166 = vmatpush3.bf16.msra.mxu1 %v6140_v15 }
 0x8c8   :  { %5173 = vmatprep.subr.bf16.mxu1 %v5812_v23 }
 0x995   :  { %v1067_v10 = vpop.f32.mrb[2].mxu1 }
 0x996   :  { %v1072_v11 = vrot.slane %v1067_v10, 6  ;;  %v4768_v12 = vpop.f32.mrb[3].mxu1 }
 0x998   :  { %v1074_v13 = vadd.f32 %v1072_v11, %v6182_v54 }
 0x99a   :  { %5377 = vtanh.f32 %v1074_v13  ;;  %v1075_v16 = vmul.f32 0.5, %v1074_v13 }
 0x99c   :  { %5379 = vtanh.f32 %v1075_v16 }
 0x9a4   :  { %v5378_v14 = vpop.eup %5377 }
 0x9a5   :  { %1085 = vrot.lane.b32.xlu0 %v5378_v14, %s5810_s11 }
 0x9a6   :  { %v5380_v17 = vpop.eup %5379 }
 0x9a7   :  { %v1077_v18 = vadd.f32 1.0, %v5380_v17 }
 0x9a9   :  { %v1078_v19 = vmul.f32 0.5, %v1077_v18 }
 0x9ab   :  { %v1083_v25 = vmul.f32 %v1081_v24, %v1078_v19 }
 0xa17   :  { %v1086_v20 = vpop.permute.xlu0 %1085 }
 0xa18   :  { %v1088_v21 = vmul.f32 %v1086_v20, %v1078_v19 }
 0xa1a   :  { %1090 = vrot.lane.b32.xlu1 %v1088_v21, %s5813_s30 }
 0xa8c   :  { %v1091_v26 = vpop.permute.xlu1 %1090 }
 0xa8d   :  { %v1093_v27 = vadd.f32 %v1091_v26, %v1083_v25 }
 0xa8f   :  { %5381 = vtanh.f32 %v1093_v27  ;;  %v1186_v43 = vrot.slane %v1093_v27, 6 }
 0xa99   :  { %v5382_v28 = vpop.eup %5381 }
 0xa9a   :  { %1096 = vrot.lane.b32.xlu0 %v5382_v28, %s5810_s11 }
 0xb0c   :  { %v1097_v29 = vpop.permute.xlu0 %1096 }
 0xb0d   :  { %v1099_v30 = vmul.f32 %v1097_v29, %v1078_v19 }
 0xb0f   :  { %v1101_v7 = vrot.slane %v1099_v30, 2  ;;  %v2558_v52 = vsel %vm310_vm3, %v6188_v8, %v1099_v30 }
 0xb11   :  { %1102 = vrot.lane.b32.xlu1 %v1101_v7, %s5813_s30 }
 0xb83   :  { %v1103_v31 = vpop.permute.xlu1 %1102 }
 0xb84   :  { %4778 = vmatmul.mubr.msk.f32.vlgmr.msra.gmra.mrb[10].mxu0 %vm359_vm5, %v1103_v31 }
 0xb85   :  { %5169 = vmatpush3.bf16.msra.mxu0 %v6133_v22  ;;  %4799 = vmatprep.mubr.msk.f32.mxu0 %vm5808_vm0, %v5807_v0 }
 0xb86   :  { %5170 = vmatprep.subr.bf16.mxu0 %v5812_v23 }
 0xb89   :  { %5172 = vmatpush3.bf16.msra.mxu0 %v6140_v15 }
 0xb8a   :  { %5179 = vmatprep.subr.bf16.mxu0 %v5812_v23 }
 0xc57   :  { %v1172_v32 = vpop.f32.mrb[10].mxu0 }
 0xc58   :  { %v1177_v33 = vrot.slane %v1172_v32, 4  ;;  %v4779_v34 = vpop.f32.mrb[11].mxu0 }
 0xc5a   :  { %v1179_v35 = vadd.f32 %v1177_v33, %v6182_v54 }
 0xc5c   :  { %5383 = vtanh.f32 %v1179_v35  ;;  %v1180_v37 = vmul.f32 0.5, %v1179_v35 }
 0xc5e   :  { %5385 = vtanh.f32 %v1180_v37 }
 0xc66   :  { %v5384_v36 = vpop.eup %5383 }
 0xc67   :  { %1190 = vrot.lane.b32.xlu0 %v5384_v36, %s5810_s11 }
 0xc68   :  { %v5386_v38 = vpop.eup %5385 }
 0xc69   :  { %v1182_v39 = vadd.f32 1.0, %v5386_v38 }
 0xc6b   :  { %v1183_v40 = vmul.f32 0.5, %v1182_v39 }
 0xc6d   :  { %v1188_v44 = vmul.f32 %v1186_v43, %v1183_v40 }
 0xcd9   :  { %v1191_v41 = vpop.permute.xlu0 %1190 }
 0xcda   :  { %v1193_v42 = vmul.f32 %v1191_v41, %v1183_v40 }
 0xcdc   :  { %1195 = vrot.lane.b32.xlu1 %v1193_v42, %s5813_s30 }
 0xd4e   :  { %v1196_v45 = vpop.permute.xlu1 %1195 }
 0xd4f   :  { %v1198_v46 = vadd.f32 %v1196_v45, %v1188_v44 }
 0xd51   :  { %5387 = vtanh.f32 %v1198_v46  ;;  %v1291_v6 = vrot.slane %v1198_v46, 6 }
 0xd5b   :  { %v5388_v47 = vpop.eup %5387 }
 0xd5c   :  { %1201 = vrot.lane.b32.xlu0 %v5388_v47, %s5810_s11 }
 0xdce   :  { %v1202_v49 = vpop.permute.xlu0 %1201 }
 0xdcf   :  { %v1204_v50 = vmul.f32 %v1202_v49, %v1183_v40 }
 0xdd1   :  { %v1206_v55 = vrot.slane %v1204_v50, 4  ;;  %v2559_v56 = vsel %vm518_vm8, %v2558_v52, %v1204_v50 }
 0xdd3   :  { %1207 = vrot.lane.b32.xlu1 %v1206_v55, %s5813_s30 }
 0xe45   :  { %v1208_v57 = vpop.permute.xlu1 %1207 }
 0xe46   :  { %4789 = vmatmul.mubr.msk.f32.vlgmr.msra.gmra.mrb[4].mxu1 %vm359_vm5, %v1208_v57 }
 0xe47   :  { %5175 = vmatpush3.bf16.msra.mxu1 %v6133_v22  ;;  %4810 = vmatprep.mubr.msk.f32.mxu1 %vm5808_vm0, %v5807_v0 }
 0xe48   :  { %5176 = vmatprep.subr.bf16.mxu1 %v5812_v23 }
 0xe4b   :  { %5178 = vmatpush3.bf16.msra.mxu1 %v6140_v15 }
 0xe4c   :  { %5185 = vmatprep.subr.bf16.mxu1 %v5812_v23 }
 0xf19   :  { %v1277_v58 = vpop.f32.mrb[4].mxu1 }
 0xf1a   :  { %v1282_v59 = vrot.slane %v1277_v58, 2  ;;  %v4790_v60 = vpop.f32.mrb[5].mxu1 }
 0xf1c   :  { %v1284_v61 = vadd.f32 %v1282_v59, %v6182_v54 }
 0xf1e   :  { %5389 = vtanh.f32 %v1284_v61  ;;  %v1285_v63 = vmul.f32 0.5, %v1284_v61 }
 0xf20   :  { %5391 = vtanh.f32 %v1285_v63 }
 0xf28   :  { %v5390_v62 = vpop.eup %5389 }
 0xf29   :  { %1295 = vrot.lane.b32.xlu0 %v5390_v62, %s5810_s11 }
 0xf2a   :  { %v5392_v1 = vpop.eup %5391 }
 0xf2b   :  { %v1287_v2 = vadd.f32 1.0, %v5392_v1 }
 0xf2d   :  { %v1288_v3 = vmul.f32 0.5, %v1287_v2 }
 0xf2f   :  { %v1293_v8 = vmul.f32 %v1291_v6, %v1288_v3 }
 0xf9b   :  { %v1296_v4 = vpop.permute.xlu0 %1295 }
 0xf9c   :  { %v1298_v5 = vmul.f32 %v1296_v4, %v1288_v3 }
 0xf9e   :  { %1300 = vrot.lane.b32.xlu1 %v1298_v5, %s5813_s30 }
0x1010   :  { %v1301_v9 = vpop.permute.xlu1 %1300 }
0x1011   :  { %v1303_v10 = vadd.f32 %v1301_v9, %v1293_v8 }
0x1013   :  { %5393 = vtanh.f32 %v1303_v10  ;;  %v1393_v29 = vrot.slane %v1303_v10, 6 }
0x101d   :  { %v5394_v11 = vpop.eup %5393 }
0x101e   :  { %1306 = vrot.lane.b32.xlu0 %v5394_v11, %s5810_s11 }
0x1090   :  { %v1307_v54 = vpop.permute.xlu0 %1306 }
0x1091   :  { %v1309_v12 = vmul.f32 %v1307_v54, %v1288_v3 }
0x1093   :  { %v1311_v13 = vrot.slane %v1309_v12, 6  ;;  %v6231_v14 = vsel %vm524_vm10, %v2559_v56, %v1309_v12 }
0x1095   :  { %1312 = vrot.lane.b32.xlu1 %v1311_v13, %s5813_s30 }
0x1107   :  { %v1313_v16 = vpop.permute.xlu1 %1312 }
0x1108   :  { %4800 = vmatmul.mubr.msk.f32.vlgmr.msra.gmra.mrb[12].mxu0 %vm359_vm5, %v1313_v16 }
0x1109   :  { %5181 = vmatpush3.bf16.msra.mxu0 %v6133_v22  ;;  %4821 = vmatprep.mubr.msk.f32.mxu0 %vm5808_vm0, %v5807_v0 }
0x110a   :  { %5182 = vmatprep.subr.bf16.mxu0 %v5812_v23 }
0x110d   :  { %5184 = vmatpush3.bf16.msra.mxu0 %v6140_v15 }
0x110e   :  { %5191 = vmatprep.subr.bf16.mxu0 %v5812_v23 }
0x11db   :  { %v1382_v17 = vpop.f32.mrb[12].mxu0 }
0x11dc   :  { %v1386_v18 = vadd.f32 %v1382_v17, %v6176_v48  ;;  %v4801_v19 = vpop.f32.mrb[13].mxu0 }
0x11de   :  { %5395 = vtanh.f32 %v1386_v18  ;;  %v1387_v21 = vmul.f32 0.5, %v1386_v18 }
0x11e0   :  { %5397 = vtanh.f32 %v1387_v21 }
0x11e8   :  { %v5396_v20 = vpop.eup %5395 }
0x11e9   :  { %1397 = vrot.lane.b32.xlu0 %v5396_v20, %s5810_s11 }
0x11ea   :  { %v5398_v24 = vpop.eup %5397 }
0x11eb   :  { %v1389_v25 = vadd.f32 1.0, %v5398_v24 }
0x11ed   :  { %v1390_v26 = vmul.f32 0.5, %v1389_v25 }
0x11ef   :  { %v1395_v30 = vmul.f32 %v1393_v29, %v1390_v26 }
0x125b   :  { %v1398_v27 = vpop.permute.xlu0 %1397 }
0x125c   :  { %v1400_v28 = vmul.f32 %v1398_v27, %v1390_v26 }
0x125e   :  { %1402 = vrot.lane.b32.xlu1 %v1400_v28, %s5813_s30 }
0x12d0   :  { %v1403_v7 = vpop.permute.xlu1 %1402 }
0x12d1   :  { %v1405_v31 = vadd.f32 %v1403_v7, %v1395_v30 }
0x12d3   :  { %5399 = vtanh.f32 %v1405_v31  ;;  %v1497_v47 = vrot.slane %v1405_v31, 6 }
0x12dd   :  { %v5400_v32 = vpop.eup %5399 }
0x12de   :  { %1408 = vrot.lane.b32.xlu0 %v5400_v32, %s5810_s11 }
0x1350   :  { %v1409_v33 = vpop.permute.xlu0 %1408 }
0x1351   :  { %v6245_v34 = vmul.f32 %v1409_v33, %v1390_v26 }
0x1353   :  { %1413 = vrot.lane.b32.xlu1 %v6245_v34, %s5813_s30 }
0x13c5   :  { %v1414_v35 = vpop.permute.xlu1 %1413 }
0x13c6   :  { %4811 = vmatmul.mubr.msk.f32.vlgmr.msra.gmra.mrb[6].mxu1 %vm359_vm5, %v1414_v35 }
0x13c7   :  { %5187 = vmatpush3.bf16.msra.mxu1 %v6133_v22  ;;  %4832 = vmatprep.mubr.msk.f32.mxu1 %vm5808_vm0, %v5807_v0 }
0x13c8   :  { %5188 = vmatprep.subr.bf16.mxu1 %v5812_v23 }
0x13cb   :  { %5190 = vmatpush3.bf16.msra.mxu1 %v6140_v15 }
0x13cc   :  { %5197 = vmatprep.subr.bf16.mxu1 %v5812_v23 }
0x1499   :  { %v1483_v36 = vpop.f32.mrb[6].mxu1 }
0x149a   :  { %v1488_v37 = vrot.slane %v1483_v36, 6  ;;  %v4812_v38 = vpop.f32.mrb[7].mxu1 }
0x149c   :  { %v1490_v39 = vadd.f32 %v1488_v37, %v6176_v48 }
0x149e   :  { %5401 = vtanh.f32 %v1490_v39  ;;  %v1491_v41 = vmul.f32 0.5, %v1490_v39 }
0x14a0   :  { %5403 = vtanh.f32 %v1491_v41 }
0x14a8   :  { %v5402_v40 = vpop.eup %5401 }
0x14a9   :  { %1501 = vrot.lane.b32.xlu0 %v5402_v40, %s5810_s11 }
0x14aa   :  { %v5404_v42 = vpop.eup %5403 }
0x14ab   :  { %v1493_v43 = vadd.f32 1.0, %v5404_v42 }
0x14ad   :  { %v1494_v44 = vmul.f32 0.5, %v1493_v43 }
0x14af   :  { %v1499_v49 = vmul.f32 %v1497_v47, %v1494_v44 }
0x151b   :  { %v1502_v45 = vpop.permute.xlu0 %1501 }
0x151c   :  { %v1504_v46 = vmul.f32 %v1502_v45, %v1494_v44 }
0x151e   :  { %1506 = vrot.lane.b32.xlu1 %v1504_v46, %s5813_s30 }
0x1590   :  { %v1507_v50 = vpop.permute.xlu1 %1506 }
0x1591   :  { %v1509_v52 = vadd.f32 %v1507_v50, %v1499_v49 }
0x1593   :  { %5405 = vtanh.f32 %v1509_v52  ;;  %v1602_v9 = vrot.slane %v1509_v52, 6 }
0x159d   :  { %v5406_v55 = vpop.eup %5405 }
0x159e   :  { %1512 = vrot.lane.b32.xlu0 %v5406_v55, %s5810_s11 }
0x1610   :  { %v1513_v56 = vpop.permute.xlu0 %1512 }
0x1611   :  { %v1515_v57 = vmul.f32 %v1513_v56, %v1494_v44 }
0x1613   :  { %v1517_v58 = vrot.slane %v1515_v57, 2  ;;  %v2561_v17 = vsel %vm310_vm3, %v6245_v34, %v1515_v57 }
0x1615   :  { %1518 = vrot.lane.b32.xlu1 %v1517_v58, %s5813_s30 }
0x1687   :  { %v1519_v59 = vpop.permute.xlu1 %1518 }
0x1688   :  { %4822 = vmatmul.mubr.msk.f32.vlgmr.msra.gmra.mrb[14].mxu0 %vm359_vm5, %v1519_v59 }
0x1689   :  { %5193 = vmatpush3.bf16.msra.mxu0 %v6133_v22  ;;  %4843 = vmatprep.mubr.msk.f32.mxu0 %vm5808_vm0, %v5807_v0 }
0x168a   :  { %5194 = vmatprep.subr.bf16.mxu0 %v5812_v23 }
0x168d   :  { %5196 = vmatpush3.bf16.msra.mxu0 %v6140_v15 }
0x168e   :  { %5203 = vmatprep.subr.bf16.mxu0 %v5812_v23 }
0x175b   :  { %v1588_v60 = vpop.f32.mrb[14].mxu0 }
0x175c   :  { %v1593_v61 = vrot.slane %v1588_v60, 4  ;;  %v4823_v62 = vpop.f32.mrb[15].mxu0 }
0x175e   :  { %v1595_v63 = vadd.f32 %v1593_v61, %v6176_v48 }
0x1760   :  { %5407 = vtanh.f32 %v1595_v63  ;;  %v1596_v2 = vmul.f32 0.5, %v1595_v63 }
0x1762   :  { %5409 = vtanh.f32 %v1596_v2 }
0x176a   :  { %v5408_v1 = vpop.eup %5407 }
0x176b   :  { %1606 = vrot.lane.b32.xlu0 %v5408_v1, %s5810_s11 }
0x176c   :  { %v5410_v3 = vpop.eup %5409 }
0x176d   :  { %v1598_v4 = vadd.f32 1.0, %v5410_v3 }
0x176f   :  { %v1599_v5 = vmul.f32 0.5, %v1598_v4 }
0x1771   :  { %v1604_v10 = vmul.f32 %v1602_v9, %v1599_v5 }
0x17dd   :  { %v1607_v6 = vpop.permute.xlu0 %1606 }
0x17de   :  { %v1609_v8 = vmul.f32 %v1607_v6, %v1599_v5 }
0x17e0   :  { %1611 = vrot.lane.b32.xlu1 %v1609_v8, %s5813_s30 }
0x1852   :  { %v1612_v11 = vpop.permute.xlu1 %1611 }
0x1853   :  { %v1614_v54 = vadd.f32 %v1612_v11, %v1604_v10 }
0x1855   :  { %5411 = vtanh.f32 %v1614_v54  ;;  %v1707_v33 = vrot.slane %v1614_v54, 6 }
0x185f   :  { %v5412_v12 = vpop.eup %5411 }
0x1860   :  { %1617 = vrot.lane.b32.xlu0 %v5412_v12, %s5810_s11 }
0x18d2   :  { %v1618_v13 = vpop.permute.xlu0 %1617 }
0x18d3   :  { %v1620_v16 = vmul.f32 %v1618_v13, %v1599_v5 }
0x18d5   :  { %v1622_v18 = vrot.slane %v1620_v16, 4  ;;  %v2562_v19 = vsel %vm518_vm8, %v2561_v17, %v1620_v16 }
0x18d7   :  { %1623 = vrot.lane.b32.xlu1 %v1622_v18, %s5813_s30 }
0x1949   :  { %v1624_v20 = vpop.permute.xlu1 %1623 }
0x194a   :  { %4833 = vmatmul.mubr.msk.f32.vlgmr.msra.gmra.mrb[8].mxu1 %vm359_vm5, %v1624_v20 }
0x194b   :  { %5199 = vmatpush3.bf16.msra.mxu1 %v6133_v22  ;;  %4854 = vmatprep.mubr.msk.f32.mxu1 %vm5808_vm0, %v5807_v0 }
0x194c   :  { %5200 = vmatprep.subr.bf16.mxu1 %v5812_v23 }
0x194f   :  { %5202 = vmatpush3.bf16.msra.mxu1 %v6140_v15 }
0x1950   :  { %5209 = vmatprep.subr.bf16.mxu1 %v5812_v23 }
0x1a1d   :  { %v1693_v21 = vpop.f32.mrb[8].mxu1 }
0x1a1e   :  { %v1698_v24 = vrot.slane %v1693_v21, 2  ;;  %v4834_v25 = vpop.f32.mrb[9].mxu1 }
0x1a20   :  { %v1700_v26 = vadd.f32 %v1698_v24, %v6176_v48 }
0x1a22   :  { %5413 = vtanh.f32 %v1700_v26  ;;  %v1701_v28 = vmul.f32 0.5, %v1700_v26 }
0x1a24   :  { %5415 = vtanh.f32 %v1701_v28 }
0x1a2c   :  { %v5414_v27 = vpop.eup %5413 }
0x1a2d   :  { %1711 = vrot.lane.b32.xlu0 %v5414_v27, %s5810_s11 }
0x1a2e   :  { %v5416_v29 = vpop.eup %5415 }
0x1a2f   :  { %v1703_v30 = vadd.f32 1.0, %v5416_v29 }
0x1a31   :  { %v1704_v7 = vmul.f32 0.5, %v1703_v30 }
0x1a33   :  { %v1709_v34 = vmul.f32 %v1707_v33, %v1704_v7 }
0x1a9f   :  { %v1712_v31 = vpop.permute.xlu0 %1711 }
0x1aa0   :  { %v1714_v32 = vmul.f32 %v1712_v31, %v1704_v7 }
0x1aa2   :  { %1716 = vrot.lane.b32.xlu1 %v1714_v32, %s5813_s30 }
0x1b14   :  { %v1717_v35 = vpop.permute.xlu1 %1716 }
0x1b15   :  { %v1719_v36 = vadd.f32 %v1717_v35, %v1709_v34 }
0x1b17   :  { %5417 = vtanh.f32 %v1719_v36  ;;  %v1809_v56 = vrot.slane %v1719_v36, 6 }
0x1b21   :  { %v5418_v37 = vpop.eup %5417 }
0x1b22   :  { %1722 = vrot.lane.b32.xlu0 %v5418_v37, %s5810_s11 }
0x1b94   :  { %v1723_v48 = vpop.permute.xlu0 %1722 }
0x1b95   :  { %v1725_v38 = vmul.f32 %v1723_v48, %v1704_v7 }
0x1b97   :  { %v1727_v39 = vrot.slane %v1725_v38, 6  ;;  %v6288_v40 = vsel %vm524_vm10, %v2562_v19, %v1725_v38 }
0x1b99   :  { %1728 = vrot.lane.b32.xlu1 %v1727_v39, %s5813_s30 }
0x1c0b   :  { %v1729_v41 = vpop.permute.xlu1 %1728 }
0x1c0c   :  { %4844 = vmatmul.mubr.msk.f32.vlgmr.msra.gmra.mrb[16].mxu0 %vm359_vm5, %v1729_v41 }
0x1c0d   :  { %5205 = vmatpush3.bf16.msra.mxu0 %v6133_v22  ;;  %4865 = vmatprep.mubr.msk.f32.mxu0 %vm5808_vm0, %v5807_v0 }
0x1c0e   :  { %5206 = vmatprep.subr.bf16.mxu0 %v5812_v23 }
0x1c11   :  { %5208 = vmatpush3.bf16.msra.mxu0 %v6140_v15 }
0x1c12   :  { %5215 = vmatprep.subr.bf16.mxu0 %v5812_v23 }
0x1cdf   :  { %v1798_v42 = vpop.f32.mrb[16].mxu0 }
0x1ce0   :  { %v1802_v43 = vadd.f32 %v1798_v42, %v6180_v53  ;;  %v4845_v44 = vpop.f32.mrb[17].mxu0 }
0x1ce2   :  { %5419 = vtanh.f32 %v1802_v43  ;;  %v1803_v46 = vmul.f32 0.5, %v1802_v43 }
0x1ce4   :  { %5421 = vtanh.f32 %v1803_v46 }
0x1cec   :  { %v5420_v45 = vpop.eup %5419 }
0x1ced   :  { %1813 = vrot.lane.b32.xlu0 %v5420_v45, %s5810_s11 }
0x1cee   :  { %v5422_v47 = vpop.eup %5421 }
0x1cef   :  { %v1805_v49 = vadd.f32 1.0, %v5422_v47 }
0x1cf1   :  { %v1806_v50 = vmul.f32 0.5, %v1805_v49 }
0x1cf3   :  { %v1811_v57 = vmul.f32 %v1809_v56, %v1806_v50 }
0x1d5f   :  { %v1814_v52 = vpop.permute.xlu0 %1813 }
0x1d60   :  { %v1816_v55 = vmul.f32 %v1814_v52, %v1806_v50 }
0x1d62   :  { %1818 = vrot.lane.b32.xlu1 %v1816_v55, %s5813_s30 }
0x1dd4   :  { %v1819_v58 = vpop.permute.xlu1 %1818 }
0x1dd5   :  { %v1821_v59 = vadd.f32 %v1819_v58, %v1811_v57 }
0x1dd7   :  { %5423 = vtanh.f32 %v1821_v59  ;;  %v1913_v12 = vrot.slane %v1821_v59, 6 }
0x1de1   :  { %v5424_v60 = vpop.eup %5423 }
0x1de2   :  { %1824 = vrot.lane.b32.xlu0 %v5424_v60, %s5810_s11 }
0x1e54   :  { %v1825_v61 = vpop.permute.xlu0 %1824 }
0x1e55   :  { %v6302_v62 = vmul.f32 %v1825_v61, %v1806_v50 }
0x1e57   :  { %1829 = vrot.lane.b32.xlu1 %v6302_v62, %s5813_s30 }
0x1ec9   :  { %v1830_v63 = vpop.permute.xlu1 %1829 }
0x1eca   :  { %4855 = vmatmul.mubr.msk.f32.vlgmr.msra.gmra.mrb[10].mxu1 %vm359_vm5, %v1830_v63 }
0x1ecb   :  { %5211 = vmatpush3.bf16.msra.mxu1 %v6133_v22  ;;  %4876 = vmatprep.mubr.msk.f32.mxu1 %vm5808_vm0, %v5807_v0 }
0x1ecc   :  { %5212 = vmatprep.subr.bf16.mxu1 %v5812_v23 }
0x1ecf   :  { %5214 = vmatpush3.bf16.msra.mxu1 %v6140_v15 }
0x1ed0   :  { %5221 = vmatprep.subr.bf16.mxu1 %v5812_v23 }
0x1f9d   :  { %v1899_v1 = vpop.f32.mrb[10].mxu1 }
0x1f9e   :  { %v1904_v2 = vrot.slane %v1899_v1, 6  ;;  %v4856_v3 = vpop.f32.mrb[11].mxu1 }
0x1fa0   :  { %v1906_v4 = vadd.f32 %v1904_v2, %v6180_v53 }
0x1fa2   :  { %5425 = vtanh.f32 %v1906_v4  ;;  %v1907_v6 = vmul.f32 0.5, %v1906_v4 }
0x1fa4   :  { %5427 = vtanh.f32 %v1907_v6 }
0x1fac   :  { %v5426_v5 = vpop.eup %5425 }
0x1fad   :  { %1917 = vrot.lane.b32.xlu0 %v5426_v5, %s5810_s11 }
0x1fae   :  { %v5428_v8 = vpop.eup %5427 }
0x1faf   :  { %v1909_v9 = vadd.f32 1.0, %v5428_v8 }
0x1fb1   :  { %v1910_v10 = vmul.f32 0.5, %v1909_v9 }
0x1fb3   :  { %v1915_v13 = vmul.f32 %v1913_v12, %v1910_v10 }
0x201f   :  { %v1918_v11 = vpop.permute.xlu0 %1917 }
0x2020   :  { %v1920_v54 = vmul.f32 %v1918_v11, %v1910_v10 }
0x2022   :  { %1922 = vrot.lane.b32.xlu1 %v1920_v54, %s5813_s30 }
0x2094   :  { %v1923_v16 = vpop.permute.xlu1 %1922 }
0x2095   :  { %v1925_v17 = vadd.f32 %v1923_v16, %v1915_v13 }
0x2097   :  { %5429 = vtanh.f32 %v1925_v17  ;;  %v2018_v35 = vrot.slane %v1925_v17, 6 }
0x20a1   :  { %v5430_v18 = vpop.eup %5429 }
0x20a2   :  { %1928 = vrot.lane.b32.xlu0 %v5430_v18, %s5810_s11 }
0x2114   :  { %v1929_v19 = vpop.permute.xlu0 %1928 }
0x2115   :  { %v1931_v20 = vmul.f32 %v1929_v19, %v1910_v10 }
0x2117   :  { %v1933_v21 = vrot.slane %v1931_v20, 2  ;;  %v2564_v42 = vsel %vm310_vm3, %v6302_v62, %v1931_v20 }
0x2119   :  { %1934 = vrot.lane.b32.xlu1 %v1933_v21, %s5813_s30 }
0x218b   :  { %v1935_v24 = vpop.permute.xlu1 %1934 }
0x218c   :  { %4866 = vmatmul.mubr.msk.f32.vlgmr.msra.gmra.mrb[18].mxu0 %vm359_vm5, %v1935_v24 }
0x218d   :  { %5217 = vmatpush3.bf16.msra.mxu0 %v6133_v22  ;;  %4887 = vmatprep.mubr.msk.f32.mxu0 %vm5808_vm0, %v5807_v0 }
0x218e   :  { %5218 = vmatprep.subr.bf16.mxu0 %v5812_v23 }
0x2191   :  { %5220 = vmatpush3.bf16.msra.mxu0 %v6140_v15 }
0x2192   :  { %5227 = vmatprep.subr.bf16.mxu0 %v5812_v23 }
0x225f   :  { %v2004_v25 = vpop.f32.mrb[18].mxu0 }
0x2260   :  { %v2009_v26 = vrot.slane %v2004_v25, 4  ;;  %v4867_v27 = vpop.f32.mrb[19].mxu0 }
0x2262   :  { %v2011_v28 = vadd.f32 %v2009_v26, %v6180_v53 }
0x2264   :  { %5431 = vtanh.f32 %v2011_v28  ;;  %v2012_v30 = vmul.f32 0.5, %v2011_v28 }
0x2266   :  { %5433 = vtanh.f32 %v2012_v30 }
0x226e   :  { %v5432_v29 = vpop.eup %5431 }
0x226f   :  { %2022 = vrot.lane.b32.xlu0 %v5432_v29, %s5810_s11 }
0x2270   :  { %v5434_v7 = vpop.eup %5433 }
0x2271   :  { %v2014_v31 = vadd.f32 1.0, %v5434_v7 }
0x2273   :  { %v2015_v32 = vmul.f32 0.5, %v2014_v31 }
0x2275   :  { %v2020_v36 = vmul.f32 %v2018_v35, %v2015_v32 }
0x22e1   :  { %v2023_v33 = vpop.permute.xlu0 %2022 }
0x22e2   :  { %v2025_v34 = vmul.f32 %v2023_v33, %v2015_v32 }
0x22e4   :  { %2027 = vrot.lane.b32.xlu1 %v2025_v34, %s5813_s30 }
0x2356   :  { %v2028_v37 = vpop.permute.xlu1 %2027 }
0x2357   :  { %v2030_v48 = vadd.f32 %v2028_v37, %v2020_v36 }
0x2359   :  { %5435 = vtanh.f32 %v2030_v48  ;;  %v2123_v61 = vrot.slane %v2030_v48, 6 }
0x2363   :  { %v5436_v38 = vpop.eup %5435 }
0x2364   :  { %2033 = vrot.lane.b32.xlu0 %v5436_v38, %s5810_s11 }
0x23d6   :  { %v2034_v39 = vpop.permute.xlu0 %2033 }
0x23d7   :  { %v2036_v41 = vmul.f32 %v2034_v39, %v2015_v32 }
0x23d9   :  { %v2038_v43 = vrot.slane %v2036_v41, 4  ;;  %v2565_v44 = vsel %vm518_vm8, %v2564_v42, %v2036_v41 }
0x23db   :  { %2039 = vrot.lane.b32.xlu1 %v2038_v43, %s5813_s30 }
0x244d   :  { %v2040_v45 = vpop.permute.xlu1 %2039 }
0x244e   :  { %4877 = vmatmul.mubr.msk.f32.vlgmr.msra.gmra.mrb[12].mxu1 %vm359_vm5, %v2040_v45 }
0x244f   :  { %5223 = vmatpush3.bf16.msra.mxu1 %v6133_v22  ;;  %4898 = vmatprep.mubr.msk.f32.mxu1 %vm5808_vm0, %v5807_v0 }
0x2450   :  { %5224 = vmatprep.subr.bf16.mxu1 %v5812_v23 }
0x2453   :  { %5226 = vmatpush3.bf16.msra.mxu1 %v6140_v15 }
0x2454   :  { %5233 = vmatprep.subr.bf16.mxu1 %v5812_v23 }
0x2521   :  { %v2109_v46 = vpop.f32.mrb[12].mxu1 }
0x2522   :  { %v2114_v47 = vrot.slane %v2109_v46, 2  ;;  %v4878_v49 = vpop.f32.mrb[13].mxu1 }
0x2524   :  { %v2116_v50 = vadd.f32 %v2114_v47, %v6180_v53 }
0x2526   :  { %5437 = vtanh.f32 %v2116_v50  ;;  %v2117_v55 = vmul.f32 0.5, %v2116_v50 }
0x2528   :  { %5439 = vtanh.f32 %v2117_v55 }
0x2530   :  { %v5438_v52 = vpop.eup %5437 }
0x2531   :  { %2127 = vrot.lane.b32.xlu0 %v5438_v52, %s5810_s11 }
0x2532   :  { %v5440_v56 = vpop.eup %5439 }
0x2533   :  { %v2119_v57 = vadd.f32 1.0, %v5440_v56 }
0x2535   :  { %v2120_v58 = vmul.f32 0.5, %v2119_v57 }
0x2537   :  { %v2125_v62 = vmul.f32 %v2123_v61, %v2120_v58 }
0x25a3   :  { %v2128_v59 = vpop.permute.xlu0 %2127 }
0x25a4   :  { %v2130_v60 = vmul.f32 %v2128_v59, %v2120_v58 }
0x25a6   :  { %2132 = vrot.lane.b32.xlu1 %v2130_v60, %s5813_s30 }
0x2618   :  { %v2133_v63 = vpop.permute.xlu1 %2132 }
0x2619   :  { %v2135_v1 = vadd.f32 %v2133_v63, %v2125_v62 }
0x261b   :  { %5441 = vtanh.f32 %v2135_v1  ;;  %v2225_v19 = vrot.slane %v2135_v1, 6 }
0x2625   :  { %v5442_v2 = vpop.eup %5441 }
0x2626   :  { %2138 = vrot.lane.b32.xlu0 %v5442_v2, %s5810_s11  ;;  %v2570_v2 = vld [vmem:[%s6779_s12] sm:$0xff] }
0x2698   :  { %v2139_v53 = vpop.permute.xlu0 %2138 }
0x2699   :  { %v2141_v3 = vmul.f32 %v2139_v53, %v2120_v58  ;;  %v2571_v53 = vld [vmem:[%s6779_s12 + $0x8] sm:$0xff] }
0x269b   :  { %v2143_v4 = vrot.slane %v2141_v3, 6  ;;  %v6345_v5 = vsel %vm524_vm10, %v2565_v44, %v2141_v3  ;;  %v5239_v3 = vpack.c.bf16 %v2571_v53, %v2570_v2 }
0x269d   :  { %2144 = vrot.lane.b32.xlu1 %v2143_v4, %s5813_s30 }
0x270f   :  { %v2145_v6 = vpop.permute.xlu1 %2144 }
0x2710   :  { %4888 = vmatmul.mubr.msk.f32.vlgmr.msra.gmra.mrb[20].mxu0 %vm359_vm5, %v2145_v6  ;;  %v2572_v6 = vld [vmem:[%s6779_s12 + $0x10] sm:$0xff] }
0x2711   :  { %5229 = vmatpush3.bf16.msra.mxu0 %v6133_v22  ;;  %4909 = vmatprep.mubr.msk.f32.mxu0 %vm5808_vm0, %v5807_v0 }
0x2712   :  { %5230 = vmatprep.subr.bf16.mxu0 %v5812_v23 }
0x2715   :  { %5232 = vmatpush3.bf16.msra.mxu0 %v6140_v15 }
0x2716   :  { %5240 = vmatprep.subr.bf16.mxu0 %v5239_v3 }
0x27e3   :  { %v2214_v8 = vpop.f32.mrb[20].mxu0 }
0x27e4   :  { %v2218_v9 = vadd.f32 %v2214_v8, %v6178_v51  ;;  %v4889_v10 = vpop.f32.mrb[21].mxu0  ;;  %v2573_v8 = vld [vmem:[%s6779_s12 + $0x18] sm:$0xff] }
0x27e6   :  { %5443 = vtanh.f32 %v2218_v9  ;;  %v2219_v54 = vmul.f32 0.5, %v2218_v9  ;;  %v5243_v9 = vpack.c.bf16 %v2573_v8, %v2572_v6 }
0x27e8   :  { %5445 = vtanh.f32 %v2219_v54 }
0x27f0   :  { %v5444_v11 = vpop.eup %5443 }
0x27f1   :  { %2229 = vrot.lane.b32.xlu0 %v5444_v11, %s5810_s11 }
0x27f2   :  { %v5446_v12 = vpop.eup %5445 }
0x27f3   :  { %v2221_v13 = vadd.f32 1.0, %v5446_v12 }
0x27f5   :  { %v2222_v16 = vmul.f32 0.5, %v2221_v13 }
0x27f7   :  { %v2227_v20 = vmul.f32 %v2225_v19, %v2222_v16  ;;  %v2576_v19 = vld [vmem:[%s6780_s13 + $0x10] sm:$0xff] }
0x2863   :  { %v2230_v17 = vpop.permute.xlu0 %2229 }
0x2864   :  { %v2232_v18 = vmul.f32 %v2230_v17, %v2222_v16  ;;  %v2575_v17 = vld [vmem:[%s6780_s13 + $0x8] sm:$0xff] }
0x2866   :  { %2234 = vrot.lane.b32.xlu1 %v2232_v18, %s5813_s30 }
0x28d8   :  { %v2235_v21 = vpop.permute.xlu1 %2234 }
0x28d9   :  { %v2237_v24 = vadd.f32 %v2235_v21, %v2227_v20  ;;  %v2577_v20 = vld [vmem:[%s6780_s13 + $0x18] sm:$0xff] }
0x28db   :  { %5447 = vtanh.f32 %v2237_v24 }
0x28e5   :  { %v5448_v25 = vpop.eup %5447 }
0x28e6   :  { %2240 = vrot.lane.b32.xlu0 %v5448_v25, %s5810_s11 }
0x2958   :  { %v2241_v26 = vpop.permute.xlu0 %2240 }
0x2959   :  { %v6358_v27 = vmul.f32 %v2241_v26, %v2222_v16  ;;  %v2574_v16 = vld [vmem:[%s6780_s13] sm:$0xff] }
0x295a   :  { %v6412_v18 = vpack.c.bf16 %v2575_v17, %v2574_v16 }
0x295b   :  { %2245 = vrot.lane.b32.xlu1 %v6358_v27, %s5813_s30 }
0x29cd   :  { %v2246_v28 = vpop.permute.xlu1 %2245 }
0x29ce   :  { %4899 = vmatmul.mubr.msk.f32.vlgmr.msra.gmra.mrb[14].mxu1 %vm359_vm5, %v2246_v28 }
0x29cf   :  { %5235 = vmatpush3.bf16.msra.mxu1 %v6133_v22  ;;  %4920 = vmatprep.mubr.msk.f32.mxu1 %vm5808_vm0, %v5807_v0 }
0x29d0   :  { %5236 = vmatprep.subr.bf16.mxu1 %v5812_v23 }
0x29d3   :  { %5238 = vmatpush3.bf16.msra.mxu1 %v6140_v15  ;;  %v2329_v15 = vrot.slane %v2237_v24, 6 }
0x29d4   :  { %5247 = vmatprep.subr.bf16.mxu1 %v5812_v23 }
0x2aa1   :  { %v2315_v29 = vpop.f32.mrb[14].mxu1 }
0x2aa2   :  { %v2320_v30 = vrot.slane %v2315_v29, 6  ;;  %v4900_v7 = vpop.f32.mrb[15].mxu1  ;;  %v6445_v29 = vld [vmem:[%s6781_s14] ss:$0 sm:$0xff] }
0x2aa4   :  { %v2322_v31 = vadd.f32 %v2320_v30, %v6178_v51 }
0x2aa6   :  { %5449 = vtanh.f32 %v2322_v31  ;;  %v2323_v33 = vmul.f32 0.5, %v2322_v31 }
0x2aa8   :  { %5451 = vtanh.f32 %v2323_v33 }
0x2ab0   :  { %v5450_v32 = vpop.eup %5449 }
0x2ab1   :  { %2333 = vrot.lane.b32.xlu0 %v5450_v32, %s5810_s11 }
0x2ab2   :  { %v5452_v22 = vpop.eup %5451 }
0x2ab3   :  { %v2325_v34 = vadd.f32 1.0, %v5452_v22 }
0x2ab5   :  { %v2326_v35 = vmul.f32 0.5, %v2325_v34 }
0x2ab7   :  { %v2331_v48 = vmul.f32 %v2329_v15, %v2326_v35 }
0x2b23   :  { %v2334_v36 = vpop.permute.xlu0 %2333 }
0x2b24   :  { %v2336_v37 = vmul.f32 %v2334_v36, %v2326_v35 }
0x2b26   :  { %2338 = vrot.lane.b32.xlu1 %v2336_v37, %s5813_s30 }
0x2b98   :  { %v2339_v38 = vpop.permute.xlu1 %2338 }
0x2b99   :  { %v2341_v39 = vadd.f32 %v2339_v38, %v2331_v48 }
0x2b9b   :  { %5453 = vtanh.f32 %v2341_v39  ;;  %v2434_v61 = vrot.slane %v2341_v39, 6 }
0x2ba5   :  { %v5454_v41 = vpop.eup %5453 }
0x2ba6   :  { %2344 = vrot.lane.b32.xlu0 %v5454_v41, %s5810_s11 }
0x2c18   :  { %v2345_v42 = vpop.permute.xlu0 %2344 }
0x2c19   :  { %v2347_v43 = vmul.f32 %v2345_v42, %v2326_v35 }
0x2c1b   :  { %v2349_v44 = vrot.slane %v2347_v43, 2  ;;  %v2567_v54 = vsel %vm310_vm3, %v6358_v27, %v2347_v43  ;;  %vm2787_vm3 = vcmask 254976  }
0x2c1d   :  { %2350 = vrot.lane.b32.xlu1 %v2349_v44, %s5813_s30 }
0x2c8f   :  { %v2351_v45 = vpop.permute.xlu1 %2350 }
0x2c90   :  { %4910 = vmatmul.mubr.msk.f32.vlgmr.msra.gmra.mrb[22].mxu0 %vm359_vm5, %v2351_v45 }
0x2c91   :  { %5242 = vmatpush3.bf16.msra.mxu0 %v5239_v3 }
0x2c92   :  { %5244 = vmatprep.subr.bf16.mxu0 %v5243_v9 }
0x2c95   :  { %5246 = vmatpush3.bf16.msra.mxu0 %v5243_v9 }
0x2c96   :  { %5253 = vmatprep.subr.bf16.mxu0 %v5812_v23 }
0x2d63   :  { %v2420_v46 = vpop.f32.mrb[22].mxu0 }
0x2d64   :  { %v2425_v47 = vrot.slane %v2420_v46, 4  ;;  %v4911_v49 = vpop.f32.mrb[23].mxu0 }
0x2d66   :  { %v2427_v50 = vadd.f32 %v2425_v47, %v6178_v51 }
0x2d68   :  { %5455 = vtanh.f32 %v2427_v50  ;;  %v2428_v55 = vmul.f32 0.5, %v2427_v50 }
0x2d6a   :  { %5457 = vtanh.f32 %v2428_v55 }
0x2d72   :  { %v5456_v52 = vpop.eup %5455 }
0x2d73   :  { %2438 = vrot.lane.b32.xlu0 %v5456_v52, %s5810_s11 }
0x2d74   :  { %v5458_v56 = vpop.eup %5457 }
0x2d75   :  { %v2430_v57 = vadd.f32 1.0, %v5458_v56 }
0x2d77   :  { %v2431_v58 = vmul.f32 0.5, %v2430_v57 }
0x2d79   :  { %v2436_v62 = vmul.f32 %v2434_v61, %v2431_v58 }
0x2de5   :  { %v2439_v59 = vpop.permute.xlu0 %2438 }
0x2de6   :  { %v2441_v60 = vmul.f32 %v2439_v59, %v2431_v58 }
0x2de8   :  { %2443 = vrot.lane.b32.xlu1 %v2441_v60, %s5813_s30 }
0x2e5a   :  { %v2444_v63 = vpop.permute.xlu1 %2443 }
0x2e5b   :  { %v6378_v1 = vadd.f32 %v2444_v63, %v2436_v62 }
0x2e5d   :  { %5459 = vtanh.f32 %v6378_v1  ;;  %v2539_v46 = vrot.slane %v6378_v1, 6 }
0x2e67   :  { %v5460_v4 = vpop.eup %5459 }
0x2e68   :  { %2449 = vrot.lane.b32.xlu0 %v5460_v4, %s5810_s11 }
0x2e6c   :  { %2589 = vrot.lane.b32.xlu0 %v6231_v14, %s5813_s30 }
0x2eda   :  { %v2450_v10 = vpop.permute.xlu0 %2449 }
0x2edb   :  { %v2452_v11 = vmul.f32 %v2450_v10, %v2431_v58 }
0x2edd   :  { %v2454_v12 = vrot.slane %v2452_v11, 4  ;;  %v6400_v14 = vsel %vm518_vm8, %v2567_v54, %v2452_v11 }
0x2ede   :  { %v2590_v13 = vpop.permute.xlu0 %2589 }
0x2edf   :  { %2455 = vrot.lane.b32.xlu1 %v2454_v12, %s5813_s30  ;;  %4931 = vmatprep.mubr.msk.f32.mxu0 %vm359_vm5, %v2590_v13 }
0x2ee3   :  { %2591 = vrot.lane.b32.xlu1 %v6288_v40, %s5813_s30  ;;  %v6422_v40 = vpack.c.bf16 %v2577_v20, %v2576_v19 }
0x2f51   :  { %v2456_v21 = vpop.permute.xlu1 %2455 }
0x2f52   :  { %4921 = vmatmul.mubr.msk.f32.vlgmr.msra.gmra.mrb[16].mxu1 %vm359_vm5, %v2456_v21 }
0x2f53   :  { %5249 = vmatpush3.bf16.msra.mxu1 %v6412_v18  ;;  %4945 = vmatprep.mubr.msk.f32.mxu1 %vm5808_vm0, %v5807_v0 }
0x2f54   :  { %5250 = vmatprep.subr.bf16.mxu1 %v5812_v23 }
0x2f55   :  { %v2592_v24 = vpop.permute.xlu1 %2591 }
0x2f56   :  { %4932 = vmatmul.mubr.msk.f32.vlgmr.msra.gmra.mrb[24].mxu0 %vm359_vm5, %v2592_v24 }
0x2f57   :  { %5252 = vmatpush3.bf16.msra.mxu1 %v6422_v40  ;;  %5255 = vmatpush3.bf16.msra.mxu0 %v6412_v18 }
0x2f58   :  { %5256 = vmatprep.subr.bf16.mxu0 %v5812_v23  ;;  %5259 = vmatprep.subr.bf16.mxu1 %v5812_v23 }
0x2f5a   :  { %4946 = vmatmul.mubr.f32.vlgmr.msra.gmra.mrb[18].mxu1 %v5807_v0 }
0x2f5b   :  { %5258 = vmatpush3.bf16.msra.mxu0 %v6422_v40  ;;  %5261 = vmatpush3.bf16.msra.mxu1 %v6412_v18 }
0x2f5c   :  { %5262 = vmatprep.subr.bf16.mxu1 %v5812_v23  ;;  %4967 = vmatprep.mubr.msk.f32.mxu1 %vm5808_vm0, %v5807_v0 }
0x2f5d   :  { %5265 = vmatprep.subr.bf16.mxu0 %v5812_v23 }
0x2f5f   :  { %5264 = vmatpush3.bf16.msra.mxu1 %v6422_v40 }
0x2f60   :  { %5271 = vmatprep.subr.bf16.mxu1 %v5812_v23 }
0x3025   :  { %v2525_v25 = vpop.f32.mrb[16].mxu1 }
0x3026   :  { %v2530_v26 = vrot.slane %v2525_v25, 2  ;;  %v4922_v27 = vpop.f32.mrb[17].mxu1 }
0x3028   :  { %v2532_v28 = vadd.f32 %v2530_v26, %v6178_v51 }
0x3029   :  { %v6447_v30 = vpop.f32.mrb[24].mxu0 }
0x302a   :  { %5461 = vtanh.f32 %v2532_v28  ;;  %v2671_v7 = vpop.f32.mrb[25].mxu0  ;;  %v2533_v35 = vmul.f32 0.5, %v2532_v28 }
0x302b   :  { %v6450_v31 = vadd.f32 %v6445_v29, %v2671_v7 }
0x302d   :  { %v2756_v32 = vpop.f32.mrb[18].mxu1 }
0x302e   :  { %v2760_v33 = vadd.f32 %v2756_v32, %v6450_v31  ;;  %v4947_v22 = vpop.f32.mrb[19].mxu1 }
0x3030   :  { %5463 = vtanh.f32 %v2760_v33  ;;  %v2761_v36 = vmul.f32 0.5, %v2760_v33 }
0x3031   :  { %5465 = vtanh.f32 %v2533_v35 }
0x3032   :  { %5467 = vtanh.f32 %v2761_v36 }
0x3034   :  { %v5462_v34 = vpop.eup %5461 }
0x3035   :  { %2543 = vrot.lane.b32.xlu0 %v5462_v34, %s5810_s11 }
0x303a   :  { %v5464_v51 = vpop.eup %5463 }
0x303b   :  { %2768 = vrot.lane.b32.xlu1 %v5464_v51, %s5810_s11  ;;  %v5466_v37 = vpop.eup %5465 }
0x303c   :  { %v2535_v15 = vadd.f32 1.0, %v5466_v37  ;;  %v5468_v48 = vpop.eup %5467 }
0x303d   :  { %v2763_v42 = vadd.f32 1.0, %v5468_v48 }
0x303e   :  { %v2536_v38 = vmul.f32 0.5, %v2535_v15 }
0x303f   :  { %v2764_v43 = vmul.f32 0.5, %v2763_v42 }
0x3040   :  { %v2541_v47 = vmul.f32 %v2539_v46, %v2536_v38 }
0x3041   :  { %v2766_v52 = vmul.f32 0.0, %v2764_v43 }
0x30a7   :  { %v2544_v39 = vpop.permute.xlu0 %2543 }
0x30a8   :  { %v2546_v41 = vmul.f32 %v2544_v39, %v2536_v38 }
0x30aa   :  { %2548 = vrot.lane.b32.xlu0 %v2546_v41, %s5813_s30 }
0x30ad   :  { %v2769_v44 = vpop.permute.xlu1 %2768 }
0x30ae   :  { %v2771_v45 = vmul.f32 %v2769_v44, %v2764_v43 }
0x30b0   :  { %2773 = vrot.lane.b32.xlu1 %v2771_v45, %s5813_s30 }
0x311c   :  { %v2549_v49 = vpop.permute.xlu0 %2548 }
0x311d   :  { %v2551_v50 = vadd.f32 %v2549_v49, %v2541_v47 }
0x311f   :  { %5469 = vtanh.f32 %v2551_v50 }
0x3122   :  { %v2774_v55 = vpop.permute.xlu1 %2773 }
0x3123   :  { %v2776_v56 = vadd.f32 %v2774_v55, %v2766_v52 }
0x3125   :  { %5471 = vtanh.f32 %v2776_v56  ;;  %v2871_v17 = vrot.slane %v2776_v56, 6 }
0x3129   :  { %v5470_v57 = vpop.eup %5469 }
0x312a   :  { %2554 = vrot.lane.b32.xlu0 %v5470_v57, %s5810_s11 }
0x312e   :  { %2593 = vrot.lane.b32.xlu0 %v6345_v5, %s5813_s30 }
0x312f   :  { %v5472_v58 = vpop.eup %5471 }
0x3130   :  { %2779 = vrot.lane.b32.xlu1 %v5472_v58, %s5810_s11 }
0x319c   :  { %v2555_v59 = vpop.permute.xlu0 %2554 }
0x319d   :  { %v2557_v60 = vmul.f32 %v2555_v59, %v2536_v38 }
0x319f   :  { %v2569_v61 = vsel %vm524_vm10, %v6400_v14, %v2557_v60 }
0x31a0   :  { %v2594_v62 = vpop.permute.xlu0 %2593  ;;  %2595 = vrot.lane.b32.xlu1 %v2569_v61, %s5813_s30 }
0x31a1   :  { %4934 = vmatprep.mubr.msk.f32.mxu0 %vm359_vm5, %v2594_v62 }
0x31a2   :  { %v2780_v63 = vpop.permute.xlu1 %2779 }
0x31a3   :  { %v2782_v1 = vmul.f32 %v2780_v63, %v2764_v43 }
0x31a5   :  { %2784 = vrot.lane.b32.xlu0 %v2782_v1, %s5813_s30 }
0x3212   :  { %v2596_v2 = vpop.permute.xlu1 %2595 }
0x3213   :  { %4935 = vmatmul.mubr.msk.f32.gmra.mrb[26].mxu0 %vm359_vm5, %v2596_v2 }
0x3214   :  { %4956 = vmatprep.mubr.msk.f32.mxu0 %vm5808_vm0, %v5807_v0 }
0x3217   :  { %v2785_v5 = vpop.permute.xlu0 %2784 }
0x3218   :  { %2788 = vst.msk [vmem:[%s6782_s15] sm:$0x3] %vm2787_vm3, %v2785_v5  ;;  %4957 = vmatmul.mubr.msk.f32.vlgmr.msra.gmra.mrb[28].mxu0 %vm359_vm5, %v2785_v5 }
0x3219   :  { %5267 = vmatpush3.bf16.msra.mxu0 %v6412_v18  ;;  %4978 = vmatprep.mubr.msk.f32.mxu0 %vm5808_vm0, %v5807_v0 }
0x321a   :  { %5268 = vmatprep.subr.bf16.mxu0 %v5812_v23 }
0x321d   :  { %5270 = vmatpush3.bf16.msra.mxu0 %v6422_v40 }
0x321e   :  { %5277 = vmatprep.subr.bf16.mxu0 %v5812_v23 }
0x32e6   :  { %v6481_v53 = vpop.f32.mrb[26].mxu0 }
0x32e7   :  { %v6483_v3 = vpop.f32.mrb[27].mxu0 }
0x32eb   :  { %v2857_v4 = vpop.f32.mrb[28].mxu0 }
0x32ec   :  { %v2862_v6 = vrot.slane %v2857_v4, 6  ;;  %v4958_v8 = vpop.f32.mrb[29].mxu0 }
0x32ee   :  { %v2864_v9 = vadd.f32 %v2862_v6, %v6450_v31 }
0x32f0   :  { %5473 = vtanh.f32 %v2864_v9  ;;  %v2865_v11 = vmul.f32 0.5, %v2864_v9 }
0x32f2   :  { %5475 = vtanh.f32 %v2865_v11 }
0x32fa   :  { %v5474_v10 = vpop.eup %5473 }
0x32fb   :  { %2875 = vrot.lane.b32.xlu1 %v5474_v10, %s5810_s11  ;;  %v6532_v10 = vadd.f32 %v6447_v30, %v6445_v29 }
0x32fc   :  { %v5476_v54 = vpop.eup %5475 }
0x32fd   :  { %v2867_v12 = vadd.f32 1.0, %v5476_v54 }
0x32ff   :  { %v2868_v14 = vmul.f32 0.5, %v2867_v12 }
0x3301   :  { %v2873_v19 = vmul.f32 %v2871_v17, %v2868_v14 }
0x336d   :  { %v2876_v13 = vpop.permute.xlu1 %2875 }
0x336e   :  { %v2878_v16 = vmul.f32 %v2876_v13, %v2868_v14 }
0x3370   :  { %2880 = vrot.lane.b32.xlu0 %v2878_v16, %s5813_s30 }
0x33e2   :  { %v2881_v20 = vpop.permute.xlu0 %2880 }
0x33e3   :  { %v2883_v21 = vadd.f32 %v2881_v20, %v2873_v19 }
0x33e5   :  { %5477 = vtanh.f32 %v2883_v21  ;;  %v2982_v38 = vrot.slane %v2883_v21, 6 }
0x33ef   :  { %v5478_v24 = vpop.eup %5477 }
0x33f0   :  { %2886 = vrot.lane.b32.xlu1 %v5478_v24, %s5810_s11 }
0x3462   :  { %v2887_v25 = vpop.permute.xlu1 %2886 }
0x3463   :  { %v6489_v26 = vmul.f32 %v2887_v25, %v2868_v14 }
0x3465   :  { %v2897_v27 = vrot.slane %v6489_v26, 2 }
0x3467   :  { %2898 = vrot.lane.b32.xlu0 %v2897_v27, %s5813_s30 }
0x34d9   :  { %v2899_v28 = vpop.permute.xlu0 %2898 }
0x34da   :  { %4968 = vmatmul.mubr.msk.f32.vlgmr.msra.gmra.mrb[20].mxu1 %vm359_vm5, %v2899_v28 }
0x34db   :  { %5273 = vmatpush3.bf16.msra.mxu1 %v6412_v18  ;;  %4989 = vmatprep.mubr.msk.f32.mxu1 %vm5808_vm0, %v5807_v0 }
0x34dc   :  { %5274 = vmatprep.subr.bf16.mxu1 %v5812_v23 }
0x34df   :  { %5276 = vmatpush3.bf16.msra.mxu1 %v6422_v40 }
0x34e0   :  { %5283 = vmatprep.subr.bf16.mxu1 %v5812_v23 }
0x35ad   :  { %v2968_v7 = vpop.f32.mrb[20].mxu1 }
0x35ae   :  { %v2973_v32 = vrot.slane %v2968_v7, 4  ;;  %v4969_v33 = vpop.f32.mrb[21].mxu1 }
0x35b0   :  { %v2975_v22 = vadd.f32 %v2973_v32, %v6450_v31 }
0x35b2   :  { %5479 = vtanh.f32 %v2975_v22  ;;  %v2976_v51 = vmul.f32 0.5, %v2975_v22 }
0x35b4   :  { %5481 = vtanh.f32 %v2976_v51 }
0x35bc   :  { %v5480_v34 = vpop.eup %5479 }
0x35bd   :  { %2986 = vrot.lane.b32.xlu1 %v5480_v34, %s5810_s11 }
0x35be   :  { %v5482_v35 = vpop.eup %5481 }
0x35bf   :  { %v2978_v36 = vadd.f32 1.0, %v5482_v35 }
0x35c1   :  { %v2979_v37 = vmul.f32 0.5, %v2978_v36 }
0x35c3   :  { %v2984_v39 = vmul.f32 %v2982_v38, %v2979_v37 }
0x362f   :  { %v2987_v15 = vpop.permute.xlu1 %2986 }
0x3630   :  { %v2989_v48 = vmul.f32 %v2987_v15, %v2979_v37 }
0x3632   :  { %2991 = vrot.lane.b32.xlu0 %v2989_v48, %s5813_s30 }
0x36a4   :  { %v2992_v41 = vpop.permute.xlu0 %2991 }
0x36a5   :  { %v2994_v42 = vadd.f32 %v2992_v41, %v2984_v39 }
0x36a7   :  { %5483 = vtanh.f32 %v2994_v42  ;;  %v3093_v63 = vrot.slane %v2994_v42, 6 }
0x36b1   :  { %v5484_v43 = vpop.eup %5483 }
0x36b2   :  { %2997 = vrot.lane.b32.xlu1 %v5484_v43, %s5810_s11 }
0x3724   :  { %v2998_v44 = vpop.permute.xlu1 %2997 }
0x3725   :  { %v6504_v45 = vmul.f32 %v2998_v44, %v2979_v37 }
0x3727   :  { %v3008_v46 = vrot.slane %v6504_v45, 4 }
0x3729   :  { %3009 = vrot.lane.b32.xlu0 %v3008_v46, %s5813_s30 }
0x379b   :  { %v3010_v47 = vpop.permute.xlu0 %3009 }
0x379c   :  { %4979 = vmatmul.mubr.msk.f32.vlgmr.msra.gmra.mrb[30].mxu0 %vm359_vm5, %v3010_v47 }
0x379d   :  { %5279 = vmatpush3.bf16.msra.mxu0 %v6412_v18  ;;  %5000 = vmatprep.mubr.msk.f32.mxu0 %vm5808_vm0, %v5807_v0 }
0x379e   :  { %5280 = vmatprep.subr.bf16.mxu0 %v5812_v23 }
0x37a1   :  { %5282 = vmatpush3.bf16.msra.mxu0 %v6422_v40 }
0x37a2   :  { %5289 = vmatprep.subr.bf16.mxu0 %v5812_v23 }
0x386f   :  { %v3079_v49 = vpop.f32.mrb[30].mxu0 }
0x3870   :  { %v3084_v50 = vrot.slane %v3079_v49, 2  ;;  %v4980_v52 = vpop.f32.mrb[31].mxu0 }
0x3872   :  { %v3086_v55 = vadd.f32 %v3084_v50, %v6450_v31 }
0x3874   :  { %5485 = vtanh.f32 %v3086_v55  ;;  %v3087_v57 = vmul.f32 0.5, %v3086_v55 }
0x3876   :  { %5487 = vtanh.f32 %v3087_v57 }
0x387e   :  { %v5486_v56 = vpop.eup %5485 }
0x387f   :  { %3097 = vrot.lane.b32.xlu1 %v5486_v56, %s5810_s11 }
0x3880   :  { %v5488_v58 = vpop.eup %5487 }
0x3881   :  { %v3089_v59 = vadd.f32 1.0, %v5488_v58 }
0x3883   :  { %v3090_v60 = vmul.f32 0.5, %v3089_v59 }
0x3885   :  { %v3095_v1 = vmul.f32 %v3093_v63, %v3090_v60 }
0x38f1   :  { %v3098_v61 = vpop.permute.xlu1 %3097 }
0x38f2   :  { %v3100_v62 = vmul.f32 %v3098_v61, %v3090_v60 }
0x38f4   :  { %3102 = vrot.lane.b32.xlu0 %v3100_v62, %s5813_s30 }
0x3966   :  { %v3103_v2 = vpop.permute.xlu0 %3102 }
0x3967   :  { %v3105_v5 = vadd.f32 %v3103_v2, %v3095_v1 }
0x3969   :  { %5489 = vtanh.f32 %v3105_v5  ;;  %v3201_v24 = vrot.slane %v3105_v5, 6 }
0x3973   :  { %v5490_v4 = vpop.eup %5489 }
0x3974   :  { %3108 = vrot.lane.b32.xlu1 %v5490_v4, %s5810_s11 }
0x39e6   :  { %v3109_v31 = vpop.permute.xlu1 %3108 }
0x39e7   :  { %v6519_v6 = vmul.f32 %v3109_v31, %v3090_v60 }
0x39e9   :  { %v3119_v8 = vrot.slane %v6519_v6, 6 }
0x39eb   :  { %3120 = vrot.lane.b32.xlu0 %v3119_v8, %s5813_s30 }
0x3a5d   :  { %v3121_v9 = vpop.permute.xlu0 %3120 }
0x3a5e   :  { %4990 = vmatmul.mubr.msk.f32.vlgmr.msra.gmra.mrb[22].mxu1 %vm359_vm5, %v3121_v9 }
0x3a5f   :  { %5285 = vmatpush3.bf16.msra.mxu1 %v6412_v18  ;;  %5011 = vmatprep.mubr.msk.f32.mxu1 %vm5808_vm0, %v5807_v0 }
0x3a60   :  { %5286 = vmatprep.subr.bf16.mxu1 %v5812_v23 }
0x3a63   :  { %5288 = vmatpush3.bf16.msra.mxu1 %v6422_v40 }
0x3a64   :  { %5295 = vmatprep.subr.bf16.mxu1 %v5812_v23 }
0x3b31   :  { %v3190_v11 = vpop.f32.mrb[22].mxu1 }
0x3b32   :  { %v3194_v54 = vadd.f32 %v3190_v11, %v6532_v10  ;;  %v4991_v12 = vpop.f32.mrb[23].mxu1 }
0x3b34   :  { %5491 = vtanh.f32 %v3194_v54  ;;  %v3195_v13 = vmul.f32 0.5, %v3194_v54 }
0x3b36   :  { %5493 = vtanh.f32 %v3195_v13 }
0x3b3e   :  { %v5492_v14 = vpop.eup %5491 }
0x3b3f   :  { %3205 = vrot.lane.b32.xlu1 %v5492_v14, %s5810_s11 }
0x3b40   :  { %v5494_v16 = vpop.eup %5493 }
0x3b41   :  { %v3197_v17 = vadd.f32 1.0, %v5494_v16 }
0x3b43   :  { %v3198_v19 = vmul.f32 0.5, %v3197_v17 }
0x3b45   :  { %v3203_v30 = vmul.f32 %v3201_v24, %v3198_v19 }
0x3bb1   :  { %v3206_v20 = vpop.permute.xlu1 %3205 }
0x3bb2   :  { %v3208_v21 = vmul.f32 %v3206_v20, %v3198_v19 }
0x3bb4   :  { %3210 = vrot.lane.b32.xlu0 %v3208_v21, %s5813_s30 }
0x3c26   :  { %v3211_v25 = vpop.permute.xlu0 %3210 }
0x3c27   :  { %v3213_v27 = vadd.f32 %v3211_v25, %v3203_v30 }
0x3c29   :  { %5495 = vtanh.f32 %v3213_v27  ;;  %v3308_v42 = vrot.slane %v3213_v27, 6 }
0x3c33   :  { %v5496_v28 = vpop.eup %5495 }
0x3c34   :  { %3216 = vrot.lane.b32.xlu1 %v5496_v28, %s5810_s11 }
0x3ca6   :  { %v3217_v7 = vpop.permute.xlu1 %3216 }
0x3ca7   :  { %v3219_v32 = vmul.f32 %v3217_v7, %v3198_v19 }
0x3ca9   :  { %3221 = vrot.lane.b32.xlu0 %v3219_v32, %s5813_s30 }
0x3d1b   :  { %v3222_v33 = vpop.permute.xlu0 %3221 }
0x3d1c   :  { %4473 = vst.msk [vmem:[%s6782_s15 + $0x8] sm:$0x3] %vm2787_vm3, %v3222_v33  ;;  %5001 = vmatmul.mubr.msk.f32.vlgmr.msra.gmra.mrb[32].mxu0 %vm359_vm5, %v3222_v33 }
0x3d1d   :  { %5291 = vmatpush3.bf16.msra.mxu0 %v6412_v18  ;;  %5022 = vmatprep.mubr.msk.f32.mxu0 %vm5808_vm0, %v5807_v0 }
0x3d1e   :  { %5292 = vmatprep.subr.bf16.mxu0 %v5812_v23 }
0x3d21   :  { %5294 = vmatpush3.bf16.msra.mxu0 %v6422_v40 }
0x3d22   :  { %5301 = vmatprep.subr.bf16.mxu0 %v5812_v23 }
0x3def   :  { %v3294_v22 = vpop.f32.mrb[32].mxu0 }
0x3df0   :  { %v3299_v34 = vrot.slane %v3294_v22, 6  ;;  %v5002_v51 = vpop.f32.mrb[33].mxu0 }
0x3df2   :  { %v3301_v35 = vadd.f32 %v3299_v34, %v6532_v10 }
0x3df4   :  { %5497 = vtanh.f32 %v3301_v35  ;;  %v3302_v37 = vmul.f32 0.5, %v3301_v35 }
0x3df6   :  { %5499 = vtanh.f32 %v3302_v37 }
0x3dfe   :  { %v5498_v36 = vpop.eup %5497 }
0x3dff   :  { %3312 = vrot.lane.b32.xlu1 %v5498_v36, %s5810_s11 }
0x3e00   :  { %v5500_v15 = vpop.eup %5499 }
0x3e01   :  { %v3304_v48 = vadd.f32 1.0, %v5500_v15  ;;  %v6597_v15 = vadd.f32 %v6445_v29, %v6483_v3 }
0x3e03   :  { %v3305_v38 = vmul.f32 0.5, %v3304_v48 }
0x3e05   :  { %v3310_v43 = vmul.f32 %v3308_v42, %v3305_v38 }
0x3e71   :  { %v3313_v39 = vpop.permute.xlu1 %3312 }
0x3e72   :  { %v3315_v41 = vmul.f32 %v3313_v39, %v3305_v38 }
0x3e74   :  { %3317 = vrot.lane.b32.xlu0 %v3315_v41, %s5813_s30 }
0x3ee6   :  { %v3318_v44 = vpop.permute.xlu0 %3317 }
0x3ee7   :  { %v3320_v46 = vadd.f32 %v3318_v44, %v3310_v43 }
0x3ee9   :  { %5501 = vtanh.f32 %v3320_v46  ;;  %v3418_v4 = vrot.slane %v3320_v46, 6 }
0x3ef3   :  { %v5502_v47 = vpop.eup %5501 }
0x3ef4   :  { %3323 = vrot.lane.b32.xlu1 %v5502_v47, %s5810_s11 }
0x3f66   :  { %v3324_v49 = vpop.permute.xlu1 %3323 }
0x3f67   :  { %v6554_v50 = vmul.f32 %v3324_v49, %v3305_v38 }
0x3f69   :  { %v3333_v52 = vrot.slane %v6554_v50, 2 }
0x3f6b   :  { %3334 = vrot.lane.b32.xlu0 %v3333_v52, %s5813_s30 }
0x3fdd   :  { %v3335_v55 = vpop.permute.xlu0 %3334 }
0x3fde   :  { %5012 = vmatmul.mubr.msk.f32.vlgmr.msra.gmra.mrb[24].mxu1 %vm359_vm5, %v3335_v55 }
0x3fdf   :  { %5297 = vmatpush3.bf16.msra.mxu1 %v6412_v18  ;;  %5033 = vmatprep.mubr.msk.f32.mxu1 %vm5808_vm0, %v5807_v0 }
0x3fe0   :  { %5298 = vmatprep.subr.bf16.mxu1 %v5812_v23 }
0x3fe3   :  { %5300 = vmatpush3.bf16.msra.mxu1 %v6422_v40 }
0x3fe4   :  { %5307 = vmatprep.subr.bf16.mxu1 %v5812_v23 }
0x40b1   :  { %v3404_v56 = vpop.f32.mrb[24].mxu1 }
0x40b2   :  { %v3409_v57 = vrot.slane %v3404_v56, 4  ;;  %v5013_v58 = vpop.f32.mrb[25].mxu1 }
0x40b4   :  { %v3411_v59 = vadd.f32 %v3409_v57, %v6532_v10 }
0x40b6   :  { %5503 = vtanh.f32 %v3411_v59  ;;  %v3412_v61 = vmul.f32 0.5, %v3411_v59 }
0x40b8   :  { %5505 = vtanh.f32 %v3412_v61 }
0x40c0   :  { %v5504_v60 = vpop.eup %5503 }
0x40c1   :  { %3422 = vrot.lane.b32.xlu1 %v5504_v60, %s5810_s11 }
0x40c2   :  { %v5506_v62 = vpop.eup %5505 }
0x40c3   :  { %v3414_v63 = vadd.f32 1.0, %v5506_v62 }
0x40c5   :  { %v3415_v1 = vmul.f32 0.5, %v3414_v63 }
0x40c7   :  { %v3420_v31 = vmul.f32 %v3418_v4, %v3415_v1 }
0x4133   :  { %v3423_v2 = vpop.permute.xlu1 %3422 }
0x4134   :  { %v3425_v5 = vmul.f32 %v3423_v2, %v3415_v1 }
0x4136   :  { %3427 = vrot.lane.b32.xlu0 %v3425_v5, %s5813_s30 }
0x41a8   :  { %v3428_v8 = vpop.permute.xlu0 %3427 }
0x41a9   :  { %v3430_v9 = vadd.f32 %v3428_v8, %v3420_v31 }
0x41ab   :  { %5507 = vtanh.f32 %v3430_v9  ;;  %v3528_v32 = vrot.slane %v3430_v9, 6 }
0x41b5   :  { %v5508_v11 = vpop.eup %5507 }
0x41b6   :  { %3433 = vrot.lane.b32.xlu1 %v5508_v11, %s5810_s11 }
0x4228   :  { %v3434_v54 = vpop.permute.xlu1 %3433 }
0x4229   :  { %v6569_v12 = vmul.f32 %v3434_v54, %v3415_v1 }
0x422b   :  { %v3443_v14 = vrot.slane %v6569_v12, 4 }
0x422d   :  { %3444 = vrot.lane.b32.xlu0 %v3443_v14, %s5813_s30 }
0x429f   :  { %v3445_v13 = vpop.permute.xlu0 %3444 }
0x42a0   :  { %5023 = vmatmul.mubr.msk.f32.vlgmr.msra.gmra.mrb[34].mxu0 %vm359_vm5, %v3445_v13 }
0x42a1   :  { %5303 = vmatpush3.bf16.msra.mxu0 %v6412_v18  ;;  %5044 = vmatprep.mubr.msk.f32.mxu0 %vm5808_vm0, %v5807_v0 }
0x42a2   :  { %5304 = vmatprep.subr.bf16.mxu0 %v5812_v23 }
0x42a5   :  { %5306 = vmatpush3.bf16.msra.mxu0 %v6422_v40 }
0x42a6   :  { %5313 = vmatprep.subr.bf16.mxu0 %v5812_v23 }
0x4373   :  { %v3514_v16 = vpop.f32.mrb[34].mxu0 }
0x4374   :  { %v3519_v17 = vrot.slane %v3514_v16, 2  ;;  %v5024_v19 = vpop.f32.mrb[35].mxu0 }
0x4376   :  { %v3521_v20 = vadd.f32 %v3519_v17, %v6532_v10 }
0x4378   :  { %5509 = vtanh.f32 %v3521_v20  ;;  %v3522_v24 = vmul.f32 0.5, %v3521_v20 }
0x437a   :  { %5511 = vtanh.f32 %v3522_v24 }
0x4382   :  { %v5510_v21 = vpop.eup %5509 }
0x4383   :  { %3532 = vrot.lane.b32.xlu1 %v5510_v21, %s5810_s11 }
0x4384   :  { %v5512_v30 = vpop.eup %5511 }
0x4385   :  { %v3524_v25 = vadd.f32 1.0, %v5512_v30 }
0x4387   :  { %v3525_v27 = vmul.f32 0.5, %v3524_v25 }
0x4389   :  { %v3530_v33 = vmul.f32 %v3528_v32, %v3525_v27 }
0x43f5   :  { %v3533_v28 = vpop.permute.xlu1 %3532 }
0x43f6   :  { %v3535_v7 = vmul.f32 %v3533_v28, %v3525_v27 }
0x43f8   :  { %3537 = vrot.lane.b32.xlu0 %v3535_v7, %s5813_s30 }
0x446a   :  { %v3538_v22 = vpop.permute.xlu0 %3537 }
0x446b   :  { %v3540_v34 = vadd.f32 %v3538_v22, %v3530_v33 }
0x446d   :  { %5513 = vtanh.f32 %v3540_v34  ;;  %v3635_v52 = vrot.slane %v3540_v34, 6 }
0x4477   :  { %v5514_v51 = vpop.eup %5513 }
0x4478   :  { %3543 = vrot.lane.b32.xlu1 %v5514_v51, %s5810_s11 }
0x44ea   :  { %v3544_v10 = vpop.permute.xlu1 %3543 }
0x44eb   :  { %v6584_v35 = vmul.f32 %v3544_v10, %v3525_v27 }
0x44ed   :  { %v3553_v36 = vrot.slane %v6584_v35, 6 }
0x44ef   :  { %3554 = vrot.lane.b32.xlu0 %v3553_v36, %s5813_s30 }
0x4561   :  { %v3555_v37 = vpop.permute.xlu0 %3554 }
0x4562   :  { %5034 = vmatmul.mubr.msk.f32.vlgmr.msra.gmra.mrb[26].mxu1 %vm359_vm5, %v3555_v37 }
0x4563   :  { %5309 = vmatpush3.bf16.msra.mxu1 %v6412_v18  ;;  %5055 = vmatprep.mubr.msk.f32.mxu1 %vm5808_vm0, %v5807_v0 }
0x4564   :  { %5310 = vmatprep.subr.bf16.mxu1 %v5812_v23 }
0x4567   :  { %5312 = vmatpush3.bf16.msra.mxu1 %v6422_v40 }
0x4568   :  { %5319 = vmatprep.subr.bf16.mxu1 %v5812_v23 }
0x4635   :  { %v3624_v48 = vpop.f32.mrb[26].mxu1 }
0x4636   :  { %v3628_v38 = vadd.f32 %v3624_v48, %v6597_v15  ;;  %v5035_v39 = vpop.f32.mrb[27].mxu1 }
0x4638   :  { %5515 = vtanh.f32 %v3628_v38  ;;  %v3629_v42 = vmul.f32 0.5, %v3628_v38 }
0x463a   :  { %5517 = vtanh.f32 %v3629_v42 }
0x4642   :  { %v5516_v41 = vpop.eup %5515 }
0x4643   :  { %3639 = vrot.lane.b32.xlu1 %v5516_v41, %s5810_s11 }
0x4644   :  { %v5518_v43 = vpop.eup %5517 }
0x4645   :  { %v3631_v44 = vadd.f32 1.0, %v5518_v43 }
0x4647   :  { %v3632_v46 = vmul.f32 0.5, %v3631_v44 }
0x4649   :  { %v3637_v3 = vmul.f32 %v3635_v52, %v3632_v46 }
0x46b5   :  { %v3640_v47 = vpop.permute.xlu1 %3639 }
0x46b6   :  { %v3642_v49 = vmul.f32 %v3640_v47, %v3632_v46 }
0x46b8   :  { %3644 = vrot.lane.b32.xlu0 %v3642_v49, %s5813_s30 }
0x472a   :  { %v3645_v55 = vpop.permute.xlu0 %3644 }
0x472b   :  { %v3647_v56 = vadd.f32 %v3645_v55, %v3637_v3 }
0x472d   :  { %5519 = vtanh.f32 %v3647_v56  ;;  %v3742_v54 = vrot.slane %v3647_v56, 6 }
0x4737   :  { %v5520_v57 = vpop.eup %5519 }
0x4738   :  { %3650 = vrot.lane.b32.xlu1 %v5520_v57, %s5810_s11 }
0x47aa   :  { %v3651_v58 = vpop.permute.xlu1 %3650 }
0x47ab   :  { %v3653_v59 = vmul.f32 %v3651_v58, %v3632_v46 }
0x47ad   :  { %3655 = vrot.lane.b32.xlu0 %v3653_v59, %s5813_s30 }
0x481f   :  { %v3656_v60 = vpop.permute.xlu0 %3655 }
0x4820   :  { %4481 = vst.msk [vmem:[%s6782_s15 + $0x10] sm:$0x3] %vm2787_vm3, %v3656_v60  ;;  %5045 = vmatmul.mubr.msk.f32.vlgmr.msra.gmra.mrb[36].mxu0 %vm359_vm5, %v3656_v60 }
0x4821   :  { %5315 = vmatpush3.bf16.msra.mxu0 %v6412_v18  ;;  %5066 = vmatprep.mubr.msk.f32.mxu0 %vm5808_vm0, %v5807_v0 }
0x4822   :  { %5316 = vmatprep.subr.bf16.mxu0 %v5812_v23 }
0x4825   :  { %5318 = vmatpush3.bf16.msra.mxu0 %v6422_v40 }
0x4826   :  { %5325 = vmatprep.subr.bf16.mxu0 %v5812_v23 }
0x48f3   :  { %v3728_v61 = vpop.f32.mrb[36].mxu0 }
0x48f4   :  { %v3733_v62 = vrot.slane %v3728_v61, 6  ;;  %v5046_v63 = vpop.f32.mrb[37].mxu0 }
0x48f6   :  { %v3735_v1 = vadd.f32 %v3733_v62, %v6597_v15 }
0x48f8   :  { %5521 = vtanh.f32 %v3735_v1  ;;  %v3736_v5 = vmul.f32 0.5, %v3735_v1 }
0x48fa   :  { %5523 = vtanh.f32 %v3736_v5 }
0x4902   :  { %v5522_v2 = vpop.eup %5521 }
0x4903   :  { %3746 = vrot.lane.b32.xlu1 %v5522_v2, %s5810_s11 }
0x4904   :  { %v5524_v4 = vpop.eup %5523 }
0x4905   :  { %v3738_v31 = vadd.f32 1.0, %v5524_v4 }
0x4907   :  { %v3739_v8 = vmul.f32 0.5, %v3738_v31 }
0x4909   :  { %v3744_v14 = vmul.f32 %v3742_v54, %v3739_v8 }
0x4975   :  { %v3747_v9 = vpop.permute.xlu1 %3746 }
0x4976   :  { %v3749_v11 = vmul.f32 %v3747_v9, %v3739_v8 }
0x4978   :  { %3751 = vrot.lane.b32.xlu0 %v3749_v11, %s5813_s30 }
0x49ea   :  { %v3752_v13 = vpop.permute.xlu0 %3751 }
0x49eb   :  { %v3754_v16 = vadd.f32 %v3752_v13, %v3744_v14 }
0x49ed   :  { %5525 = vtanh.f32 %v3754_v16  ;;  %v3852_v36 = vrot.slane %v3754_v16, 6 }
0x49f7   :  { %v5526_v17 = vpop.eup %5525 }
0x49f8   :  { %3757 = vrot.lane.b32.xlu1 %v5526_v17, %s5810_s11 }
0x4a6a   :  { %v3758_v19 = vpop.permute.xlu1 %3757 }
0x4a6b   :  { %v6619_v20 = vmul.f32 %v3758_v19, %v3739_v8  ;;  %v6661_v8 = vadd.f32 %v6481_v53, %v6445_v29 }
0x4a6d   :  { %v3767_v21 = vrot.slane %v6619_v20, 2 }
0x4a6f   :  { %3768 = vrot.lane.b32.xlu0 %v3767_v21, %s5813_s30 }
0x4ae1   :  { %v3769_v24 = vpop.permute.xlu0 %3768 }
0x4ae2   :  { %5056 = vmatmul.mubr.msk.f32.vlgmr.msra.gmra.mrb[28].mxu1 %vm359_vm5, %v3769_v24 }
0x4ae3   :  { %5321 = vmatpush3.bf16.msra.mxu1 %v6412_v18  ;;  %5077 = vmatprep.mubr.msk.f32.mxu1 %vm5808_vm0, %v5807_v0 }
0x4ae4   :  { %5322 = vmatprep.subr.bf16.mxu1 %v5812_v23 }
0x4ae7   :  { %5324 = vmatpush3.bf16.msra.mxu1 %v6422_v40 }
0x4ae8   :  { %5331 = vmatprep.subr.bf16.mxu1 %v5812_v23 }
0x4bb5   :  { %v3838_v30 = vpop.f32.mrb[28].mxu1 }
0x4bb6   :  { %v3843_v25 = vrot.slane %v3838_v30, 4  ;;  %v5057_v27 = vpop.f32.mrb[29].mxu1 }
0x4bb8   :  { %v3845_v28 = vadd.f32 %v3843_v25, %v6597_v15 }
0x4bba   :  { %5527 = vtanh.f32 %v3845_v28  ;;  %v3846_v32 = vmul.f32 0.5, %v3845_v28 }
0x4bbc   :  { %5529 = vtanh.f32 %v3846_v32 }
0x4bc4   :  { %v5528_v7 = vpop.eup %5527 }
0x4bc5   :  { %3856 = vrot.lane.b32.xlu1 %v5528_v7, %s5810_s11 }
0x4bc6   :  { %v5530_v33 = vpop.eup %5529 }
0x4bc7   :  { %v3848_v22 = vadd.f32 1.0, %v5530_v33 }
0x4bc9   :  { %v3849_v34 = vmul.f32 0.5, %v3848_v22 }
0x4bcb   :  { %v3854_v37 = vmul.f32 %v3852_v36, %v3849_v34 }
0x4c37   :  { %v3857_v51 = vpop.permute.xlu1 %3856 }
0x4c38   :  { %v3859_v10 = vmul.f32 %v3857_v51, %v3849_v34 }
0x4c3a   :  { %3861 = vrot.lane.b32.xlu0 %v3859_v10, %s5813_s30 }
0x4cac   :  { %v3862_v48 = vpop.permute.xlu0 %3861 }
0x4cad   :  { %v3864_v38 = vadd.f32 %v3862_v48, %v3854_v37 }
0x4caf   :  { %5531 = vtanh.f32 %v3864_v38  ;;  %v3962_v61 = vrot.slane %v3864_v38, 6 }
0x4cb9   :  { %v5532_v39 = vpop.eup %5531 }
0x4cba   :  { %3867 = vrot.lane.b32.xlu1 %v5532_v39, %s5810_s11 }
0x4d2c   :  { %v3868_v41 = vpop.permute.xlu1 %3867 }
0x4d2d   :  { %v6634_v42 = vmul.f32 %v3868_v41, %v3849_v34 }
0x4d2f   :  { %v3877_v43 = vrot.slane %v6634_v42, 4 }
0x4d31   :  { %3878 = vrot.lane.b32.xlu0 %v3877_v43, %s5813_s30 }
0x4da3   :  { %v3879_v44 = vpop.permute.xlu0 %3878 }
0x4da4   :  { %5067 = vmatmul.mubr.msk.f32.vlgmr.msra.gmra.mrb[38].mxu0 %vm359_vm5, %v3879_v44 }
0x4da5   :  { %5327 = vmatpush3.bf16.msra.mxu0 %v6412_v18  ;;  %5088 = vmatprep.mubr.msk.f32.mxu0 %vm5808_vm0, %v5807_v0 }
0x4da6   :  { %5328 = vmatprep.subr.bf16.mxu0 %v5812_v23 }
0x4da9   :  { %5330 = vmatpush3.bf16.msra.mxu0 %v6422_v40 }
0x4daa   :  { %5337 = vmatprep.subr.bf16.mxu0 %v5812_v23 }
0x4e77   :  { %v3948_v46 = vpop.f32.mrb[38].mxu0 }
0x4e78   :  { %v3953_v47 = vrot.slane %v3948_v46, 2  ;;  %v5068_v49 = vpop.f32.mrb[39].mxu0 }
0x4e7a   :  { %v3955_v52 = vadd.f32 %v3953_v47, %v6597_v15 }
0x4e7c   :  { %5533 = vtanh.f32 %v3955_v52  ;;  %v3956_v55 = vmul.f32 0.5, %v3955_v52 }
0x4e7e   :  { %5535 = vtanh.f32 %v3956_v55 }
0x4e86   :  { %v5534_v3 = vpop.eup %5533 }
0x4e87   :  { %3966 = vrot.lane.b32.xlu1 %v5534_v3, %s5810_s11 }
0x4e88   :  { %v5536_v56 = vpop.eup %5535 }
0x4e89   :  { %v3958_v57 = vadd.f32 1.0, %v5536_v56 }
0x4e8b   :  { %v3959_v58 = vmul.f32 0.5, %v3958_v57 }
0x4e8d   :  { %v3964_v62 = vmul.f32 %v3962_v61, %v3959_v58 }
0x4ef9   :  { %v3967_v59 = vpop.permute.xlu1 %3966 }
0x4efa   :  { %v3969_v60 = vmul.f32 %v3967_v59, %v3959_v58 }
0x4efc   :  { %3971 = vrot.lane.b32.xlu0 %v3969_v60, %s5813_s30 }
0x4f6e   :  { %v3972_v63 = vpop.permute.xlu0 %3971 }
0x4f6f   :  { %v3974_v1 = vadd.f32 %v3972_v63, %v3964_v62 }
0x4f71   :  { %5537 = vtanh.f32 %v3974_v1  ;;  %v4069_v30 = vrot.slane %v3974_v1, 6 }
0x4f7b   :  { %v5538_v2 = vpop.eup %5537 }
0x4f7c   :  { %3977 = vrot.lane.b32.xlu1 %v5538_v2, %s5810_s11 }
0x4fee   :  { %v3978_v15 = vpop.permute.xlu1 %3977 }
0x4fef   :  { %v6649_v5 = vmul.f32 %v3978_v15, %v3959_v58 }
0x4ff1   :  { %v3987_v4 = vrot.slane %v6649_v5, 6 }
0x4ff3   :  { %3988 = vrot.lane.b32.xlu0 %v3987_v4, %s5813_s30 }
0x5065   :  { %v3989_v31 = vpop.permute.xlu0 %3988 }
0x5066   :  { %5078 = vmatmul.mubr.msk.f32.vlgmr.msra.gmra.mrb[30].mxu1 %vm359_vm5, %v3989_v31 }
0x5067   :  { %5333 = vmatpush3.bf16.msra.mxu1 %v6412_v18  ;;  %5099 = vmatprep.mubr.msk.f32.mxu1 %vm5808_vm0, %v5807_v0 }
0x5068   :  { %5334 = vmatprep.subr.bf16.mxu1 %v5812_v23 }
0x506b   :  { %5336 = vmatpush3.bf16.msra.mxu1 %v6422_v40 }
0x5139   :  { %v4058_v9 = vpop.f32.mrb[30].mxu1 }
0x513a   :  { %v4062_v11 = vadd.f32 %v4058_v9, %v6661_v8  ;;  %v5079_v54 = vpop.f32.mrb[31].mxu1 }
0x513c   :  { %5539 = vtanh.f32 %v4062_v11  ;;  %v4063_v13 = vmul.f32 0.5, %v4062_v11 }
0x513e   :  { %5541 = vtanh.f32 %v4063_v13 }
0x5146   :  { %v5540_v14 = vpop.eup %5539 }
0x5147   :  { %4073 = vrot.lane.b32.xlu1 %v5540_v14, %s5810_s11 }
0x5148   :  { %v5542_v16 = vpop.eup %5541 }
0x5149   :  { %v4065_v17 = vadd.f32 1.0, %v5542_v16 }
0x514b   :  { %v4066_v19 = vmul.f32 0.5, %v4065_v17 }
0x514d   :  { %v4071_v29 = vmul.f32 %v4069_v30, %v4066_v19 }
0x51b9   :  { %v4074_v21 = vpop.permute.xlu1 %4073 }
0x51ba   :  { %v4076_v24 = vmul.f32 %v4074_v21, %v4066_v19 }
0x51bc   :  { %4078 = vrot.lane.b32.xlu0 %v4076_v24, %s5813_s30 }
0x522e   :  { %v4079_v53 = vpop.permute.xlu0 %4078 }
0x522f   :  { %v4081_v25 = vadd.f32 %v4079_v53, %v4071_v29 }
0x5231   :  { %5543 = vtanh.f32 %v4081_v25 }
0x523b   :  { %v5544_v27 = vpop.eup %5543 }
0x523c   :  { %4084 = vrot.lane.b32.xlu1 %v5544_v27, %s5810_s11 }
0x52ae   :  { %v4085_v28 = vpop.permute.xlu1 %4084 }
0x52af   :  { %v4087_v7 = vmul.f32 %v4085_v28, %v4066_v19 }
0x52b1   :  { %4089 = vrot.lane.b32.xlu0 %v4087_v7, %s5813_s30 }
0x5323   :  { %v4090_v32 = vpop.permute.xlu0 %4089 }
0x5324   :  { %4489 = vst.msk [vmem:[%s6782_s15 + $0x18] sm:$0x3] %vm2787_vm3, %v4090_v32  ;;  %5089 = vmatmul.mubr.msk.f32.vlgmr.msra.gmra.mrb[40].mxu0 %vm359_vm5, %v4090_v32 }
0x5325   :  { %5339 = vmatpush3.bf16.msra.mxu0 %v6412_v18  ;;  %5110 = vmatprep.mubr.msk.f32.mxu0 %vm5808_vm0, %v5807_v0  ;;  %vm2895_vm0 = vcmask 257026  }
0x5326   :  { %5340 = vmatprep.subr.bf16.mxu0 %v5812_v23  ;;  %v4176_v23 = vrot.slane %v4081_v25, 6 }
0x5329   :  { %5342 = vmatpush3.bf16.msra.mxu0 %v6422_v40 }
0x53f7   :  { %v4162_v33 = vpop.f32.mrb[40].mxu0 }
0x53f8   :  { %v4167_v22 = vrot.slane %v4162_v33, 6  ;;  %v5090_v34 = vpop.f32.mrb[41].mxu0 }
0x53fa   :  { %v4169_v51 = vadd.f32 %v4167_v22, %v6661_v8 }
0x53fc   :  { %5545 = vtanh.f32 %v4169_v51  ;;  %v4170_v36 = vmul.f32 0.5, %v4169_v51 }
0x53fe   :  { %5547 = vtanh.f32 %v4170_v36 }
0x5406   :  { %v5546_v10 = vpop.eup %5545 }
0x5407   :  { %4180 = vrot.lane.b32.xlu1 %v5546_v10, %s5810_s11 }
0x5408   :  { %v5548_v37 = vpop.eup %5547 }
0x5409   :  { %v4172_v18 = vadd.f32 1.0, %v5548_v37 }
0x540b   :  { %v4173_v48 = vmul.f32 0.5, %v4172_v18 }
0x540d   :  { %v4178_v40 = vmul.f32 %v4176_v23, %v4173_v48 }
0x5479   :  { %v4181_v38 = vpop.permute.xlu1 %4180 }
0x547a   :  { %v4183_v0 = vmul.f32 %v4181_v38, %v4173_v48 }
0x547c   :  { %4185 = vrot.lane.b32.xlu0 %v4183_v0, %s5813_s30 }
0x54ee   :  { %v4186_v39 = vpop.permute.xlu0 %4185 }
0x54ef   :  { %v4188_v41 = vadd.f32 %v4186_v39, %v4178_v40 }
0x54f1   :  { %5549 = vtanh.f32 %v4188_v41  ;;  %v4286_v1 = vrot.slane %v4188_v41, 6 }
0x54fb   :  { %v5550_v43 = vpop.eup %5549 }
0x54fc   :  { %4191 = vrot.lane.b32.xlu1 %v5550_v43, %s5810_s11 }
0x556e   :  { %v4192_v44 = vpop.permute.xlu1 %4191 }
0x556f   :  { %v6682_v46 = vmul.f32 %v4192_v44, %v4173_v48 }
0x5571   :  { %v4201_v47 = vrot.slane %v6682_v46, 2 }
0x5573   :  { %4202 = vrot.lane.b32.xlu0 %v4201_v47, %s5813_s30 }
0x55e5   :  { %v4203_v49 = vpop.permute.xlu0 %4202 }
0x55e6   :  { %5100 = vmatmul.mubr.msk.f32.vlgmr.msra.gmra.mrb[32].mxu1 %vm359_vm5, %v4203_v49 }
0x56b9   :  { %v4272_v52 = vpop.f32.mrb[32].mxu1 }
0x56ba   :  { %v4277_v3 = vrot.slane %v4272_v52, 4  ;;  %v5101_v55 = vpop.f32.mrb[33].mxu1 }
0x56bc   :  { %v4279_v56 = vadd.f32 %v4277_v3, %v6661_v8 }
0x56be   :  { %5551 = vtanh.f32 %v4279_v56  ;;  %v4280_v58 = vmul.f32 0.5, %v4279_v56 }
0x56c0   :  { %5553 = vtanh.f32 %v4280_v58 }
0x56c8   :  { %v5552_v57 = vpop.eup %5551 }
0x56c9   :  { %4290 = vrot.lane.b32.xlu1 %v5552_v57, %s5810_s11 }
0x56ca   :  { %v5554_v59 = vpop.eup %5553 }
0x56cb   :  { %v4282_v60 = vadd.f32 1.0, %v5554_v59 }
0x56cd   :  { %v4283_v61 = vmul.f32 0.5, %v4282_v60 }
0x56cf   :  { %v4288_v2 = vmul.f32 %v4286_v1, %v4283_v61 }
0x573b   :  { %v4291_v62 = vpop.permute.xlu1 %4290 }
0x573c   :  { %v4293_v63 = vmul.f32 %v4291_v62, %v4283_v61 }
0x573e   :  { %4295 = vrot.lane.b32.xlu0 %v4293_v63, %s5813_s30 }
0x57b0   :  { %v4296_v15 = vpop.permute.xlu0 %4295 }
0x57b1   :  { %v4298_v4 = vadd.f32 %v4296_v15, %v4288_v2 }
0x57b3   :  { %5555 = vtanh.f32 %v4298_v4 }
0x57bd   :  { %v5556_v31 = vpop.eup %5555 }
0x57be   :  { %4301 = vrot.lane.b32.xlu1 %v5556_v31, %s5810_s11 }
0x5830   :  { %v4302_v9 = vpop.permute.xlu1 %4301 }
0x5831   :  { %v4304_v11 = vmul.f32 %v4302_v9, %v4283_v61 }
0x5833   :  { %v4311_v54 = vrot.slane %v4304_v11, 4 }
0x5835   :  { %4312 = vrot.lane.b32.xlu0 %v4311_v54, %s5813_s30 }
0x58a7   :  { %v4313_v14 = vpop.permute.xlu0 %4312 }
0x58a8   :  { %5111 = vmatmul.mubr.msk.f32.vlgmr.msra.gmra.mrb[42].mxu0 %vm359_vm5, %v4313_v14  ;;  %vm3117_vm5 = vcmask 261126  }
0x597b   :  { %v4382_v13 = vpop.f32.mrb[42].mxu0 }
0x597c   :  { %v4387_v16 = vrot.slane %v4382_v13, 2  ;;  %v5112_v17 = vpop.f32.mrb[43].mxu0 }
0x597e   :  { %v4389_v19 = vadd.f32 %v4387_v16, %v6661_v8  ;;  %v4396_v8 = vrot.slane %v4298_v4, 6 }
0x5980   :  { %5557 = vtanh.f32 %v4389_v19  ;;  %v4390_v24 = vmul.f32 0.5, %v4389_v19 }
0x5982   :  { %5559 = vtanh.f32 %v4390_v24 }
0x598a   :  { %v5558_v21 = vpop.eup %5557 }
0x598b   :  { %4400 = vrot.lane.b32.xlu1 %v5558_v21, %s5810_s11 }
0x598c   :  { %v5560_v30 = vpop.eup %5559 }
0x598d   :  { %v4392_v29 = vadd.f32 1.0, %v5560_v30 }
0x598f   :  { %v4393_v53 = vmul.f32 0.5, %v4392_v29 }
0x5991   :  { %v4398_v28 = vmul.f32 %v4396_v8, %v4393_v53 }
0x59fd   :  { %v4401_v25 = vpop.permute.xlu1 %4400 }
0x59fe   :  { %v4403_v27 = vmul.f32 %v4401_v25, %v4393_v53 }
0x5a00   :  { %4405 = vrot.lane.b32.xlu0 %v4403_v27, %s5813_s30 }
0x5a04   :  { %2891 = vrot.lane.b32.xlu0 %v6489_v26, %s5813_s30 }
0x5a08   :  { %3113 = vrot.lane.b32.xlu0 %v6519_v6, %s5813_s30 }
0x5a0c   :  { %3438 = vrot.lane.b32.xlu0 %v6569_v12, %s5813_s30 }
0x5a10   :  { %3762 = vrot.lane.b32.xlu0 %v6619_v20, %s5813_s30 }
0x5a14   :  { %3982 = vrot.lane.b32.xlu0 %v6649_v5, %s5813_s30 }
0x5a18   :  { %4306 = vrot.lane.b32.xlu0 %v4304_v11, %s5813_s30 }
0x5a72   :  { %v4406_v7 = vpop.permute.xlu0 %4405 }
0x5a73   :  { %v4408_v32 = vadd.f32 %v4406_v7, %v4398_v28 }
0x5a75   :  { %5561 = vtanh.f32 %v4408_v32 }
0x5a76   :  { %v2892_v26 = vpop.permute.xlu0 %2891 }
0x5a77   :  { %4467 = vst.msk [vmem:[%s6782_s15] sm:$0xc] %vm2895_vm0, %v2892_v26 }
0x5a7a   :  { %v3114_v6 = vpop.permute.xlu0 %3113 }
0x5a7b   :  { %4471 = vst.msk [vmem:[%s6782_s15] sm:$0xc0] %vm3117_vm5, %v3114_v6 }
0x5a7e   :  { %v3439_v12 = vpop.permute.xlu0 %3438 }
0x5a7f   :  { %v5562_v20 = vpop.eup %5561  ;;  %4477 = vst.msk [vmem:[%s6782_s15 + $0x8] sm:$0x30] %vm3006_vm6, %v3439_v12 }
0x5a80   :  { %4411 = vrot.lane.b32.xlu1 %v5562_v20, %s5810_s11 }
0x5a82   :  { %v3763_v5 = vpop.permute.xlu0 %3762 }
0x5a83   :  { %4483 = vst.msk [vmem:[%s6782_s15 + $0x10] sm:$0xc] %vm2895_vm0, %v3763_v5 }
0x5a84   :  { %3002 = vrot.lane.b32.xlu1 %v6504_v45, %s5813_s30 }
0x5a86   :  { %v3983_v33 = vpop.permute.xlu0 %3982 }
0x5a87   :  { %4487 = vst.msk [vmem:[%s6782_s15 + $0x10] sm:$0xc0] %vm3117_vm5, %v3983_v33 }
0x5a88   :  { %3328 = vrot.lane.b32.xlu1 %v6554_v50, %s5813_s30 }
0x5a8a   :  { %v4307_v22 = vpop.permute.xlu0 %4306 }
0x5a8b   :  { %4493 = vst.msk [vmem:[%s6782_s15 + $0x18] sm:$0x30] %vm3006_vm6, %v4307_v22 }
0x5a8c   :  { %3548 = vrot.lane.b32.xlu1 %v6584_v35, %s5813_s30 }
0x5a90   :  { %3872 = vrot.lane.b32.xlu1 %v6634_v42, %s5813_s30 }
0x5a94   :  { %4196 = vrot.lane.b32.xlu1 %v6682_v46, %s5813_s30 }
0x5af2   :  { %v4412_v45 = vpop.permute.xlu1 %4411 }
0x5af3   :  { %v4414_v34 = vmul.f32 %v4412_v45, %v4393_v53 }
0x5af5   :  { %4416 = vrot.lane.b32.xlu1 %v4414_v34, %s5813_s30 }
0x5af6   :  { %v3003_v50 = vpop.permute.xlu1 %3002 }
0x5af7   :  { %4469 = vst.msk [vmem:[%s6782_s15] sm:$0x30] %vm3006_vm6, %v3003_v50 }
0x5afa   :  { %v3329_v51 = vpop.permute.xlu1 %3328 }
0x5afb   :  { %4475 = vst.msk [vmem:[%s6782_s15 + $0x8] sm:$0xc] %vm2895_vm0, %v3329_v51 }
0x5afe   :  { %v3549_v35 = vpop.permute.xlu1 %3548 }
0x5aff   :  { %4479 = vst.msk [vmem:[%s6782_s15 + $0x8] sm:$0xc0] %vm3117_vm5, %v3549_v35 }
0x5b02   :  { %v3873_v42 = vpop.permute.xlu1 %3872 }
0x5b03   :  { %4485 = vst.msk [vmem:[%s6782_s15 + $0x10] sm:$0x30] %vm3006_vm6, %v3873_v42 }
0x5b06   :  { %v4197_v10 = vpop.permute.xlu1 %4196 }
0x5b07   :  { %4491 = vst.msk [vmem:[%s6782_s15 + $0x18] sm:$0xc] %vm2895_vm0, %v4197_v10 }
0x5b67   :  { %v4417_v36 = vpop.permute.xlu1 %4416 }
0x5b68   :  { %4495 = vst.msk [vmem:[%s6782_s15 + $0x18] sm:$0xc0] %vm3117_vm5, %v4417_v36 }
0x5b69   :  { %4425 = vsyncpa [#allocation3], 1 }
0x5b6a   :  { %4426 = vsyncpa [#allocation5], 1 }
0x5b6b   :  { %4427 = vsyncpa [#allocation8], 1 }
0x5b6c   :  { %4428 = vsyncpa [#allocation11], 1 }
0x5b6d   :  { %4429 = vsyncpa [#allocation14], 1 }
0x5b6e   :  { %4430 = vsyncpa [#allocation17], 1 }

</bundles_post_ra>
